<compile_context>
chip_gen: v5e
topology: v5e:2x2
jax: 0.10.0
libtpu: 0.0.40
codegen_flags: <defaults>
</compile_context>

<pallas_src>
import functools

import jax
import jax.numpy as jnp
from jax.experimental import pallas as pl
from jax.experimental.pallas import tpu as pltpu

NEG_SLOPE = 0.2
BN_EPS = 1e-5
TILE_M = 512                      # conv row tile (multiple of 16 for bf16 tiles)
BN_TILE_PREFS = (1024, 512, 256, 128, 64, 32, 16)


def _round_up(x, m):
    return ((x + m - 1) // m) * m


def _pick_tile(mp):
    for t in BN_TILE_PREFS:
        if mp % t == 0:
            return t
    return mp


# ----------------------------- Pallas kernels ------------------------------ #

def _conv_kernel(p_ref, w_ref, b_ref, *out_refs, leaky, with_stats):
    """One (TILE_M, K) x (K, OC) MXU tile: out = patches @ w + bias, optional
    fused LeakyReLU(0.2).  Optionally emits per-tile channel sum / sum-of-squares
    (f32, pre-activation) for a downstream BatchNorm."""
    o_ref = out_refs[0]
    acc = jnp.dot(p_ref[...], w_ref[...], preferred_element_type=jnp.float32)
    acc = acc + b_ref[...]                                   # (TM, OC) + (1, OC)
    if with_stats:
        sum_ref, sq_ref = out_refs[1], out_refs[2]           # views (1, 1, OC)
        sum_ref[0] = jnp.sum(acc, axis=0, keepdims=True)
        sq_ref[0] = jnp.sum(acc * acc, axis=0, keepdims=True)
    if leaky:
        acc = jnp.where(acc >= 0.0, acc, NEG_SLOPE * acc)
    o_ref[...] = acc.astype(o_ref.dtype)


def _bn_lrelu_kernel(x_ref, scale_ref, shift_ref, o_ref):
    """out = LeakyReLU(x * scale + shift); per-channel f32 scale/shift."""
    y = x_ref[...].astype(jnp.float32) * scale_ref[...] + shift_ref[...]
    o_ref[...] = jnp.where(y >= 0.0, y, NEG_SLOPE * y).astype(o_ref.dtype)


# ------------------------------- JAX glue ----------------------------------- #

def _im2col_nhwc(x, kh, kw, stride, pad):
    """x: NHWC -> patches (N*OH*OW, KH*KW*C); K ordered (kh, kw, c) and channels
    stay in the (lane) minor dim — no transposes."""
    N, H, W, C = x.shape
    xp = jnp.pad(x, ((0, 0), (pad, pad), (pad, pad), (0, 0)))
    OH = (H + 2 * pad - kh) // stride + 1
    OW = (W + 2 * pad - kw) // stride + 1
    cols = []
    for i in range(kh):
        for j in range(kw):
            cols.append(xp[:, i:i + stride * OH:stride, j:j + stride * OW:stride, :])
    p = jnp.concatenate(cols, axis=-1)                        # (N, OH, OW, KH*KW*C)
    return p.reshape(N * OH * OW, kh * kw * C), OH, OW


def _conv_flat(x, weight, bias, stride, pad, *, leaky, with_stats, out_dtype):
    """im2col + tiled Pallas matmul.  Returns padded flat output (Mp, OCp),
    optional per-tile stats, output spatial dims, M, OC, OCp."""
    OC, IC, KH, KW = weight.shape
    N, H, W, C = x.shape
    assert C == IC, (C, IC)

    patches, OH, OW = _im2col_nhwc(x, KH, KW, stride, pad)    # (M, K)
    M, K = patches.shape

    Kp = _round_up(K, 128)                                    # lane-align contraction dim
    OCp = OC if OC % 8 == 0 else _round_up(OC, 128)           # pads only the final OC=1 conv
    tile_m = min(TILE_M, _round_up(M, 16))
    Mp = _round_up(M, tile_m)
    num_tiles = Mp // tile_m

    patches = jnp.pad(patches, ((0, Mp - M), (0, Kp - K))).astype(jnp.bfloat16)
    w2 = weight.transpose(2, 3, 1, 0).reshape(K, OC)          # (kh, kw, ic) -> rows of K
    w2 = jnp.pad(w2.astype(jnp.float32), ((0, Kp - K), (0, OCp - OC))).astype(jnp.bfloat16)
    b = bias if bias is not None else jnp.zeros((OC,), jnp.float32)
    b2 = jnp.pad(b.astype(jnp.float32), (0, OCp - OC)).reshape(1, OCp)

    out_shape = [jax.ShapeDtypeStruct((Mp, OCp), out_dtype)]
    out_specs = [pl.BlockSpec((tile_m, OCp), lambda i: (i, 0))]
    if with_stats:
        out_shape += [jax.ShapeDtypeStruct((num_tiles, 1, OCp), jnp.float32)] * 2
        out_specs += [pl.BlockSpec((1, 1, OCp), lambda i: (i, 0, 0))] * 2

    bytes_accessed = int(Mp * Kp * 2 + Kp * OCp * 2
                         + Mp * OCp * jnp.dtype(out_dtype).itemsize
                         + (2 * num_tiles * OCp * 4 if with_stats else 0))
    cost = pl.CostEstimate(flops=int(2 * Mp * Kp * OCp), transcendentals=0,
                           bytes_accessed=bytes_accessed)

    res = pl.pallas_call(
        functools.partial(_conv_kernel, leaky=leaky, with_stats=with_stats),
        out_shape=tuple(out_shape),
        grid=(num_tiles,),
        in_specs=[
            pl.BlockSpec((tile_m, Kp), lambda i: (i, 0)),     # patches tile (bf16)
            pl.BlockSpec((Kp, OCp), lambda i: (0, 0)),        # weights, VMEM-resident
            pl.BlockSpec((1, OCp), lambda i: (0, 0)),         # bias (f32)
        ],
        out_specs=tuple(out_specs),
        compiler_params=pltpu.CompilerParams(dimension_semantics=("parallel",)),
        cost_estimate=cost,
    )(patches, w2, b2)

    if with_stats:
        out_flat, ssum, ssq = res
    else:
        (out_flat,) = res
        ssum = ssq = None
    return out_flat, (ssum, ssq), (N, OH, OW), M, OC, OCp


def _bn_affine_from_stats(ssum_tiles, ssq_tiles, m_real, m_pad, bias, gamma, beta, oc):
    """Batch mean / biased var from kernel-emitted per-tile sums, corrected for the
    zero-padded patch rows (each padded row contributes exactly `bias`)."""
    ssum = jnp.sum(ssum_tiles, axis=(0, 1))[:oc]
    ssq = jnp.sum(ssq_tiles, axis=(0, 1))[:oc]
    n_pad = float(m_pad - m_real)
    b = (bias if bias is not None else jnp.zeros((oc,), jnp.float32)).astype(jnp.float32)
    ssum = ssum - n_pad * b
    ssq = ssq - n_pad * b * b
    mean = ssum / float(m_real)
    var = jnp.maximum(ssq / float(m_real) - mean * mean, 0.0)   # biased var (PyTorch)
    scale = gamma.astype(jnp.float32) * jax.lax.rsqrt(var + BN_EPS)
    shift = beta.astype(jnp.float32) - mean * scale
    return scale.reshape(1, oc), shift.reshape(1, oc)


def pallas_bn_lrelu(x, scale, shift, *, out_dtype):
    Mp, C = x.shape
    tile_m = _pick_tile(Mp)
    cost = pl.CostEstimate(
        flops=int(3 * Mp * C), transcendentals=0,
        bytes_accessed=int(Mp * C * (x.dtype.itemsize + jnp.dtype(out_dtype).itemsize)
                           + 2 * C * 4))
    return pl.pallas_call(
        _bn_lrelu_kernel,
        out_shape=jax.ShapeDtypeStruct((Mp, C), out_dtype),
        grid=(Mp // tile_m,),
        in_specs=[
            pl.BlockSpec((tile_m, C), lambda i: (i, 0)),
            pl.BlockSpec((1, C), lambda i: (0, 0)),
            pl.BlockSpec((1, C), lambda i: (0, 0)),
        ],
        out_specs=pl.BlockSpec((tile_m, C), lambda i: (i, 0)),
        compiler_params=pltpu.CompilerParams(dimension_semantics=("parallel",)),
        cost_estimate=cost,
    )(x, scale, shift)


def conv_layer(x, weight, bias, *, stride, pad, leaky, out_dtype=jnp.bfloat16):
    """Conv2d (+ optional fused LeakyReLU), NHWC -> NHWC."""
    out_flat, _, (N, OH, OW), M, OC, _ = _conv_flat(
        x, weight, bias, stride, pad, leaky=leaky, with_stats=False, out_dtype=out_dtype)
    return out_flat[:M, :OC].reshape(N, OH, OW, OC)


def conv_bn_lrelu_layer(x, weight, bias, gamma, beta, *, stride, pad):
    """Conv2d + BatchNorm2d (training-mode batch stats) + LeakyReLU, NHWC -> NHWC."""
    out_flat, (ssum, ssq), (N, OH, OW), M, OC, OCp = _conv_flat(
        x, weight, bias, stride, pad, leaky=False, with_stats=True,
        out_dtype=jnp.bfloat16)
    assert OCp == OC, (OCp, OC)              # BN layers already have lane-friendly OC
    Mp = out_flat.shape[0]
    scale, shift = _bn_affine_from_stats(ssum, ssq, M, Mp, bias, gamma, beta, OC)
    y = pallas_bn_lrelu(out_flat, scale, shift, out_dtype=jnp.bfloat16)
    return y[:M].reshape(N, OH, OW, OC)


def discriminator_forward(params, img_A, img_B):
    # Module boundary is NCHW (PyTorch convention); internals run NHWC in bf16.
    x = jnp.concatenate((img_A, img_B), axis=1)                   # (N, 6, H, W)
    x = x.transpose(0, 2, 3, 1).astype(jnp.bfloat16)              # NHWC

    # block 1: Conv(6->32, k4, s2, p1) + LeakyReLU (fused in kernel), no BN
    x = conv_layer(x, params["w1"], params["b1"], stride=2, pad=1, leaky=True)

    # blocks 2-4: Conv + BN (batch stats fused into conv pass) + LeakyReLU
    x = conv_bn_lrelu_layer(x, params["w2"], params["b2"], params["g2"], params["be2"],
                            stride=2, pad=1)
    x = conv_bn_lrelu_layer(x, params["w3"], params["b3"], params["g3"], params["be3"],
                            stride=2, pad=1)
    x = conv_bn_lrelu_layer(x, params["w4"], params["b4"], params["g4"], params["be4"],
                            stride=2, pad=1)

    # ZeroPad2d((left=1, right=0, top=1, bottom=0)) in NHWC
    x = jnp.pad(x, ((0, 0), (1, 0), (1, 0), (0, 0)))

    # final Conv(256->1, k4, s1, p1, bias=False); OC padded to 128 inside the
    # kernel path for lane-dense stores and sliced back in conv_layer.
    x = conv_layer(x, params["w5"], None, stride=1, pad=1, leaky=False,
                   out_dtype=jnp.float32)

    return x.transpose(0, 3, 1, 2)                                # back to NCHW


def init_params(key):
    ks = jax.random.split(key, 16)

    def conv_w(k, oc, ic):
        return 0.02 * jax.random.normal(k, (oc, ic, 4, 4), jnp.float32)

    def vec(k, n, scale=0.01):
        return scale * jax.random.normal(k, (n,), jnp.float32)

    return {
        "w1": conv_w(ks[0], 32, 6),   "b1": vec(ks[1], 32),
        "w2": conv_w(ks[2], 64, 32),  "b2": vec(ks[3], 64),
        "g2": 1.0 + vec(ks[4], 64, 0.1),  "be2": vec(ks[5], 64, 0.1),
        "w3": conv_w(ks[6], 128, 64), "b3": vec(ks[7], 128),
        "g3": 1.0 + vec(ks[8], 128, 0.1), "be3": vec(ks[9], 128, 0.1),
        "w4": conv_w(ks[10], 256, 128), "b4": vec(ks[11], 256),
        "g4": 1.0 + vec(ks[12], 256, 0.1), "be4": vec(ks[13], 256, 0.1),
        "w5": conv_w(ks[14], 1, 256),
    }


if __name__ == "__main__":
    key = jax.random.PRNGKey(0)
    k_p, k_a, k_b = jax.random.split(key, 3)

    params = init_params(k_p)
    img_A = jax.random.normal(k_a, (2, 3, 16, 16), jnp.float32)
    img_B = jax.random.normal(k_b, (2, 3, 16, 16), jnp.float32)

    fwd = jax.jit(discriminator_forward)
    out = fwd(params, img_A, img_B)
    out = jax.block_until_ready(out)

    assert out.shape == (2, 1, 1, 1), out.shape
    assert bool(jnp.all(jnp.isfinite(out))), "non-finite output"
    print("KERNEL_OK")
</pallas_src>

<mosaic_0001>
module attributes {stable_mosaic.version = 11 : i64} {
  func.func @_conv_kernel(%arg0: i32, %arg1: memref<128x128xbf16, #tpu.memory_space<vmem>>, %arg2: memref<128x32xbf16, #tpu.memory_space<vmem>>, %arg3: memref<1x32xf32, #tpu.memory_space<vmem>>, %arg4: memref<128x32xbf16, #tpu.memory_space<vmem>>) attributes {dimension_semantics = [#tpu.dimension_semantics<parallel>], iteration_bounds = array<i64: 1>, scalar_prefetch = 0 : i64, scratch_operands = 0 : i64, tpu.core_type = #tpu.core_type<tc>, window_params = [{transform_indices = @transform_0, window_bounds = array<i64: 128, 128>}, {pipeline_mode = #tpu.pipeline_mode<synchronous>, transform_indices = @transform_1, window_bounds = array<i64: 128, 32>}, {pipeline_mode = #tpu.pipeline_mode<synchronous>, transform_indices = @transform_2, window_bounds = array<i64: 1, 32>}, {transform_indices = @transform_3, window_bounds = array<i64: 128, 32>}]} {
    %c0 = arith.constant 0 : index
    %c0_0 = arith.constant 0 : index
    %0 = vector.load %arg1[%c0, %c0_0] : memref<128x128xbf16, #tpu.memory_space<vmem>>, vector<128x128xbf16>
    %c0_1 = arith.constant 0 : index
    %c0_2 = arith.constant 0 : index
    %1 = vector.load %arg2[%c0_1, %c0_2] : memref<128x32xbf16, #tpu.memory_space<vmem>>, vector<128x32xbf16>
    %cst = arith.constant dense<0.000000e+00> : vector<128x32xf32>
    %2 = tpu.matmul %0, %1, %cst {dimension_numbers = #tpu.dot_dimension_numbers<[1], [0], [0], [1], [0, 0, 1, 1], [], []>} : vector<128x128xbf16>, vector<128x32xbf16>, vector<128x32xf32> -> vector<128x32xf32>
    %c0_3 = arith.constant 0 : index
    %c0_4 = arith.constant 0 : index
    %3 = vector.load %arg3[%c0_3, %c0_4] : memref<1x32xf32, #tpu.memory_space<vmem>>, vector<1x32xf32>
    %4 = vector.broadcast %3 : vector<1x32xf32> to vector<128x32xf32>
    %5 = arith.addf %2, %4 : vector<128x32xf32>
    %cst_5 = arith.constant 0.000000e+00 : f32
    %6 = vector.broadcast %cst_5 : f32 to vector<128x32xf32>
    %7 = arith.cmpf oge, %5, %6 : vector<128x32xf32>
    %cst_6 = arith.constant 2.000000e-01 : f32
    %8 = vector.broadcast %cst_6 : f32 to vector<128x32xf32>
    %9 = arith.mulf %8, %5 : vector<128x32xf32>
    %10 = arith.select %7, %5, %9 : vector<128x32xi1>, vector<128x32xf32>
    %11 = arith.truncf %10 : vector<128x32xf32> to vector<128x32xbf16>
    %c0_7 = arith.constant 0 : index
    %c0_8 = arith.constant 0 : index
    %12 = vector.load %arg4[%c0_7, %c0_8] : memref<128x32xbf16, #tpu.memory_space<vmem>>, vector<128x32xbf16>
    tpu.vector_store %arg4[%c0_7, %c0_8], %11 {strides = array<i32>} : memref<128x32xbf16, #tpu.memory_space<vmem>>, vector<128x32xbf16>,
    return
  }
  func.func @transform_0(%arg0: i32) -> (i32, i32) {
    %c0_i32 = arith.constant 0 : i32
    %c0_i32_0 = arith.constant 0 : i32
    return %arg0, %c0_i32 : i32, i32
  }
  func.func @transform_1(%arg0: i32) -> (i32, i32) {
    %c0_i32 = arith.constant 0 : i32
    %c0_i32_0 = arith.constant 0 : i32
    %c0_i32_1 = arith.constant 0 : i32
    return %c0_i32, %c0_i32_0 : i32, i32
  }
  func.func @transform_2(%arg0: i32) -> (i32, i32) {
    %c0_i32 = arith.constant 0 : i32
    %c0_i32_0 = arith.constant 0 : i32
    %c0_i32_1 = arith.constant 0 : i32
    return %c0_i32, %c0_i32_0 : i32, i32
  }
  func.func @transform_3(%arg0: i32) -> (i32, i32) {
    %c0_i32 = arith.constant 0 : i32
    %c0_i32_0 = arith.constant 0 : i32
    return %arg0, %c0_i32 : i32, i32
  }
}

module attributes {stable_mosaic.version = 11 : i64} {
  func.func @_conv_kernel(%arg0: i32, %arg1: memref<32x512xbf16, #tpu.memory_space<vmem>>, %arg2: memref<512x64xbf16, #tpu.memory_space<vmem>>, %arg3: memref<1x64xf32, #tpu.memory_space<vmem>>, %arg4: memref<32x64xbf16, #tpu.memory_space<vmem>>, %arg5: memref<1x1x64xf32, #tpu.memory_space<vmem>>, %arg6: memref<1x1x64xf32, #tpu.memory_space<vmem>>) attributes {dimension_semantics = [#tpu.dimension_semantics<parallel>], iteration_bounds = array<i64: 1>, scalar_prefetch = 0 : i64, scratch_operands = 0 : i64, tpu.core_type = #tpu.core_type<tc>, window_params = [{transform_indices = @transform_0, window_bounds = array<i64: 32, 512>}, {pipeline_mode = #tpu.pipeline_mode<synchronous>, transform_indices = @transform_1, window_bounds = array<i64: 512, 64>}, {pipeline_mode = #tpu.pipeline_mode<synchronous>, transform_indices = @transform_2, window_bounds = array<i64: 1, 64>}, {transform_indices = @transform_3, window_bounds = array<i64: 32, 64>}, {transform_indices = @transform_4, window_bounds = array<i64: 1, 1, 64>}, {transform_indices = @transform_5, window_bounds = array<i64: 1, 1, 64>}]} {
    %c0 = arith.constant 0 : index
    %c0_0 = arith.constant 0 : index
    %0 = vector.load %arg1[%c0, %c0_0] : memref<32x512xbf16, #tpu.memory_space<vmem>>, vector<32x512xbf16>
    %c0_1 = arith.constant 0 : index
    %c0_2 = arith.constant 0 : index
    %1 = vector.load %arg2[%c0_1, %c0_2] : memref<512x64xbf16, #tpu.memory_space<vmem>>, vector<512x64xbf16>
    %cst = arith.constant dense<0.000000e+00> : vector<32x64xf32>
    %2 = tpu.matmul %0, %1, %cst {dimension_numbers = #tpu.dot_dimension_numbers<[1], [0], [0], [1], [0, 0, 1, 1], [], []>} : vector<32x512xbf16>, vector<512x64xbf16>, vector<32x64xf32> -> vector<32x64xf32>
    %c0_3 = arith.constant 0 : index
    %c0_4 = arith.constant 0 : index
    %3 = vector.load %arg3[%c0_3, %c0_4] : memref<1x64xf32, #tpu.memory_space<vmem>>, vector<1x64xf32>
    %4 = vector.broadcast %3 : vector<1x64xf32> to vector<32x64xf32>
    %5 = arith.addf %2, %4 : vector<32x64xf32>
    %cst_5 = arith.constant dense<0.000000e+00> : vector<64xf32>
    %6 = vector.multi_reduction <add>, %5, %cst_5 [0] : vector<32x64xf32> to vector<64xf32>
    %7 = vector.shape_cast %6 : vector<64xf32> to vector<1x64xf32>
    %c0_6 = arith.constant 0 : index
    %c0_7 = arith.constant 0 : index
    %c0_8 = arith.constant 0 : index
    %8 = vector.load %arg5[%c0_6, %c0_7, %c0_8] : memref<1x1x64xf32, #tpu.memory_space<vmem>>, vector<1x1x64xf32>
    %9 = vector.shape_cast %8 : vector<1x1x64xf32> to vector<1x64xf32>
    %10 = vector.shape_cast %7 : vector<1x64xf32> to vector<1x1x64xf32>
    tpu.vector_store %arg5[%c0_6, %c0_7, %c0_8], %10 {strides = array<i32>} : memref<1x1x64xf32, #tpu.memory_space<vmem>>, vector<1x1x64xf32>,
    %11 = arith.mulf %5, %5 : vector<32x64xf32>
    %cst_9 = arith.constant dense<0.000000e+00> : vector<64xf32>
    %12 = vector.multi_reduction <add>, %11, %cst_9 [0] : vector<32x64xf32> to vector<64xf32>
    %13 = vector.shape_cast %12 : vector<64xf32> to vector<1x64xf32>
    %c0_10 = arith.constant 0 : index
    %c0_11 = arith.constant 0 : index
    %c0_12 = arith.constant 0 : index
    %14 = vector.load %arg6[%c0_10, %c0_11, %c0_12] : memref<1x1x64xf32, #tpu.memory_space<vmem>>, vector<1x1x64xf32>
    %15 = vector.shape_cast %14 : vector<1x1x64xf32> to vector<1x64xf32>
    %16 = vector.shape_cast %13 : vector<1x64xf32> to vector<1x1x64xf32>
    tpu.vector_store %arg6[%c0_10, %c0_11, %c0_12], %16 {strides = array<i32>} : memref<1x1x64xf32, #tpu.memory_space<vmem>>, vector<1x1x64xf32>,
    %17 = arith.truncf %5 : vector<32x64xf32> to vector<32x64xbf16>
    %c0_13 = arith.constant 0 : index
    %c0_14 = arith.constant 0 : index
    %18 = vector.load %arg4[%c0_13, %c0_14] : memref<32x64xbf16, #tpu.memory_space<vmem>>, vector<32x64xbf16>
    tpu.vector_store %arg4[%c0_13, %c0_14], %17 {strides = array<i32>} : memref<32x64xbf16, #tpu.memory_space<vmem>>, vector<32x64xbf16>,
    return
  }
  func.func @transform_0(%arg0: i32) -> (i32, i32) {
    %c0_i32 = arith.constant 0 : i32
    %c0_i32_0 = arith.constant 0 : i32
    return %arg0, %c0_i32 : i32, i32
  }
  func.func @transform_1(%arg0: i32) -> (i32, i32) {
    %c0_i32 = arith.constant 0 : i32
    %c0_i32_0 = arith.constant 0 : i32
    %c0_i32_1 = arith.constant 0 : i32
    return %c0_i32, %c0_i32_0 : i32, i32
  }
  func.func @transform_2(%arg0: i32) -> (i32, i32) {
    %c0_i32 = arith.constant 0 : i32
    %c0_i32_0 = arith.constant 0 : i32
    %c0_i32_1 = arith.constant 0 : i32
    return %c0_i32, %c0_i32_0 : i32, i32
  }
  func.func @transform_3(%arg0: i32) -> (i32, i32) {
    %c0_i32 = arith.constant 0 : i32
    %c0_i32_0 = arith.constant 0 : i32
    return %arg0, %c0_i32 : i32, i32
  }
  func.func @transform_4(%arg0: i32) -> (i32, i32, i32) {
    %c0_i32 = arith.constant 0 : i32
    %c0_i32_0 = arith.constant 0 : i32
    %c0_i32_1 = arith.constant 0 : i32
    return %arg0, %c0_i32, %c0_i32_0 : i32, i32, i32
  }
  func.func @transform_5(%arg0: i32) -> (i32, i32, i32) {
    %c0_i32 = arith.constant 0 : i32
    %c0_i32_0 = arith.constant 0 : i32
    %c0_i32_1 = arith.constant 0 : i32
    return %arg0, %c0_i32, %c0_i32_0 : i32, i32, i32
  }
}

module attributes {stable_mosaic.version = 11 : i64} {
  func.func @_bn_lrelu_kernel(%arg0: i32, %arg1: memref<32x64xbf16, #tpu.memory_space<vmem>>, %arg2: memref<1x64xf32, #tpu.memory_space<vmem>>, %arg3: memref<1x64xf32, #tpu.memory_space<vmem>>, %arg4: memref<32x64xbf16, #tpu.memory_space<vmem>>) attributes {dimension_semantics = [#tpu.dimension_semantics<parallel>], iteration_bounds = array<i64: 1>, scalar_prefetch = 0 : i64, scratch_operands = 0 : i64, tpu.core_type = #tpu.core_type<tc>, window_params = [{transform_indices = @transform_0, window_bounds = array<i64: 32, 64>}, {pipeline_mode = #tpu.pipeline_mode<synchronous>, transform_indices = @transform_1, window_bounds = array<i64: 1, 64>}, {pipeline_mode = #tpu.pipeline_mode<synchronous>, transform_indices = @transform_2, window_bounds = array<i64: 1, 64>}, {transform_indices = @transform_3, window_bounds = array<i64: 32, 64>}]} {
    %c0 = arith.constant 0 : index
    %c0_0 = arith.constant 0 : index
    %0 = vector.load %arg1[%c0, %c0_0] : memref<32x64xbf16, #tpu.memory_space<vmem>>, vector<32x64xbf16>
    %1 = arith.extf %0 : vector<32x64xbf16> to vector<32x64xf32>
    %c0_1 = arith.constant 0 : index
    %c0_2 = arith.constant 0 : index
    %2 = vector.load %arg2[%c0_1, %c0_2] : memref<1x64xf32, #tpu.memory_space<vmem>>, vector<1x64xf32>
    %3 = vector.broadcast %2 : vector<1x64xf32> to vector<32x64xf32>
    %4 = arith.mulf %1, %3 : vector<32x64xf32>
    %c0_3 = arith.constant 0 : index
    %c0_4 = arith.constant 0 : index
    %5 = vector.load %arg3[%c0_3, %c0_4] : memref<1x64xf32, #tpu.memory_space<vmem>>, vector<1x64xf32>
    %6 = vector.broadcast %5 : vector<1x64xf32> to vector<32x64xf32>
    %7 = arith.addf %4, %6 : vector<32x64xf32>
    %cst = arith.constant 0.000000e+00 : f32
    %8 = vector.broadcast %cst : f32 to vector<32x64xf32>
    %9 = arith.cmpf oge, %7, %8 : vector<32x64xf32>
    %cst_5 = arith.constant 2.000000e-01 : f32
    %10 = vector.broadcast %cst_5 : f32 to vector<32x64xf32>
    %11 = arith.mulf %10, %7 : vector<32x64xf32>
    %12 = arith.select %9, %7, %11 : vector<32x64xi1>, vector<32x64xf32>
    %13 = arith.truncf %12 : vector<32x64xf32> to vector<32x64xbf16>
    %c0_6 = arith.constant 0 : index
    %c0_7 = arith.constant 0 : index
    %14 = vector.load %arg4[%c0_6, %c0_7] : memref<32x64xbf16, #tpu.memory_space<vmem>>, vector<32x64xbf16>
    tpu.vector_store %arg4[%c0_6, %c0_7], %13 {strides = array<i32>} : memref<32x64xbf16, #tpu.memory_space<vmem>>, vector<32x64xbf16>,
    return
  }
  func.func @transform_0(%arg0: i32) -> (i32, i32) {
    %c0_i32 = arith.constant 0 : i32
    %c0_i32_0 = arith.constant 0 : i32
    return %arg0, %c0_i32 : i32, i32
  }
  func.func @transform_1(%arg0: i32) -> (i32, i32) {
    %c0_i32 = arith.constant 0 : i32
    %c0_i32_0 = arith.constant 0 : i32
    %c0_i32_1 = arith.constant 0 : i32
    return %c0_i32, %c0_i32_0 : i32, i32
  }
  func.func @transform_2(%arg0: i32) -> (i32, i32) {
    %c0_i32 = arith.constant 0 : i32
    %c0_i32_0 = arith.constant 0 : i32
    %c0_i32_1 = arith.constant 0 : i32
    return %c0_i32, %c0_i32_0 : i32, i32
  }
  func.func @transform_3(%arg0: i32) -> (i32, i32) {
    %c0_i32 = arith.constant 0 : i32
    %c0_i32_0 = arith.constant 0 : i32
    return %arg0, %c0_i32 : i32, i32
  }
}

module attributes {stable_mosaic.version = 11 : i64} {
  func.func @_conv_kernel(%arg0: i32, %arg1: memref<16x1024xbf16, #tpu.memory_space<vmem>>, %arg2: memref<1024x128xbf16, #tpu.memory_space<vmem>>, %arg3: memref<1x128xf32, #tpu.memory_space<vmem>>, %arg4: memref<16x128xbf16, #tpu.memory_space<vmem>>, %arg5: memref<1x1x128xf32, #tpu.memory_space<vmem>>, %arg6: memref<1x1x128xf32, #tpu.memory_space<vmem>>) attributes {dimension_semantics = [#tpu.dimension_semantics<parallel>], iteration_bounds = array<i64: 1>, scalar_prefetch = 0 : i64, scratch_operands = 0 : i64, tpu.core_type = #tpu.core_type<tc>, window_params = [{transform_indices = @transform_0, window_bounds = array<i64: 16, 1024>}, {pipeline_mode = #tpu.pipeline_mode<synchronous>, transform_indices = @transform_1, window_bounds = array<i64: 1024, 128>}, {pipeline_mode = #tpu.pipeline_mode<synchronous>, transform_indices = @transform_2, window_bounds = array<i64: 1, 128>}, {transform_indices = @transform_3, window_bounds = array<i64: 16, 128>}, {transform_indices = @transform_4, window_bounds = array<i64: 1, 1, 128>}, {transform_indices = @transform_5, window_bounds = array<i64: 1, 1, 128>}]} {
    %c0 = arith.constant 0 : index
    %c0_0 = arith.constant 0 : index
    %0 = vector.load %arg1[%c0, %c0_0] : memref<16x1024xbf16, #tpu.memory_space<vmem>>, vector<16x1024xbf16>
    %c0_1 = arith.constant 0 : index
    %c0_2 = arith.constant 0 : index
    %1 = vector.load %arg2[%c0_1, %c0_2] : memref<1024x128xbf16, #tpu.memory_space<vmem>>, vector<1024x128xbf16>
    %cst = arith.constant dense<0.000000e+00> : vector<16x128xf32>
    %2 = tpu.matmul %0, %1, %cst {dimension_numbers = #tpu.dot_dimension_numbers<[1], [0], [0], [1], [0, 0, 1, 1], [], []>} : vector<16x1024xbf16>, vector<1024x128xbf16>, vector<16x128xf32> -> vector<16x128xf32>
    %c0_3 = arith.constant 0 : index
    %c0_4 = arith.constant 0 : index
    %3 = vector.load %arg3[%c0_3, %c0_4] : memref<1x128xf32, #tpu.memory_space<vmem>>, vector<1x128xf32>
    %4 = vector.broadcast %3 : vector<1x128xf32> to vector<16x128xf32>
    %5 = arith.addf %2, %4 : vector<16x128xf32>
    %cst_5 = arith.constant dense<0.000000e+00> : vector<128xf32>
    %6 = vector.multi_reduction <add>, %5, %cst_5 [0] : vector<16x128xf32> to vector<128xf32>
    %7 = vector.shape_cast %6 : vector<128xf32> to vector<1x128xf32>
    %c0_6 = arith.constant 0 : index
    %c0_7 = arith.constant 0 : index
    %c0_8 = arith.constant 0 : index
    %8 = vector.load %arg5[%c0_6, %c0_7, %c0_8] : memref<1x1x128xf32, #tpu.memory_space<vmem>>, vector<1x1x128xf32>
    %9 = vector.shape_cast %8 : vector<1x1x128xf32> to vector<1x128xf32>
    %10 = vector.shape_cast %7 : vector<1x128xf32> to vector<1x1x128xf32>
    tpu.vector_store %arg5[%c0_6, %c0_7, %c0_8], %10 {strides = array<i32>} : memref<1x1x128xf32, #tpu.memory_space<vmem>>, vector<1x1x128xf32>,
    %11 = arith.mulf %5, %5 : vector<16x128xf32>
    %cst_9 = arith.constant dense<0.000000e+00> : vector<128xf32>
    %12 = vector.multi_reduction <add>, %11, %cst_9 [0] : vector<16x128xf32> to vector<128xf32>
    %13 = vector.shape_cast %12 : vector<128xf32> to vector<1x128xf32>
    %c0_10 = arith.constant 0 : index
    %c0_11 = arith.constant 0 : index
    %c0_12 = arith.constant 0 : index
    %14 = vector.load %arg6[%c0_10, %c0_11, %c0_12] : memref<1x1x128xf32, #tpu.memory_space<vmem>>, vector<1x1x128xf32>
    %15 = vector.shape_cast %14 : vector<1x1x128xf32> to vector<1x128xf32>
    %16 = vector.shape_cast %13 : vector<1x128xf32> to vector<1x1x128xf32>
    tpu.vector_store %arg6[%c0_10, %c0_11, %c0_12], %16 {strides = array<i32>} : memref<1x1x128xf32, #tpu.memory_space<vmem>>, vector<1x1x128xf32>,
    %17 = arith.truncf %5 : vector<16x128xf32> to vector<16x128xbf16>
    %c0_13 = arith.constant 0 : index
    %c0_14 = arith.constant 0 : index
    %18 = vector.load %arg4[%c0_13, %c0_14] : memref<16x128xbf16, #tpu.memory_space<vmem>>, vector<16x128xbf16>
    tpu.vector_store %arg4[%c0_13, %c0_14], %17 {strides = array<i32>} : memref<16x128xbf16, #tpu.memory_space<vmem>>, vector<16x128xbf16>,
    return
  }
  func.func @transform_0(%arg0: i32) -> (i32, i32) {
    %c0_i32 = arith.constant 0 : i32
    %c0_i32_0 = arith.constant 0 : i32
    return %arg0, %c0_i32 : i32, i32
  }
  func.func @transform_1(%arg0: i32) -> (i32, i32) {
    %c0_i32 = arith.constant 0 : i32
    %c0_i32_0 = arith.constant 0 : i32
    %c0_i32_1 = arith.constant 0 : i32
    return %c0_i32, %c0_i32_0 : i32, i32
  }
  func.func @transform_2(%arg0: i32) -> (i32, i32) {
    %c0_i32 = arith.constant 0 : i32
    %c0_i32_0 = arith.constant 0 : i32
    %c0_i32_1 = arith.constant 0 : i32
    return %c0_i32, %c0_i32_0 : i32, i32
  }
  func.func @transform_3(%arg0: i32) -> (i32, i32) {
    %c0_i32 = arith.constant 0 : i32
    %c0_i32_0 = arith.constant 0 : i32
    return %arg0, %c0_i32 : i32, i32
  }
  func.func @transform_4(%arg0: i32) -> (i32, i32, i32) {
    %c0_i32 = arith.constant 0 : i32
    %c0_i32_0 = arith.constant 0 : i32
    %c0_i32_1 = arith.constant 0 : i32
    return %arg0, %c0_i32, %c0_i32_0 : i32, i32, i32
  }
  func.func @transform_5(%arg0: i32) -> (i32, i32, i32) {
    %c0_i32 = arith.constant 0 : i32
    %c0_i32_0 = arith.constant 0 : i32
    %c0_i32_1 = arith.constant 0 : i32
    return %arg0, %c0_i32, %c0_i32_0 : i32, i32, i32
  }
}

module attributes {stable_mosaic.version = 11 : i64} {
  func.func @_bn_lrelu_kernel(%arg0: i32, %arg1: memref<16x128xbf16, #tpu.memory_space<vmem>>, %arg2: memref<1x128xf32, #tpu.memory_space<vmem>>, %arg3: memref<1x128xf32, #tpu.memory_space<vmem>>, %arg4: memref<16x128xbf16, #tpu.memory_space<vmem>>) attributes {dimension_semantics = [#tpu.dimension_semantics<parallel>], iteration_bounds = array<i64: 1>, scalar_prefetch = 0 : i64, scratch_operands = 0 : i64, tpu.core_type = #tpu.core_type<tc>, window_params = [{transform_indices = @transform_0, window_bounds = array<i64: 16, 128>}, {pipeline_mode = #tpu.pipeline_mode<synchronous>, transform_indices = @transform_1, window_bounds = array<i64: 1, 128>}, {pipeline_mode = #tpu.pipeline_mode<synchronous>, transform_indices = @transform_2, window_bounds = array<i64: 1, 128>}, {transform_indices = @transform_3, window_bounds = array<i64: 16, 128>}]} {
    %c0 = arith.constant 0 : index
    %c0_0 = arith.constant 0 : index
    %0 = vector.load %arg1[%c0, %c0_0] : memref<16x128xbf16, #tpu.memory_space<vmem>>, vector<16x128xbf16>
    %1 = arith.extf %0 : vector<16x128xbf16> to vector<16x128xf32>
    %c0_1 = arith.constant 0 : index
    %c0_2 = arith.constant 0 : index
    %2 = vector.load %arg2[%c0_1, %c0_2] : memref<1x128xf32, #tpu.memory_space<vmem>>, vector<1x128xf32>
    %3 = vector.broadcast %2 : vector<1x128xf32> to vector<16x128xf32>
    %4 = arith.mulf %1, %3 : vector<16x128xf32>
    %c0_3 = arith.constant 0 : index
    %c0_4 = arith.constant 0 : index
    %5 = vector.load %arg3[%c0_3, %c0_4] : memref<1x128xf32, #tpu.memory_space<vmem>>, vector<1x128xf32>
    %6 = vector.broadcast %5 : vector<1x128xf32> to vector<16x128xf32>
    %7 = arith.addf %4, %6 : vector<16x128xf32>
    %cst = arith.constant 0.000000e+00 : f32
    %8 = vector.broadcast %cst : f32 to vector<16x128xf32>
    %9 = arith.cmpf oge, %7, %8 : vector<16x128xf32>
    %cst_5 = arith.constant 2.000000e-01 : f32
    %10 = vector.broadcast %cst_5 : f32 to vector<16x128xf32>
    %11 = arith.mulf %10, %7 : vector<16x128xf32>
    %12 = arith.select %9, %7, %11 : vector<16x128xi1>, vector<16x128xf32>
    %13 = arith.truncf %12 : vector<16x128xf32> to vector<16x128xbf16>
    %c0_6 = arith.constant 0 : index
    %c0_7 = arith.constant 0 : index
    %14 = vector.load %arg4[%c0_6, %c0_7] : memref<16x128xbf16, #tpu.memory_space<vmem>>, vector<16x128xbf16>
    tpu.vector_store %arg4[%c0_6, %c0_7], %13 {strides = array<i32>} : memref<16x128xbf16, #tpu.memory_space<vmem>>, vector<16x128xbf16>,
    return
  }
  func.func @transform_0(%arg0: i32) -> (i32, i32) {
    %c0_i32 = arith.constant 0 : i32
    %c0_i32_0 = arith.constant 0 : i32
    return %arg0, %c0_i32 : i32, i32
  }
  func.func @transform_1(%arg0: i32) -> (i32, i32) {
    %c0_i32 = arith.constant 0 : i32
    %c0_i32_0 = arith.constant 0 : i32
    %c0_i32_1 = arith.constant 0 : i32
    return %c0_i32, %c0_i32_0 : i32, i32
  }
  func.func @transform_2(%arg0: i32) -> (i32, i32) {
    %c0_i32 = arith.constant 0 : i32
    %c0_i32_0 = arith.constant 0 : i32
    %c0_i32_1 = arith.constant 0 : i32
    return %c0_i32, %c0_i32_0 : i32, i32
  }
  func.func @transform_3(%arg0: i32) -> (i32, i32) {
    %c0_i32 = arith.constant 0 : i32
    %c0_i32_0 = arith.constant 0 : i32
    return %arg0, %c0_i32 : i32, i32
  }
}

module attributes {stable_mosaic.version = 11 : i64} {
  func.func @_conv_kernel(%arg0: i32, %arg1: memref<16x2048xbf16, #tpu.memory_space<vmem>>, %arg2: memref<2048x256xbf16, #tpu.memory_space<vmem>>, %arg3: memref<1x256xf32, #tpu.memory_space<vmem>>, %arg4: memref<16x256xbf16, #tpu.memory_space<vmem>>, %arg5: memref<1x1x256xf32, #tpu.memory_space<vmem>>, %arg6: memref<1x1x256xf32, #tpu.memory_space<vmem>>) attributes {dimension_semantics = [#tpu.dimension_semantics<parallel>], iteration_bounds = array<i64: 1>, scalar_prefetch = 0 : i64, scratch_operands = 0 : i64, tpu.core_type = #tpu.core_type<tc>, window_params = [{transform_indices = @transform_0, window_bounds = array<i64: 16, 2048>}, {pipeline_mode = #tpu.pipeline_mode<synchronous>, transform_indices = @transform_1, window_bounds = array<i64: 2048, 256>}, {pipeline_mode = #tpu.pipeline_mode<synchronous>, transform_indices = @transform_2, window_bounds = array<i64: 1, 256>}, {transform_indices = @transform_3, window_bounds = array<i64: 16, 256>}, {transform_indices = @transform_4, window_bounds = array<i64: 1, 1, 256>}, {transform_indices = @transform_5, window_bounds = array<i64: 1, 1, 256>}]} {
    %c0 = arith.constant 0 : index
    %c0_0 = arith.constant 0 : index
    %0 = vector.load %arg1[%c0, %c0_0] : memref<16x2048xbf16, #tpu.memory_space<vmem>>, vector<16x2048xbf16>
    %c0_1 = arith.constant 0 : index
    %c0_2 = arith.constant 0 : index
    %1 = vector.load %arg2[%c0_1, %c0_2] : memref<2048x256xbf16, #tpu.memory_space<vmem>>, vector<2048x256xbf16>
    %cst = arith.constant dense<0.000000e+00> : vector<16x256xf32>
    %2 = tpu.matmul %0, %1, %cst {dimension_numbers = #tpu.dot_dimension_numbers<[1], [0], [0], [1], [0, 0, 1, 1], [], []>} : vector<16x2048xbf16>, vector<2048x256xbf16>, vector<16x256xf32> -> vector<16x256xf32>
    %c0_3 = arith.constant 0 : index
    %c0_4 = arith.constant 0 : index
    %3 = vector.load %arg3[%c0_3, %c0_4] : memref<1x256xf32, #tpu.memory_space<vmem>>, vector<1x256xf32>
    %4 = vector.broadcast %3 : vector<1x256xf32> to vector<16x256xf32>
    %5 = arith.addf %2, %4 : vector<16x256xf32>
    %cst_5 = arith.constant dense<0.000000e+00> : vector<256xf32>
    %6 = vector.multi_reduction <add>, %5, %cst_5 [0] : vector<16x256xf32> to vector<256xf32>
    %7 = vector.shape_cast %6 : vector<256xf32> to vector<1x256xf32>
    %c0_6 = arith.constant 0 : index
    %c0_7 = arith.constant 0 : index
    %c0_8 = arith.constant 0 : index
    %8 = vector.load %arg5[%c0_6, %c0_7, %c0_8] : memref<1x1x256xf32, #tpu.memory_space<vmem>>, vector<1x1x256xf32>
    %9 = vector.shape_cast %8 : vector<1x1x256xf32> to vector<1x256xf32>
    %10 = vector.shape_cast %7 : vector<1x256xf32> to vector<1x1x256xf32>
    tpu.vector_store %arg5[%c0_6, %c0_7, %c0_8], %10 {strides = array<i32>} : memref<1x1x256xf32, #tpu.memory_space<vmem>>, vector<1x1x256xf32>,
    %11 = arith.mulf %5, %5 : vector<16x256xf32>
    %cst_9 = arith.constant dense<0.000000e+00> : vector<256xf32>
    %12 = vector.multi_reduction <add>, %11, %cst_9 [0] : vector<16x256xf32> to vector<256xf32>
    %13 = vector.shape_cast %12 : vector<256xf32> to vector<1x256xf32>
    %c0_10 = arith.constant 0 : index
    %c0_11 = arith.constant 0 : index
    %c0_12 = arith.constant 0 : index
    %14 = vector.load %arg6[%c0_10, %c0_11, %c0_12] : memref<1x1x256xf32, #tpu.memory_space<vmem>>, vector<1x1x256xf32>
    %15 = vector.shape_cast %14 : vector<1x1x256xf32> to vector<1x256xf32>
    %16 = vector.shape_cast %13 : vector<1x256xf32> to vector<1x1x256xf32>
    tpu.vector_store %arg6[%c0_10, %c0_11, %c0_12], %16 {strides = array<i32>} : memref<1x1x256xf32, #tpu.memory_space<vmem>>, vector<1x1x256xf32>,
    %17 = arith.truncf %5 : vector<16x256xf32> to vector<16x256xbf16>
    %c0_13 = arith.constant 0 : index
    %c0_14 = arith.constant 0 : index
    %18 = vector.load %arg4[%c0_13, %c0_14] : memref<16x256xbf16, #tpu.memory_space<vmem>>, vector<16x256xbf16>
    tpu.vector_store %arg4[%c0_13, %c0_14], %17 {strides = array<i32>} : memref<16x256xbf16, #tpu.memory_space<vmem>>, vector<16x256xbf16>,
    return
  }
  func.func @transform_0(%arg0: i32) -> (i32, i32) {
    %c0_i32 = arith.constant 0 : i32
    %c0_i32_0 = arith.constant 0 : i32
    return %arg0, %c0_i32 : i32, i32
  }
  func.func @transform_1(%arg0: i32) -> (i32, i32) {
    %c0_i32 = arith.constant 0 : i32
    %c0_i32_0 = arith.constant 0 : i32
    %c0_i32_1 = arith.constant 0 : i32
    return %c0_i32, %c0_i32_0 : i32, i32
  }
  func.func @transform_2(%arg0: i32) -> (i32, i32) {
    %c0_i32 = arith.constant 0 : i32
    %c0_i32_0 = arith.constant 0 : i32
    %c0_i32_1 = arith.constant 0 : i32
    return %c0_i32, %c0_i32_0 : i32, i32
  }
  func.func @transform_3(%arg0: i32) -> (i32, i32) {
    %c0_i32 = arith.constant 0 : i32
    %c0_i32_0 = arith.constant 0 : i32
    return %arg0, %c0_i32 : i32, i32
  }
  func.func @transform_4(%arg0: i32) -> (i32, i32, i32) {
    %c0_i32 = arith.constant 0 : i32
    %c0_i32_0 = arith.constant 0 : i32
    %c0_i32_1 = arith.constant 0 : i32
    return %arg0, %c0_i32, %c0_i32_0 : i32, i32, i32
  }
  func.func @transform_5(%arg0: i32) -> (i32, i32, i32) {
    %c0_i32 = arith.constant 0 : i32
    %c0_i32_0 = arith.constant 0 : i32
    %c0_i32_1 = arith.constant 0 : i32
    return %arg0, %c0_i32, %c0_i32_0 : i32, i32, i32
  }
}

module attributes {stable_mosaic.version = 11 : i64} {
  func.func @_bn_lrelu_kernel(%arg0: i32, %arg1: memref<16x256xbf16, #tpu.memory_space<vmem>>, %arg2: memref<1x256xf32, #tpu.memory_space<vmem>>, %arg3: memref<1x256xf32, #tpu.memory_space<vmem>>, %arg4: memref<16x256xbf16, #tpu.memory_space<vmem>>) attributes {dimension_semantics = [#tpu.dimension_semantics<parallel>], iteration_bounds = array<i64: 1>, scalar_prefetch = 0 : i64, scratch_operands = 0 : i64, tpu.core_type = #tpu.core_type<tc>, window_params = [{transform_indices = @transform_0, window_bounds = array<i64: 16, 256>}, {pipeline_mode = #tpu.pipeline_mode<synchronous>, transform_indices = @transform_1, window_bounds = array<i64: 1, 256>}, {pipeline_mode = #tpu.pipeline_mode<synchronous>, transform_indices = @transform_2, window_bounds = array<i64: 1, 256>}, {transform_indices = @transform_3, window_bounds = array<i64: 16, 256>}]} {
    %c0 = arith.constant 0 : index
    %c0_0 = arith.constant 0 : index
    %0 = vector.load %arg1[%c0, %c0_0] : memref<16x256xbf16, #tpu.memory_space<vmem>>, vector<16x256xbf16>
    %1 = arith.extf %0 : vector<16x256xbf16> to vector<16x256xf32>
    %c0_1 = arith.constant 0 : index
    %c0_2 = arith.constant 0 : index
    %2 = vector.load %arg2[%c0_1, %c0_2] : memref<1x256xf32, #tpu.memory_space<vmem>>, vector<1x256xf32>
    %3 = vector.broadcast %2 : vector<1x256xf32> to vector<16x256xf32>
    %4 = arith.mulf %1, %3 : vector<16x256xf32>
    %c0_3 = arith.constant 0 : index
    %c0_4 = arith.constant 0 : index
    %5 = vector.load %arg3[%c0_3, %c0_4] : memref<1x256xf32, #tpu.memory_space<vmem>>, vector<1x256xf32>
    %6 = vector.broadcast %5 : vector<1x256xf32> to vector<16x256xf32>
    %7 = arith.addf %4, %6 : vector<16x256xf32>
    %cst = arith.constant 0.000000e+00 : f32
    %8 = vector.broadcast %cst : f32 to vector<16x256xf32>
    %9 = arith.cmpf oge, %7, %8 : vector<16x256xf32>
    %cst_5 = arith.constant 2.000000e-01 : f32
    %10 = vector.broadcast %cst_5 : f32 to vector<16x256xf32>
    %11 = arith.mulf %10, %7 : vector<16x256xf32>
    %12 = arith.select %9, %7, %11 : vector<16x256xi1>, vector<16x256xf32>
    %13 = arith.truncf %12 : vector<16x256xf32> to vector<16x256xbf16>
    %c0_6 = arith.constant 0 : index
    %c0_7 = arith.constant 0 : index
    %14 = vector.load %arg4[%c0_6, %c0_7] : memref<16x256xbf16, #tpu.memory_space<vmem>>, vector<16x256xbf16>
    tpu.vector_store %arg4[%c0_6, %c0_7], %13 {strides = array<i32>} : memref<16x256xbf16, #tpu.memory_space<vmem>>, vector<16x256xbf16>,
    return
  }
  func.func @transform_0(%arg0: i32) -> (i32, i32) {
    %c0_i32 = arith.constant 0 : i32
    %c0_i32_0 = arith.constant 0 : i32
    return %arg0, %c0_i32 : i32, i32
  }
  func.func @transform_1(%arg0: i32) -> (i32, i32) {
    %c0_i32 = arith.constant 0 : i32
    %c0_i32_0 = arith.constant 0 : i32
    %c0_i32_1 = arith.constant 0 : i32
    return %c0_i32, %c0_i32_0 : i32, i32
  }
  func.func @transform_2(%arg0: i32) -> (i32, i32) {
    %c0_i32 = arith.constant 0 : i32
    %c0_i32_0 = arith.constant 0 : i32
    %c0_i32_1 = arith.constant 0 : i32
    return %c0_i32, %c0_i32_0 : i32, i32
  }
  func.func @transform_3(%arg0: i32) -> (i32, i32) {
    %c0_i32 = arith.constant 0 : i32
    %c0_i32_0 = arith.constant 0 : i32
    return %arg0, %c0_i32 : i32, i32
  }
}

module attributes {stable_mosaic.version = 11 : i64} {
  func.func @_conv_kernel(%arg0: i32, %arg1: memref<16x4096xbf16, #tpu.memory_space<vmem>>, %arg2: memref<4096x128xbf16, #tpu.memory_space<vmem>>, %arg3: memref<1x128xf32, #tpu.memory_space<vmem>>, %arg4: memref<16x128xf32, #tpu.memory_space<vmem>>) attributes {dimension_semantics = [#tpu.dimension_semantics<parallel>], iteration_bounds = array<i64: 1>, scalar_prefetch = 0 : i64, scratch_operands = 0 : i64, tpu.core_type = #tpu.core_type<tc>, window_params = [{transform_indices = @transform_0, window_bounds = array<i64: 16, 4096>}, {pipeline_mode = #tpu.pipeline_mode<synchronous>, transform_indices = @transform_1, window_bounds = array<i64: 4096, 128>}, {pipeline_mode = #tpu.pipeline_mode<synchronous>, transform_indices = @transform_2, window_bounds = array<i64: 1, 128>}, {transform_indices = @transform_3, window_bounds = array<i64: 16, 128>}]} {
    %c0 = arith.constant 0 : index
    %c0_0 = arith.constant 0 : index
    %0 = vector.load %arg1[%c0, %c0_0] : memref<16x4096xbf16, #tpu.memory_space<vmem>>, vector<16x4096xbf16>
    %c0_1 = arith.constant 0 : index
    %c0_2 = arith.constant 0 : index
    %1 = vector.load %arg2[%c0_1, %c0_2] : memref<4096x128xbf16, #tpu.memory_space<vmem>>, vector<4096x128xbf16>
    %cst = arith.constant dense<0.000000e+00> : vector<16x128xf32>
    %2 = tpu.matmul %0, %1, %cst {dimension_numbers = #tpu.dot_dimension_numbers<[1], [0], [0], [1], [0, 0, 1, 1], [], []>} : vector<16x4096xbf16>, vector<4096x128xbf16>, vector<16x128xf32> -> vector<16x128xf32>
    %c0_3 = arith.constant 0 : index
    %c0_4 = arith.constant 0 : index
    %3 = vector.load %arg3[%c0_3, %c0_4] : memref<1x128xf32, #tpu.memory_space<vmem>>, vector<1x128xf32>
    %4 = vector.broadcast %3 : vector<1x128xf32> to vector<16x128xf32>
    %5 = arith.addf %2, %4 : vector<16x128xf32>
    %c0_5 = arith.constant 0 : index
    %c0_6 = arith.constant 0 : index
    %6 = vector.load %arg4[%c0_5, %c0_6] : memref<16x128xf32, #tpu.memory_space<vmem>>, vector<16x128xf32>
    tpu.vector_store %arg4[%c0_5, %c0_6], %5 {strides = array<i32>} : memref<16x128xf32, #tpu.memory_space<vmem>>, vector<16x128xf32>,
    return
  }
  func.func @transform_0(%arg0: i32) -> (i32, i32) {
    %c0_i32 = arith.constant 0 : i32
    %c0_i32_0 = arith.constant 0 : i32
    return %arg0, %c0_i32 : i32, i32
  }
  func.func @transform_1(%arg0: i32) -> (i32, i32) {
    %c0_i32 = arith.constant 0 : i32
    %c0_i32_0 = arith.constant 0 : i32
    %c0_i32_1 = arith.constant 0 : i32
    return %c0_i32, %c0_i32_0 : i32, i32
  }
  func.func @transform_2(%arg0: i32) -> (i32, i32) {
    %c0_i32 = arith.constant 0 : i32
    %c0_i32_0 = arith.constant 0 : i32
    %c0_i32_1 = arith.constant 0 : i32
    return %c0_i32, %c0_i32_0 : i32, i32
  }
  func.func @transform_3(%arg0: i32) -> (i32, i32) {
    %c0_i32 = arith.constant 0 : i32
    %c0_i32_0 = arith.constant 0 : i32
    return %arg0, %c0_i32 : i32, i32
  }
}

</mosaic_0001>

<bundles_post_ra>
// kernel: discriminator_forward.8
= control target key start
LH: loop header
LB: loop body
LE: loop exit
PB: predicated region body
PF: predicated region fallthrough
CT: control target
= control target key end

     0   :  { %vm259_vm2 = vcmask 257024   ;;  %s538_s1 = inlined_call_operand.vmem [shape: bf16[128,32], index: 1, kind: input, shape index: {}]   ;;  %s539_s2 = inlined_call_operand.vmem [shape: f32[1,32], index: 2, kind: input, shape index: {}]   ;;  %s540_s0 = inlined_call_operand.vmem [shape: bf16[128,128], index: 0, kind: input, shape index: {}]   ;;  %s541_s3 = inlined_call_operand.vmem [shape: bf16[128,32], index: 3, kind: output, shape index: {}]  }
   0x1   :  { %v359_v0 = vld [vmem:[%s538_s1 + $0x38] sm:$0xff]  ;;  %v358_v1 = vld [vmem:[%s538_s1 + $0x30] sm:$0xff]  ;;  %v357_v2 = vld [vmem:[%s538_s1 + $0x28] sm:$0xff] }
   0x2   :  { %146 = vmatpush.bf16.msra.mxu0 %v359_v0  ;;  %360 = vmatpush.bf16.msra.mxu1 %v359_v0  ;;  %v356_v3 = vld [vmem:[%s538_s1 + $0x20] sm:$0xff]  ;;  %v355_v4 = vld [vmem:[%s538_s1 + $0x18] sm:$0xff]  ;;  %v354_v5 = vld [vmem:[%s538_s1 + $0x10] sm:$0xff] }
   0x3   :  { %361 = vmatpush.bf16.msra.mxu2 %v359_v0  ;;  %362 = vmatpush.bf16.msra.mxu3 %v359_v0  ;;  %v353_v6 = vld [vmem:[%s538_s1 + $0x8] sm:$0xff]  ;;  %v352_v7 = vld [vmem:[%s538_s1] sm:$0xff]  ;;  %v346_v9 = vld [vmem:[%s540_s0 + $0x10] sm:$0xff] }
   0x4   :  { %v344_v8 = vld [vmem:[%s540_s0] sm:$0xff]  ;;  %v350_v11 = vld [vmem:[%s540_s0 + $0x30] sm:$0xff]  ;;  %v345_v12 = vld [vmem:[%s540_s0 + $0x8] sm:$0xff] }
   0x5   :  { %v348_v10 = vld [vmem:[%s540_s0 + $0x20] sm:$0xff]  ;;  %v347_v13 = vld [vmem:[%s540_s0 + $0x18] sm:$0xff]  ;;  %v349_v14 = vld [vmem:[%s540_s0 + $0x28] sm:$0xff] }
   0x6   :  { %147 = vmatpush.bf16.msra.mxu0 %v358_v1  ;;  %363 = vmatpush.bf16.msra.mxu1 %v358_v1  ;;  %v351_v15 = vld [vmem:[%s540_s0 + $0x38] sm:$0xff]  ;;  %v456_v16 = vld [vmem:[%s539_s2] ss:$0 sm:$0xff] }
   0x7   :  { %364 = vmatpush.bf16.msra.mxu2 %v358_v1  ;;  %365 = vmatpush.bf16.msra.mxu3 %v358_v1 }
   0xa   :  { %148 = vmatpush.bf16.msra.mxu0 %v357_v2  ;;  %366 = vmatpush.bf16.msra.mxu1 %v357_v2 }
   0xb   :  { %367 = vmatpush.bf16.msra.mxu2 %v357_v2  ;;  %368 = vmatpush.bf16.msra.mxu3 %v357_v2 }
   0xe   :  { %149 = vmatpush.bf16.msra.mxu0 %v356_v3  ;;  %369 = vmatpush.bf16.msra.mxu1 %v356_v3 }
   0xf   :  { %370 = vmatpush.bf16.msra.mxu2 %v356_v3  ;;  %371 = vmatpush.bf16.msra.mxu3 %v356_v3 }
  0x12   :  { %150 = vmatpush.bf16.msra.mxu0 %v355_v4  ;;  %372 = vmatpush.bf16.msra.mxu1 %v355_v4 }
  0x13   :  { %373 = vmatpush.bf16.msra.mxu2 %v355_v4  ;;  %374 = vmatpush.bf16.msra.mxu3 %v355_v4 }
  0x16   :  { %151 = vmatpush.bf16.msra.mxu0 %v354_v5  ;;  %375 = vmatpush.bf16.msra.mxu1 %v354_v5 }
  0x17   :  { %376 = vmatpush.bf16.msra.mxu2 %v354_v5  ;;  %377 = vmatpush.bf16.msra.mxu3 %v354_v5 }
  0x1a   :  { %152 = vmatpush.bf16.msra.mxu0 %v353_v6  ;;  %378 = vmatpush.bf16.msra.mxu1 %v353_v6 }
  0x1b   :  { %379 = vmatpush.bf16.msra.mxu2 %v353_v6  ;;  %380 = vmatpush.bf16.msra.mxu3 %v353_v6 }
  0x1e   :  { %153 = vmatpush.bf16.msra.mxu0 %v352_v7  ;;  %381 = vmatpush.bf16.msra.mxu1 %v352_v7 }
  0x1f   :  { %382 = vmatpush.bf16.msra.mxu2 %v352_v7  ;;  %383 = vmatpush.bf16.msra.mxu3 %v352_v7 }
  0x21   :  { %154 = vmatmul.bf16.vlgmr.msra.gmra.mxu0 %v344_v8  ;;  %164 = vmatmul.bf16.vlgmr.msra.gmra.mxu1 %v346_v9 }
  0x22   :  { %174 = vmatmul.bf16.vlgmr.msra.gmra.mxu2 %v348_v10  ;;  %184 = vmatmul.bf16.vlgmr.msra.gmra.mxu3 %v350_v11 }
  0x31   :  { %159 = vmatmul.bf16.gmra.mxu0 %v345_v12  ;;  %169 = vmatmul.bf16.gmra.mxu1 %v347_v13 }
  0x32   :  { %179 = vmatmul.bf16.gmra.mxu2 %v349_v14  ;;  %189 = vmatmul.bf16.gmra.mxu3 %v351_v15 }
  0x9e   :  { %v155_v17 = vpop.f32.mrf.mxu0  ;;  %v165_v18 = vpop.f32.mrf.mxu1 }
  0x9f   :  { %v156_v19 = vadd.f32 %v456_v16, %v155_v17  ;;  %v166_v20 = vadd.f32 %v456_v16, %v165_v18 }
  0xa1   :  { %vm195_vm0 = vcmp.ge.f32.partialorder %v156_v19, 0.0  ;;  %v211_v21 = vmul.f32 0.2, %v156_v19  ;;  %vm199_vm1 = vcmp.ge.f32.partialorder %v166_v20, 0.0  ;;  %v215_v22 = vmul.f32 0.2, %v166_v20 }
  0xa3   :  { %v227_v23 = vsel %vm195_vm0, %v156_v19, %v211_v21  ;;  %v231_v24 = vsel %vm199_vm1, %v166_v20, %v215_v22 }
  0xa4   :  { %v243_v25 = vpack.c.bf16 %v227_v23, %v227_v23  ;;  %v247_v26 = vpack.c.bf16 %v231_v24, %v231_v24 }
  0xa5   :  { %v175_v27 = vpop.f32.mrf.mxu2  ;;  %v185_v28 = vpop.f32.mrf.mxu3 }
  0xa6   :  { %260 = vst.msk [vmem:[%s541_s3] sm:$0xf] %vm259_vm2, %v243_v25  ;;  %v176_v29 = vadd.f32 %v456_v16, %v175_v27  ;;  %v186_v30 = vadd.f32 %v456_v16, %v185_v28  ;;  %v157_v31 = vpop.f32.mrf.mxu0  ;;  %v167_v32 = vpop.f32.mrf.mxu1 }
  0xa7   :  { %264 = vst.msk [vmem:[%s541_s3 + $0x10] sm:$0xf] %vm259_vm2, %v247_v26  ;;  %v158_v33 = vadd.f32 %v456_v16, %v157_v31  ;;  %v168_v34 = vadd.f32 %v456_v16, %v167_v32 }
  0xa8   :  { %vm203_vm3 = vcmp.ge.f32.partialorder %v176_v29, 0.0  ;;  %v219_v35 = vmul.f32 0.2, %v176_v29  ;;  %vm207_vm4 = vcmp.ge.f32.partialorder %v186_v30, 0.0  ;;  %v223_v36 = vmul.f32 0.2, %v186_v30 }
  0xa9   :  { %vm196_vm5 = vcmp.ge.f32.partialorder %v158_v33, 0.0  ;;  %v212_v37 = vmul.f32 0.2, %v158_v33  ;;  %vm200_vm6 = vcmp.ge.f32.partialorder %v168_v34, 0.0  ;;  %v216_v38 = vmul.f32 0.2, %v168_v34 }
  0xaa   :  { %v235_v39 = vsel %vm203_vm3, %v176_v29, %v219_v35  ;;  %v239_v40 = vsel %vm207_vm4, %v186_v30, %v223_v36 }
  0xab   :  { %v251_v41 = vpack.c.bf16 %v235_v39, %v235_v39  ;;  %v255_v42 = vpack.c.bf16 %v239_v40, %v239_v40  ;;  %v228_v43 = vsel %vm196_vm5, %v158_v33, %v212_v37  ;;  %v232_v44 = vsel %vm200_vm6, %v168_v34, %v216_v38 }
  0xac   :  { %v244_v45 = vpack.c.bf16 %v228_v43, %v228_v43  ;;  %v248_v46 = vpack.c.bf16 %v232_v44, %v232_v44 }
  0xad   :  { %268 = vst.msk [vmem:[%s541_s3 + $0x20] sm:$0xf] %vm259_vm2, %v251_v41  ;;  %v177_v47 = vpop.f32.mrf.mxu2  ;;  %v187_v48 = vpop.f32.mrf.mxu3 }
  0xae   :  { %272 = vst.msk [vmem:[%s541_s3 + $0x30] sm:$0xf] %vm259_vm2, %v255_v42  ;;  %v178_v49 = vadd.f32 %v456_v16, %v177_v47  ;;  %v188_v50 = vadd.f32 %v456_v16, %v187_v48  ;;  %v160_v51 = vpop.f32.mrf.mxu0  ;;  %v170_v52 = vpop.f32.mrf.mxu1 }
  0xaf   :  { %261 = vst.msk [vmem:[%s541_s3 + $0x4] sm:$0xf] %vm259_vm2, %v244_v45  ;;  %v161_v53 = vadd.f32 %v456_v16, %v160_v51  ;;  %v171_v54 = vadd.f32 %v456_v16, %v170_v52 }
  0xb0   :  { %265 = vst.msk [vmem:[%s541_s3 + $0x14] sm:$0xf] %vm259_vm2, %v248_v46  ;;  %vm204_vm7 = vcmp.ge.f32.partialorder %v178_v49, 0.0  ;;  %v220_v55 = vmul.f32 0.2, %v178_v49  ;;  %vm208_vm8 = vcmp.ge.f32.partialorder %v188_v50, 0.0 }
  0xb1   :  { %v224_v56 = vmul.f32 0.2, %v188_v50  ;;  %vm197_vm9 = vcmp.ge.f32.partialorder %v161_v53, 0.0  ;;  %v213_v57 = vmul.f32 0.2, %v161_v53  ;;  %vm201_vm10 = vcmp.ge.f32.partialorder %v171_v54, 0.0 }
  0xb2   :  { %v236_v58 = vsel %vm204_vm7, %v178_v49, %v220_v55  ;;  %v217_v59 = vmul.f32 0.2, %v171_v54 }
  0xb3   :  { %v252_v60 = vpack.c.bf16 %v236_v58, %v236_v58  ;;  %v240_v61 = vsel %vm208_vm8, %v188_v50, %v224_v56  ;;  %v229_v62 = vsel %vm197_vm9, %v161_v53, %v213_v57 }
  0xb4   :  { %v256_v63 = vpack.c.bf16 %v240_v61, %v240_v61  ;;  %v245_v0 = vpack.c.bf16 %v229_v62, %v229_v62  ;;  %v233_v1 = vsel %vm201_vm10, %v171_v54, %v217_v59 }
  0xb5   :  { %269 = vst.msk [vmem:[%s541_s3 + $0x24] sm:$0xf] %vm259_vm2, %v252_v60  ;;  %v249_v2 = vpack.c.bf16 %v233_v1, %v233_v1  ;;  %v180_v3 = vpop.f32.mrf.mxu2  ;;  %v190_v4 = vpop.f32.mrf.mxu3 }
  0xb6   :  { %273 = vst.msk [vmem:[%s541_s3 + $0x34] sm:$0xf] %vm259_vm2, %v256_v63  ;;  %v181_v5 = vadd.f32 %v456_v16, %v180_v3  ;;  %v191_v6 = vadd.f32 %v456_v16, %v190_v4  ;;  %v162_v7 = vpop.f32.mrf.mxu0  ;;  %v172_v8 = vpop.f32.mrf.mxu1 }
  0xb7   :  { %262 = vst.msk [vmem:[%s541_s3 + $0x8] sm:$0xf] %vm259_vm2, %v245_v0  ;;  %v163_v9 = vadd.f32 %v456_v16, %v162_v7  ;;  %v173_v10 = vadd.f32 %v456_v16, %v172_v8 }
  0xb8   :  { %266 = vst.msk [vmem:[%s541_s3 + $0x18] sm:$0xf] %vm259_vm2, %v249_v2  ;;  %vm205_vm11 = vcmp.ge.f32.partialorder %v181_v5, 0.0  ;;  %v221_v11 = vmul.f32 0.2, %v181_v5  ;;  %vm209_vm12 = vcmp.ge.f32.partialorder %v191_v6, 0.0 }
  0xb9   :  { %v225_v12 = vmul.f32 0.2, %v191_v6  ;;  %vm198_vm13 = vcmp.ge.f32.partialorder %v163_v9, 0.0  ;;  %v214_v13 = vmul.f32 0.2, %v163_v9  ;;  %vm202_vm14 = vcmp.ge.f32.partialorder %v173_v10, 0.0 }
  0xba   :  { %v237_v14 = vsel %vm205_vm11, %v181_v5, %v221_v11  ;;  %v218_v15 = vmul.f32 0.2, %v173_v10 }
  0xbb   :  { %v253_v17 = vpack.c.bf16 %v237_v14, %v237_v14  ;;  %v241_v18 = vsel %vm209_vm12, %v191_v6, %v225_v12  ;;  %v230_v19 = vsel %vm198_vm13, %v163_v9, %v214_v13 }
  0xbc   :  { %v257_v20 = vpack.c.bf16 %v241_v18, %v241_v18  ;;  %v246_v21 = vpack.c.bf16 %v230_v19, %v230_v19  ;;  %v234_v22 = vsel %vm202_vm14, %v173_v10, %v218_v15 }
  0xbd   :  { %270 = vst.msk [vmem:[%s541_s3 + $0x28] sm:$0xf] %vm259_vm2, %v253_v17  ;;  %v250_v23 = vpack.c.bf16 %v234_v22, %v234_v22  ;;  %v182_v24 = vpop.f32.mrf.mxu2  ;;  %v192_v25 = vpop.f32.mrf.mxu3 }
  0xbe   :  { %274 = vst.msk [vmem:[%s541_s3 + $0x38] sm:$0xf] %vm259_vm2, %v257_v20  ;;  %v183_v26 = vadd.f32 %v456_v16, %v182_v24  ;;  %v193_v27 = vadd.f32 %v456_v16, %v192_v25 }
  0xbf   :  { %263 = vst.msk [vmem:[%s541_s3 + $0xc] sm:$0xf] %vm259_vm2, %v246_v21 }
  0xc0   :  { %267 = vst.msk [vmem:[%s541_s3 + $0x1c] sm:$0xf] %vm259_vm2, %v250_v23  ;;  %vm206_vm15 = vcmp.ge.f32.partialorder %v183_v26, 0.0  ;;  %v222_v28 = vmul.f32 0.2, %v183_v26  ;;  %vm210_vm0 = vcmp.ge.f32.partialorder %v193_v27, 0.0 }
  0xc1   :  { %v226_v29 = vmul.f32 0.2, %v193_v27 }
  0xc2   :  { %v238_v30 = vsel %vm206_vm15, %v183_v26, %v222_v28 }
  0xc3   :  { %v254_v31 = vpack.c.bf16 %v238_v30, %v238_v30  ;;  %v242_v32 = vsel %vm210_vm0, %v193_v27, %v226_v29 }
  0xc4   :  { %v258_v33 = vpack.c.bf16 %v242_v32, %v242_v32 }
  0xc5   :  { %271 = vst.msk [vmem:[%s541_s3 + $0x2c] sm:$0xf] %vm259_vm2, %v254_v31 }
  0xc6   :  { %275 = vst.msk [vmem:[%s541_s3 + $0x3c] sm:$0xf] %vm259_vm2, %v258_v33 }

// kernel: discriminator_forward.10
= control target key start
LH: loop header
LB: loop body
LE: loop exit
PB: predicated region body
PF: predicated region fallthrough
CT: control target
= control target key end

     0   :  { %vm54_vm4 = vcmask 519168   ;;  %s118_s0 = inlined_call_operand.vmem [shape: bf16[32,64], index: 0, kind: input, shape index: {}]   ;;  %s119_s1 = inlined_call_operand.vmem [shape: f32[1,64], index: 1, kind: input, shape index: {}]   ;;  %s120_s2 = inlined_call_operand.vmem [shape: f32[1,64], index: 2, kind: input, shape index: {}]   ;;  %s121_s3 = inlined_call_operand.vmem [shape: bf16[32,64], index: 3, kind: output, shape index: {}]  }
   0x1   :  { %v64_v0 = vld [vmem:[%s118_s0] sm:$0xff]   ;;  %v71_v5 = vld [vmem:[%s118_s0 + $0x8] sm:$0xff]  }
   0x2   :  { %v72_v1 = vld [vmem:[%s119_s1] ss:$0 sm:$0xff]  ;;  %v65_v2 = vunpack.c.l.bf16 %v64_v0  ;;  %v66_v4 = vunpack.c.h.bf16 %v64_v0  ;;  %v69_v6 = vunpack.c.l.bf16 %v71_v5  ;;  %v70_v7 = vunpack.c.h.bf16 %v71_v5 }
   0x3   :  { %v73_v3 = vld [vmem:[%s120_s2] ss:$0 sm:$0xff] }
   0x4   :  { %v26_v8 = vmul.f32 %v72_v1, %v65_v2  ;;  %v27_v9 = vmul.f32 %v72_v1, %v66_v4  ;;  %v28_v10 = vmul.f32 %v72_v1, %v69_v6  ;;  %v29_v11 = vmul.f32 %v72_v1, %v70_v7 }
   0x6   :  { %v34_v12 = vadd.f32 %v73_v3, %v26_v8  ;;  %v35_v13 = vadd.f32 %v73_v3, %v27_v9  ;;  %v36_v14 = vadd.f32 %v73_v3, %v28_v10  ;;  %v37_v15 = vadd.f32 %v73_v3, %v29_v11 }
   0x8   :  { %vm38_vm0 = vcmp.ge.f32.partialorder %v34_v12, 0.0  ;;  %v42_v16 = vmul.f32 0.2, %v34_v12  ;;  %vm39_vm1 = vcmp.ge.f32.partialorder %v35_v13, 0.0  ;;  %v43_v17 = vmul.f32 0.2, %v35_v13 }
   0x9   :  { %vm40_vm2 = vcmp.ge.f32.partialorder %v36_v14, 0.0  ;;  %v44_v18 = vmul.f32 0.2, %v36_v14  ;;  %vm41_vm3 = vcmp.ge.f32.partialorder %v37_v15, 0.0  ;;  %v45_v19 = vmul.f32 0.2, %v37_v15 }
   0xa   :  { %v46_v20 = vsel %vm38_vm0, %v34_v12, %v42_v16  ;;  %v47_v21 = vsel %vm39_vm1, %v35_v13, %v43_v17 }
   0xb   :  { %v50_v22 = vpack.c.bf16 %v46_v20, %v46_v20  ;;  %v51_v23 = vpack.c.bf16 %v47_v21, %v47_v21  ;;  %v48_v24 = vsel %vm40_vm2, %v36_v14, %v44_v18  ;;  %v49_v25 = vsel %vm41_vm3, %v37_v15, %v45_v19 }
   0xc   :  { %v52_v26 = vpack.c.bf16 %v48_v24, %v48_v24  ;;  %v53_v27 = vpack.c.bf16 %v49_v25, %v49_v25 }
   0xd   :  { %55 = vst.msk [vmem:[%s121_s3] sm:$0xf] %vm54_vm4, %v50_v22 }
   0xe   :  { %56 = vst.msk [vmem:[%s121_s3 + $0x4] sm:$0xf] %vm54_vm4, %v51_v23 }
   0xf   :  { %57 = vst.msk [vmem:[%s121_s3 + $0x8] sm:$0xf] %vm54_vm4, %v52_v26 }
  0x10   :  { %58 = vst.msk [vmem:[%s121_s3 + $0xc] sm:$0xf] %vm54_vm4, %v53_v27 }

// kernel: discriminator_forward.9
= control target key start
LH: loop header
LB: loop body
LE: loop exit
PB: predicated region body
PF: predicated region fallthrough
CT: control target
= control target key end

     0   :  { %vm439_vm0 = vcmask 519168   ;;  %vm401_vm1 = vcmask 523264   ;;  %vm415_vm2 = vcmask 516096   ;;  %s864_s1 = inlined_call_operand.vmem [shape: bf16[512,64], index: 1, kind: input, shape index: {}]   ;;  %s865_s2 = inlined_call_operand.vmem [shape: f32[1,64], index: 2, kind: input, shape index: {}]   ;;  %s866_s0 = inlined_call_operand.vmem [shape: bf16[32,512], index: 0, kind: input, shape index: {}]   ;;  %s867_s3 = inlined_call_operand.vmem [shape: bf16[32,64], index: 3, kind: output, shape index: {0}]   ;;  %s868_s4 = inlined_call_operand.vmem [shape: f32[1,1,64], index: 4, kind: output, shape index: {1}]   ;;  %s869_s5 = inlined_call_operand.vmem [shape: f32[1,1,64], index: 5, kind: output, shape index: {2}]  }
   0x1   :  { %v631_v0 = vld [vmem:[%s864_s1 + $0x38] sm:$0xff]  ;;  %v630_v4 = vld [vmem:[%s864_s1 + $0x30] sm:$0xff]  ;;  %v629_v8 = vld [vmem:[%s864_s1 + $0x28] sm:$0xff] }
   0x2   :  { %v639_v1 = vld [vmem:[%s864_s1 + $0x78] sm:$0xff]  ;;  %325 = vmatpush.bf16.msra.mxu0 %v631_v0  ;;  %v638_v5 = vld [vmem:[%s864_s1 + $0x70] sm:$0xff]  ;;  %v637_v9 = vld [vmem:[%s864_s1 + $0x68] sm:$0xff] }
   0x3   :  { %v647_v2 = vld [vmem:[%s864_s1 + $0xb8] sm:$0xff]  ;;  %344 = vmatpush.bf16.msra.mxu1 %v639_v1  ;;  %v646_v6 = vld [vmem:[%s864_s1 + $0xb0] sm:$0xff]  ;;  %v645_v10 = vld [vmem:[%s864_s1 + $0xa8] sm:$0xff] }
   0x4   :  { %v655_v3 = vld [vmem:[%s864_s1 + $0xf8] sm:$0xff]  ;;  %363 = vmatpush.bf16.msra.mxu2 %v647_v2  ;;  %v654_v7 = vld [vmem:[%s864_s1 + $0xf0] sm:$0xff]  ;;  %v653_v11 = vld [vmem:[%s864_s1 + $0xe8] sm:$0xff] }
   0x5   :  { %382 = vmatpush.bf16.msra.mxu3 %v655_v3  ;;  %v628_v12 = vld [vmem:[%s864_s1 + $0x20] sm:$0xff]  ;;  %v627_v16 = vld [vmem:[%s864_s1 + $0x18] sm:$0xff]  ;;  %v626_v20 = vld [vmem:[%s864_s1 + $0x10] sm:$0xff] }
   0x6   :  { %326 = vmatpush.bf16.msra.mxu0 %v630_v4  ;;  %v636_v13 = vld [vmem:[%s864_s1 + $0x60] sm:$0xff]  ;;  %v635_v17 = vld [vmem:[%s864_s1 + $0x58] sm:$0xff]  ;;  %v634_v21 = vld [vmem:[%s864_s1 + $0x50] sm:$0xff] }
   0x7   :  { %345 = vmatpush.bf16.msra.mxu1 %v638_v5  ;;  %v644_v14 = vld [vmem:[%s864_s1 + $0xa0] sm:$0xff]  ;;  %v643_v18 = vld [vmem:[%s864_s1 + $0x98] sm:$0xff]  ;;  %v642_v22 = vld [vmem:[%s864_s1 + $0x90] sm:$0xff] }
   0x8   :  { %364 = vmatpush.bf16.msra.mxu2 %v646_v6  ;;  %v652_v15 = vld [vmem:[%s864_s1 + $0xe0] sm:$0xff]  ;;  %v651_v19 = vld [vmem:[%s864_s1 + $0xd8] sm:$0xff]  ;;  %v650_v23 = vld [vmem:[%s864_s1 + $0xd0] sm:$0xff] }
   0x9   :  { %383 = vmatpush.bf16.msra.mxu3 %v654_v7  ;;  %v625_v24 = vld [vmem:[%s864_s1 + $0x8] sm:$0xff]  ;;  %v624_v28 = vld [vmem:[%s864_s1] sm:$0xff]  ;;  %v618_v33 = vld [vmem:[%s866_s0 + $0xc] sm:$0xf0] }
   0xa   :  { %327 = vmatpush.bf16.msra.mxu0 %v629_v8  ;;  %v633_v25 = vld [vmem:[%s864_s1 + $0x48] sm:$0xff]  ;;  %v632_v29 = vld [vmem:[%s864_s1 + $0x40] sm:$0xff]  ;;  %v460_v35 = vld [vmem:[%s866_s0 + $0x10] sm:$0xf0] }
   0xb   :  { %346 = vmatpush.bf16.msra.mxu1 %v637_v9  ;;  %v641_v26 = vld [vmem:[%s864_s1 + $0x88] sm:$0xff]  ;;  %v640_v30 = vld [vmem:[%s864_s1 + $0x80] sm:$0xff]  ;;  %v619_v37 = vld [vmem:[%s866_s0 + $0x14] sm:$0xf0] }
   0xc   :  { %365 = vmatpush.bf16.msra.mxu2 %v645_v10  ;;  %v649_v27 = vld [vmem:[%s864_s1 + $0xc8] sm:$0xff]  ;;  %v648_v31 = vld [vmem:[%s864_s1 + $0xc0] sm:$0xff]  ;;  %v468_v39 = vld [vmem:[%s866_s0 + $0x18] sm:$0xf0] }
   0xd   :  { %384 = vmatpush.bf16.msra.mxu3 %v653_v11  ;;  %v458_v32 = vld [vmem:[%s866_s0] sm:$0xf]  ;;  %v616_v34 = vld [vmem:[%s866_s0 + $0x4] sm:$0xf]  ;;  %v466_v36 = vld [vmem:[%s866_s0 + $0x8] sm:$0xf] }
   0xe   :  { %328 = vmatpush.bf16.msra.mxu0 %v628_v12  ;;  %v617_v38 = vld [vmem:[%s866_s0 + $0xc] sm:$0xf]  ;;  %v459_v40 = vor.u32 %v618_v33, %v458_v32  ;;  %v463_v41 = vor.u32 %v616_v34, %v460_v35  ;;  %v467_v42 = vor.u32 %v619_v37, %v466_v36  ;;  %v474_v44 = vld [vmem:[%s866_s0 + $0x20] sm:$0xf]  ;;  %v622_v45 = vld [vmem:[%s866_s0 + $0x2c] sm:$0xf0] }
   0xf   :  { %347 = vmatpush.bf16.msra.mxu1 %v636_v13  ;;  %v471_v43 = vor.u32 %v617_v38, %v468_v39  ;;  %v620_v46 = vld [vmem:[%s866_s0 + $0x24] sm:$0xf]  ;;  %v476_v47 = vld [vmem:[%s866_s0 + $0x30] sm:$0xf0]  ;;  %v482_v48 = vld [vmem:[%s866_s0 + $0x28] sm:$0xf]  ;;  %v475_v52 = vor.u32 %v622_v45, %v474_v44 }
  0x10   :  { %366 = vmatpush.bf16.msra.mxu2 %v644_v14  ;;  %v623_v49 = vld [vmem:[%s866_s0 + $0x34] sm:$0xf0]  ;;  %v621_v50 = vld [vmem:[%s866_s0 + $0x2c] sm:$0xf]  ;;  %v484_v51 = vld [vmem:[%s866_s0 + $0x38] sm:$0xf0]  ;;  %v479_v53 = vor.u32 %v620_v46, %v476_v47 }
  0x11   :  { %385 = vmatpush.bf16.msra.mxu3 %v652_v15  ;;  %v483_v54 = vor.u32 %v623_v49, %v482_v48  ;;  %v487_v55 = vor.u32 %v621_v50, %v484_v51  ;;  %v656_v56 = vld [vmem:[%s865_s2] ss:$0 sm:$0xff] }
  0x12   :  { %329 = vmatpush.bf16.msra.mxu0 %v627_v16 }
  0x13   :  { %348 = vmatpush.bf16.msra.mxu1 %v635_v17 }
  0x14   :  { %367 = vmatpush.bf16.msra.mxu2 %v643_v18 }
  0x15   :  { %386 = vmatpush.bf16.msra.mxu3 %v651_v19 }
  0x16   :  { %330 = vmatpush.bf16.msra.mxu0 %v626_v20 }
  0x17   :  { %349 = vmatpush.bf16.msra.mxu1 %v634_v21 }
  0x18   :  { %368 = vmatpush.bf16.msra.mxu2 %v642_v22 }
  0x19   :  { %387 = vmatpush.bf16.msra.mxu3 %v650_v23 }
  0x1a   :  { %331 = vmatpush.bf16.msra.mxu0 %v625_v24 }
  0x1b   :  { %350 = vmatpush.bf16.msra.mxu1 %v633_v25 }
  0x1c   :  { %369 = vmatpush.bf16.msra.mxu2 %v641_v26 }
  0x1d   :  { %388 = vmatpush.bf16.msra.mxu3 %v649_v27 }
  0x1e   :  { %332 = vmatpush.bf16.msra.mxu0 %v624_v28 }
  0x1f   :  { %351 = vmatpush.bf16.msra.mxu1 %v632_v29 }
  0x20   :  { %370 = vmatpush.bf16.msra.mxu2 %v640_v30 }
  0x21   :  { %389 = vmatpush.bf16.msra.mxu3 %v648_v31  ;;  %333 = vmatmul.bf16.vlgmr.msra.gmra.mxu0 %v459_v40 }
  0x22   :  { %352 = vmatmul.bf16.vlgmr.msra.gmra.mxu1 %v463_v41 }
  0x23   :  { %371 = vmatmul.bf16.vlgmr.msra.gmra.mxu2 %v467_v42 }
  0x24   :  { %390 = vmatmul.bf16.vlgmr.msra.gmra.mxu3 %v471_v43 }
  0x31   :  { %338 = vmatmul.bf16.gmra.mxu0 %v475_v52 }
  0x32   :  { %357 = vmatmul.bf16.gmra.mxu1 %v479_v53 }
  0x33   :  { %376 = vmatmul.bf16.gmra.mxu2 %v483_v54 }
  0x34   :  { %395 = vmatmul.bf16.gmra.mxu3 %v487_v55 }
  0x9e   :  { %v334_v57 = vpop.f32.mrf.mxu0 }
  0x9f   :  { %v353_v58 = vpop.f32.mrf.mxu1  ;;  %v335_v59 = vadd.f32 %v656_v56, %v334_v57 }
  0xa1   :  { %v354_v60 = vadd.f32 %v353_v58, %v335_v59 }
  0xa6   :  { %v372_v61 = vpop.f32.mrf.mxu2  ;;  %v336_v0 = vpop.f32.mrf.mxu0 }
  0xa7   :  { %v391_v62 = vpop.f32.mrf.mxu3  ;;  %v373_v63 = vadd.f32 %v372_v61, %v354_v60  ;;  %v355_v1 = vpop.f32.mrf.mxu1  ;;  %v337_v3 = vadd.f32 %v656_v56, %v336_v0 }
  0xa9   :  { %v392_v2 = vadd.f32 %v391_v62, %v373_v63  ;;  %v356_v5 = vadd.f32 %v355_v1, %v337_v3 }
  0xab   :  { %v435_v4 = vpack.c.bf16 %v392_v2, %v392_v2  ;;  %v417_v24 = vmul.f32 %v392_v2, %v392_v2  ;;  %v402_v29 = vsel %vm401_vm1, %v392_v2, 0.0 }
  0xad   :  { %440 = vst.msk [vmem:[%s867_s3] sm:$0xf] %vm439_vm0, %v435_v4  ;;  %v421_v35 = vsel %vm401_vm1, %v417_v24, 0.0 }
  0xae   :  { %v374_v6 = vpop.f32.mrf.mxu2  ;;  %v339_v9 = vpop.f32.mrf.mxu0 }
  0xaf   :  { %v393_v7 = vpop.f32.mrf.mxu3  ;;  %v375_v8 = vadd.f32 %v374_v6, %v356_v5  ;;  %v340_v10 = vadd.f32 %v656_v56, %v339_v9  ;;  %v358_v12 = vpop.f32.mrf.mxu1 }
  0xb1   :  { %v394_v11 = vadd.f32 %v393_v7, %v375_v8  ;;  %v359_v14 = vadd.f32 %v358_v12, %v340_v10 }
  0xb3   :  { %v436_v13 = vpack.c.bf16 %v394_v11, %v394_v11  ;;  %v418_v21 = vmul.f32 %v394_v11, %v394_v11  ;;  %v403_v25 = vsel %vm401_vm1, %v394_v11, 0.0 }
  0xb4   :  { %v404_v33 = vadd.f32 %v403_v25, %v402_v29 }
  0xb5   :  { %441 = vst.msk [vmem:[%s867_s3 + $0x4] sm:$0xf] %vm439_vm0, %v436_v13  ;;  %v422_v30 = vsel %vm401_vm1, %v418_v21, 0.0 }
  0xb6   :  { %v377_v15 = vpop.f32.mrf.mxu2  ;;  %v341_v18 = vpop.f32.mrf.mxu0  ;;  %v423_v38 = vadd.f32 %v422_v30, %v421_v35 }
  0xb7   :  { %v396_v16 = vpop.f32.mrf.mxu3  ;;  %v378_v17 = vadd.f32 %v377_v15, %v359_v14  ;;  %v342_v20 = vadd.f32 %v656_v56, %v341_v18  ;;  %v360_v23 = vpop.f32.mrf.mxu1 }
  0xb9   :  { %v397_v19 = vadd.f32 %v396_v16, %v378_v17  ;;  %v361_v27 = vadd.f32 %v360_v23, %v342_v20 }
  0xbb   :  { %v437_v22 = vpack.c.bf16 %v397_v19, %v397_v19  ;;  %v419_v26 = vmul.f32 %v397_v19, %v397_v19  ;;  %v405_v31 = vsel %vm401_vm1, %v397_v19, 0.0 }
  0xbc   :  { %v406_v39 = vadd.f32 %v405_v31, %v404_v33 }
  0xbd   :  { %442 = vst.msk [vmem:[%s867_s3 + $0x8] sm:$0xf] %vm439_vm0, %v437_v22  ;;  %v424_v36 = vsel %vm401_vm1, %v419_v26, 0.0 }
  0xbe   :  { %v379_v28 = vpop.f32.mrf.mxu2  ;;  %v425_v43 = vadd.f32 %v424_v36, %v423_v38 }
  0xbf   :  { %v380_v32 = vadd.f32 %v379_v28, %v361_v27  ;;  %v398_v34 = vpop.f32.mrf.mxu3 }
  0xc1   :  { %v399_v37 = vadd.f32 %v398_v34, %v380_v32 }
  0xc3   :  { %v407_v40 = vsel %vm401_vm1, %v399_v37, 0.0  ;;  %v420_v41 = vmul.f32 %v399_v37, %v399_v37  ;;  %v438_v42 = vpack.c.bf16 %v399_v37, %v399_v37 }
  0xc4   :  { %v408_v44 = vadd.f32 %v407_v40, %v406_v39 }
  0xc5   :  { %v426_v45 = vsel %vm401_vm1, %v420_v41, 0.0  ;;  %443 = vst.msk [vmem:[%s867_s3 + $0xc] sm:$0xf] %vm439_vm0, %v438_v42 }
  0xc6   :  { %v409_v46 = vrot.slane %v408_v44, 4  ;;  %v427_v47 = vadd.f32 %v426_v45, %v425_v43 }
  0xc8   :  { %v410_v48 = vadd.f32 %v409_v46, %v408_v44  ;;  %v428_v49 = vrot.slane %v427_v47, 4 }
  0xca   :  { %v411_v50 = vrot.slane %v410_v48, 2  ;;  %v429_v51 = vadd.f32 %v428_v49, %v427_v47 }
  0xcc   :  { %v412_v52 = vadd.f32 %v411_v50, %v410_v48  ;;  %v430_v53 = vrot.slane %v429_v51, 2 }
  0xce   :  { %v413_v54 = vrot.slane %v412_v52, 1  ;;  %v431_v55 = vadd.f32 %v430_v53, %v429_v51 }
  0xd0   :  { %v414_v56 = vadd.f32 %v413_v54, %v412_v52  ;;  %v432_v57 = vrot.slane %v431_v55, 1 }
  0xd2   :  { %416 = vst.msk [vmem:[%s868_s4] sm:$0x1] %vm415_vm2, %v414_v56  ;;  %v433_v58 = vadd.f32 %v432_v57, %v431_v55 }
  0xd4   :  { %434 = vst.msk [vmem:[%s869_s5] sm:$0x1] %vm415_vm2, %v433_v58 }

// kernel: discriminator_forward.12
= control target key start
LH: loop header
LB: loop body
LE: loop exit
PB: predicated region body
PF: predicated region fallthrough
CT: control target
= control target key end

     0   :  { %s87_s0 = inlined_call_operand.vmem [shape: bf16[16,128], index: 0, kind: input, shape index: {}]   ;;  %s88_s1 = inlined_call_operand.vmem [shape: f32[1,128], index: 1, kind: input, shape index: {}]   ;;  %s89_s2 = inlined_call_operand.vmem [shape: f32[1,128], index: 2, kind: input, shape index: {}]   ;;  %s90_s3 = inlined_call_operand.vmem [shape: bf16[16,128], index: 3, kind: output, shape index: {}]  }
   0x1   :  { %v45_v0 = vld [vmem:[%s87_s0] sm:$0xff]  }
   0x2   :  { %v53_v1 = vld [vmem:[%s88_s1] ss:$0 sm:$0xff]  ;;  %v46_v2 = vunpack.c.l.bf16 %v45_v0  ;;  %v47_v3 = vunpack.c.h.bf16 %v45_v0 }
   0x3   :  { %v54_v4 = vld [vmem:[%s89_s2] ss:$0 sm:$0xff] }
   0x4   :  { %v22_v5 = vmul.f32 %v53_v1, %v46_v2  ;;  %v23_v6 = vmul.f32 %v53_v1, %v47_v3 }
   0x6   :  { %v28_v7 = vadd.f32 %v54_v4, %v22_v5  ;;  %v29_v8 = vadd.f32 %v54_v4, %v23_v6 }
   0x8   :  { %vm30_vm0 = vcmp.ge.f32.partialorder %v28_v7, 0.0  ;;  %vm31_vm1 = vcmp.ge.f32.partialorder %v29_v8, 0.0  ;;  %v32_v9 = vmul.f32 0.2, %v28_v7  ;;  %v33_v10 = vmul.f32 0.2, %v29_v8 }
   0xa   :  { %v34_v11 = vsel %vm30_vm0, %v28_v7, %v32_v9  ;;  %v35_v12 = vsel %vm31_vm1, %v29_v8, %v33_v10 }
   0xb   :  { %v51_v13 = vpack.c.bf16 %v35_v12, %v34_v11 }
   0xd   :  { %52 = vst [vmem:[%s90_s3] sm:$0xff] %v51_v13  }

// kernel: discriminator_forward.11
= control target key start
LH: loop header
LB: loop body
LE: loop exit
PB: predicated region body
PF: predicated region fallthrough
CT: control target
= control target key end

     0   :  { %s1375_s1 = inlined_call_operand.vmem [shape: bf16[1024,128], index: 1, kind: input, shape index: {}]   ;;  %s1376_s2 = inlined_call_operand.vmem [shape: f32[1,128], index: 2, kind: input, shape index: {}]   ;;  %s1377_s0 = inlined_call_operand.vmem [shape: bf16[16,1024], index: 0, kind: input, shape index: {}]   ;;  %s1378_s3 = inlined_call_operand.vmem [shape: bf16[16,128], index: 3, kind: output, shape index: {0}]   ;;  %s1379_s4 = inlined_call_operand.vmem [shape: f32[1,1,128], index: 4, kind: output, shape index: {1}]   ;;  %s1380_s5 = inlined_call_operand.vmem [shape: f32[1,1,128], index: 5, kind: output, shape index: {2}]  }
   0x1   :  { %v1030_v0 = vld [vmem:[%s1375_s1 + $0x38] sm:$0xff]  ;;  %v1029_v4 = vld [vmem:[%s1375_s1 + $0x30] sm:$0xff]  ;;  %v1028_v8 = vld [vmem:[%s1375_s1 + $0x28] sm:$0xff] }
   0x2   :  { %v1038_v1 = vld [vmem:[%s1375_s1 + $0x78] sm:$0xff]  ;;  %581 = vmatpush.bf16.msra.mxu0 %v1030_v0  ;;  %v1037_v5 = vld [vmem:[%s1375_s1 + $0x70] sm:$0xff]  ;;  %v1036_v9 = vld [vmem:[%s1375_s1 + $0x68] sm:$0xff] }
   0x3   :  { %v1046_v2 = vld [vmem:[%s1375_s1 + $0xb8] sm:$0xff]  ;;  %595 = vmatpush.bf16.msra.mxu1 %v1038_v1  ;;  %v1045_v6 = vld [vmem:[%s1375_s1 + $0xb0] sm:$0xff]  ;;  %v1044_v10 = vld [vmem:[%s1375_s1 + $0xa8] sm:$0xff] }
   0x4   :  { %v1054_v3 = vld [vmem:[%s1375_s1 + $0xf8] sm:$0xff]  ;;  %609 = vmatpush.bf16.msra.mxu2 %v1046_v2  ;;  %v1053_v7 = vld [vmem:[%s1375_s1 + $0xf0] sm:$0xff]  ;;  %v1052_v11 = vld [vmem:[%s1375_s1 + $0xe8] sm:$0xff] }
   0x5   :  { %623 = vmatpush.bf16.msra.mxu3 %v1054_v3  ;;  %v1027_v12 = vld [vmem:[%s1375_s1 + $0x20] sm:$0xff]  ;;  %v1026_v16 = vld [vmem:[%s1375_s1 + $0x18] sm:$0xff]  ;;  %v1025_v20 = vld [vmem:[%s1375_s1 + $0x10] sm:$0xff] }
   0x6   :  { %582 = vmatpush.bf16.msra.mxu0 %v1029_v4  ;;  %v1035_v13 = vld [vmem:[%s1375_s1 + $0x60] sm:$0xff]  ;;  %v1034_v17 = vld [vmem:[%s1375_s1 + $0x58] sm:$0xff]  ;;  %v1033_v21 = vld [vmem:[%s1375_s1 + $0x50] sm:$0xff] }
   0x7   :  { %596 = vmatpush.bf16.msra.mxu1 %v1037_v5  ;;  %v1043_v14 = vld [vmem:[%s1375_s1 + $0xa0] sm:$0xff]  ;;  %v1042_v18 = vld [vmem:[%s1375_s1 + $0x98] sm:$0xff]  ;;  %v1041_v22 = vld [vmem:[%s1375_s1 + $0x90] sm:$0xff] }
   0x8   :  { %610 = vmatpush.bf16.msra.mxu2 %v1045_v6  ;;  %v1051_v15 = vld [vmem:[%s1375_s1 + $0xe0] sm:$0xff]  ;;  %v1050_v19 = vld [vmem:[%s1375_s1 + $0xd8] sm:$0xff]  ;;  %v1049_v23 = vld [vmem:[%s1375_s1 + $0xd0] sm:$0xff] }
   0x9   :  { %624 = vmatpush.bf16.msra.mxu3 %v1053_v7  ;;  %v1024_v24 = vld [vmem:[%s1375_s1 + $0x8] sm:$0xff]  ;;  %v1023_v28 = vld [vmem:[%s1375_s1] sm:$0xff]  ;;  %v1062_v32 = vld [vmem:[%s1375_s1 + $0x138] sm:$0xff] }
   0xa   :  { %583 = vmatpush.bf16.msra.mxu0 %v1028_v8  ;;  %v1032_v25 = vld [vmem:[%s1375_s1 + $0x48] sm:$0xff]  ;;  %v1031_v29 = vld [vmem:[%s1375_s1 + $0x40] sm:$0xff]  ;;  %v1070_v33 = vld [vmem:[%s1375_s1 + $0x178] sm:$0xff] }
   0xb   :  { %597 = vmatpush.bf16.msra.mxu1 %v1036_v9  ;;  %v1040_v26 = vld [vmem:[%s1375_s1 + $0x88] sm:$0xff]  ;;  %v1039_v30 = vld [vmem:[%s1375_s1 + $0x80] sm:$0xff]  ;;  %v1078_v42 = vld [vmem:[%s1375_s1 + $0x1b8] sm:$0xff] }
   0xc   :  { %611 = vmatpush.bf16.msra.mxu2 %v1044_v10  ;;  %v1048_v27 = vld [vmem:[%s1375_s1 + $0xc8] sm:$0xff]  ;;  %v1047_v31 = vld [vmem:[%s1375_s1 + $0xc0] sm:$0xff]  ;;  %v1086_v43 = vld [vmem:[%s1375_s1 + $0x1f8] sm:$0xff] }
   0xd   :  { %625 = vmatpush.bf16.msra.mxu3 %v1052_v11  ;;  %v737_v34 = vld [vmem:[%s1377_s0 + $0x8] sm:$0xf]  ;;  %v729_v36 = vld [vmem:[%s1377_s0] sm:$0xf]  ;;  %v1016_v38 = vld [vmem:[%s1377_s0 + $0xc] sm:$0xf] }
   0xe   :  { %584 = vmatpush.bf16.msra.mxu0 %v1027_v12  ;;  %v1020_v35 = vld [vmem:[%s1377_s0 + $0x24] sm:$0xf0]  ;;  %v1019_v37 = vld [vmem:[%s1377_s0 + $0x1c] sm:$0xf0]  ;;  %v739_v39 = vld [vmem:[%s1377_s0 + $0x28] sm:$0xf0] }
   0xf   :  { %598 = vmatpush.bf16.msra.mxu1 %v1035_v13  ;;  %v1015_v40 = vld [vmem:[%s1377_s0 + $0x4] sm:$0xf]  ;;  %v738_v44 = vor.u32 %v1020_v35, %v737_v34  ;;  %v730_v45 = vor.u32 %v1019_v37, %v729_v36  ;;  %v742_v46 = vor.u32 %v1016_v38, %v739_v39  ;;  %v1061_v48 = vld [vmem:[%s1375_s1 + $0x130] sm:$0xff]  ;;  %v1060_v52 = vld [vmem:[%s1375_s1 + $0x128] sm:$0xff] }
  0x10   :  { %612 = vmatpush.bf16.msra.mxu2 %v1043_v14  ;;  %v731_v41 = vld [vmem:[%s1377_s0 + $0x20] sm:$0xf0]  ;;  %v1069_v49 = vld [vmem:[%s1375_s1 + $0x170] sm:$0xff]  ;;  %v1068_v53 = vld [vmem:[%s1375_s1 + $0x168] sm:$0xff] }
  0x11   :  { %626 = vmatpush.bf16.msra.mxu3 %v1051_v15  ;;  %v734_v47 = vor.u32 %v1015_v40, %v731_v41  ;;  %v1077_v50 = vld [vmem:[%s1375_s1 + $0x1b0] sm:$0xff]  ;;  %v1076_v54 = vld [vmem:[%s1375_s1 + $0x1a8] sm:$0xff]  ;;  %v1059_v56 = vld [vmem:[%s1375_s1 + $0x120] sm:$0xff] }
  0x12   :  { %585 = vmatpush.bf16.msra.mxu0 %v1026_v16  ;;  %v1085_v51 = vld [vmem:[%s1375_s1 + $0x1f0] sm:$0xff]  ;;  %v1084_v55 = vld [vmem:[%s1375_s1 + $0x1e8] sm:$0xff]  ;;  %v1067_v57 = vld [vmem:[%s1375_s1 + $0x160] sm:$0xff] }
  0x13   :  { %599 = vmatpush.bf16.msra.mxu1 %v1034_v17  ;;  %v1075_v58 = vld [vmem:[%s1375_s1 + $0x1a0] sm:$0xff]  ;;  %v1058_v60 = vld [vmem:[%s1375_s1 + $0x118] sm:$0xff]  ;;  %v1057_v0 = vld [vmem:[%s1375_s1 + $0x110] sm:$0xff] }
  0x14   :  { %613 = vmatpush.bf16.msra.mxu2 %v1042_v18  ;;  %v1083_v59 = vld [vmem:[%s1375_s1 + $0x1e0] sm:$0xff]  ;;  %v1066_v61 = vld [vmem:[%s1375_s1 + $0x158] sm:$0xff]  ;;  %v1065_v1 = vld [vmem:[%s1375_s1 + $0x150] sm:$0xff] }
  0x15   :  { %627 = vmatpush.bf16.msra.mxu3 %v1050_v19  ;;  %v1074_v62 = vld [vmem:[%s1375_s1 + $0x198] sm:$0xff]  ;;  %v1073_v2 = vld [vmem:[%s1375_s1 + $0x190] sm:$0xff]  ;;  %v1056_v4 = vld [vmem:[%s1375_s1 + $0x108] sm:$0xff] }
  0x16   :  { %586 = vmatpush.bf16.msra.mxu0 %v1025_v20  ;;  %v1082_v63 = vld [vmem:[%s1375_s1 + $0x1d8] sm:$0xff]  ;;  %v1081_v3 = vld [vmem:[%s1375_s1 + $0x1d0] sm:$0xff]  ;;  %v1064_v5 = vld [vmem:[%s1375_s1 + $0x148] sm:$0xff] }
  0x17   :  { %600 = vmatpush.bf16.msra.mxu1 %v1033_v21  ;;  %v1072_v6 = vld [vmem:[%s1375_s1 + $0x188] sm:$0xff]  ;;  %v1055_v8 = vld [vmem:[%s1375_s1 + $0x100] sm:$0xff]  ;;  %v745_v12 = vld [vmem:[%s1377_s0 + $0x10] sm:$0xf] }
  0x18   :  { %614 = vmatpush.bf16.msra.mxu2 %v1041_v22  ;;  %v1080_v7 = vld [vmem:[%s1375_s1 + $0x1c8] sm:$0xff]  ;;  %v1063_v9 = vld [vmem:[%s1375_s1 + $0x140] sm:$0xff]  ;;  %v1021_v13 = vld [vmem:[%s1377_s0 + $0x2c] sm:$0xf0] }
  0x19   :  { %628 = vmatpush.bf16.msra.mxu3 %v1049_v23  ;;  %v1071_v10 = vld [vmem:[%s1375_s1 + $0x180] sm:$0xff]  ;;  %v1017_v14 = vld [vmem:[%s1377_s0 + $0x14] sm:$0xf]  ;;  %v753_v16 = vld [vmem:[%s1377_s0 + $0x18] sm:$0xf]  ;;  %v746_v20 = vor.u32 %v1021_v13, %v745_v12 }
  0x1a   :  { %587 = vmatpush.bf16.msra.mxu0 %v1024_v24  ;;  %v1079_v11 = vld [vmem:[%s1375_s1 + $0x1c0] sm:$0xff]  ;;  %v747_v15 = vld [vmem:[%s1377_s0 + $0x30] sm:$0xf0]  ;;  %v1022_v17 = vld [vmem:[%s1377_s0 + $0x34] sm:$0xf0] }
  0x1b   :  { %601 = vmatpush.bf16.msra.mxu1 %v1032_v25  ;;  %v1018_v18 = vld [vmem:[%s1377_s0 + $0x1c] sm:$0xf]  ;;  %v750_v21 = vor.u32 %v1017_v14, %v747_v15  ;;  %v754_v22 = vor.u32 %v1022_v17, %v753_v16 }
  0x1c   :  { %615 = vmatpush.bf16.msra.mxu2 %v1040_v26  ;;  %v755_v19 = vld [vmem:[%s1377_s0 + $0x38] sm:$0xf0]  ;;  %v1092_v26 = vld [vmem:[%s1376_s2] ss:$0 sm:$0xff] }
  0x1d   :  { %629 = vmatpush.bf16.msra.mxu3 %v1048_v27  ;;  %v758_v23 = vor.u32 %v1018_v18, %v755_v19 }
  0x1e   :  { %588 = vmatpush.bf16.msra.mxu0 %v1023_v28 }
  0x1f   :  { %602 = vmatpush.bf16.msra.mxu1 %v1031_v29 }
  0x20   :  { %616 = vmatpush.bf16.msra.mxu2 %v1039_v30 }
  0x21   :  { %630 = vmatpush.bf16.msra.mxu3 %v1047_v31  ;;  %589 = vmatmul.bf16.vlgmr.msra.gmra.mxu0 %v730_v45 }
  0x22   :  { %637 = vmatpush.bf16.msrb.mxu0 %v1062_v32  ;;  %603 = vmatmul.bf16.vlgmr.msra.gmra.mxu1 %v734_v47 }
  0x23   :  { %651 = vmatpush.bf16.msrb.mxu1 %v1070_v33  ;;  %617 = vmatmul.bf16.vlgmr.msra.gmra.mxu2 %v738_v44 }
  0x24   :  { %665 = vmatpush.bf16.msrb.mxu2 %v1078_v42  ;;  %631 = vmatmul.bf16.vlgmr.msra.gmra.mxu3 %v742_v46 }
  0x25   :  { %679 = vmatpush.bf16.msrb.mxu3 %v1086_v43 }
  0x26   :  { %638 = vmatpush.bf16.msrb.mxu0 %v1061_v48 }
  0x27   :  { %652 = vmatpush.bf16.msrb.mxu1 %v1069_v49 }
  0x28   :  { %666 = vmatpush.bf16.msrb.mxu2 %v1077_v50 }
  0x29   :  { %680 = vmatpush.bf16.msrb.mxu3 %v1085_v51 }
  0x2a   :  { %639 = vmatpush.bf16.msrb.mxu0 %v1060_v52 }
  0x2b   :  { %653 = vmatpush.bf16.msrb.mxu1 %v1068_v53 }
  0x2c   :  { %667 = vmatpush.bf16.msrb.mxu2 %v1076_v54 }
  0x2d   :  { %681 = vmatpush.bf16.msrb.mxu3 %v1084_v55 }
  0x2e   :  { %640 = vmatpush.bf16.msrb.mxu0 %v1059_v56 }
  0x2f   :  { %654 = vmatpush.bf16.msrb.mxu1 %v1067_v57 }
  0x30   :  { %668 = vmatpush.bf16.msrb.mxu2 %v1075_v58 }
  0x31   :  { %682 = vmatpush.bf16.msrb.mxu3 %v1083_v59 }
  0x32   :  { %641 = vmatpush.bf16.msrb.mxu0 %v1058_v60 }
  0x33   :  { %655 = vmatpush.bf16.msrb.mxu1 %v1066_v61 }
  0x34   :  { %669 = vmatpush.bf16.msrb.mxu2 %v1074_v62 }
  0x35   :  { %683 = vmatpush.bf16.msrb.mxu3 %v1082_v63 }
  0x36   :  { %642 = vmatpush.bf16.msrb.mxu0 %v1057_v0 }
  0x37   :  { %656 = vmatpush.bf16.msrb.mxu1 %v1065_v1 }
  0x38   :  { %670 = vmatpush.bf16.msrb.mxu2 %v1073_v2 }
  0x39   :  { %684 = vmatpush.bf16.msrb.mxu3 %v1081_v3 }
  0x3a   :  { %643 = vmatpush.bf16.msrb.mxu0 %v1056_v4 }
  0x3b   :  { %657 = vmatpush.bf16.msrb.mxu1 %v1064_v5 }
  0x3c   :  { %671 = vmatpush.bf16.msrb.mxu2 %v1072_v6 }
  0x3d   :  { %685 = vmatpush.bf16.msrb.mxu3 %v1080_v7 }
  0x3e   :  { %644 = vmatpush.bf16.msrb.mxu0 %v1055_v8 }
  0x3f   :  { %658 = vmatpush.bf16.msrb.mxu1 %v1063_v9 }
  0x40   :  { %672 = vmatpush.bf16.msrb.mxu2 %v1071_v10 }
  0x41   :  { %686 = vmatpush.bf16.msrb.mxu3 %v1079_v11  ;;  %645 = vmatmul.bf16.vlgmr.msrb.gmra.mxu0 %v746_v20 }
  0x42   :  { %659 = vmatmul.bf16.vlgmr.msrb.gmra.mxu1 %v750_v21 }
  0x43   :  { %673 = vmatmul.bf16.vlgmr.msrb.gmra.mxu2 %v754_v22 }
  0x44   :  { %687 = vmatmul.bf16.vlgmr.msrb.gmra.mxu3 %v758_v23 }
  0x9e   :  { %v590_v24 = vpop.f32.mrf.mxu0 }
  0x9f   :  { %v604_v25 = vpop.f32.mrf.mxu1  ;;  %v591_v29 = vadd.f32 %v1092_v26, %v590_v24 }
  0xa1   :  { %v605_v32 = vadd.f32 %v604_v25, %v591_v29 }
  0xa6   :  { %v618_v27 = vpop.f32.mrf.mxu2  ;;  %v592_v30 = vpop.f32.mrf.mxu0 }
  0xa7   :  { %v632_v28 = vpop.f32.mrf.mxu3  ;;  %v606_v31 = vpop.f32.mrf.mxu1  ;;  %v593_v33 = vadd.f32 %v1092_v26, %v592_v30  ;;  %v619_v36 = vadd.f32 %v618_v27, %v605_v32 }
  0xa9   :  { %v607_v37 = vadd.f32 %v606_v31, %v593_v33  ;;  %v633_v40 = vadd.f32 %v632_v28, %v619_v36 }
  0xae   :  { %v620_v34 = vpop.f32.mrf.mxu2 }
  0xaf   :  { %v634_v35 = vpop.f32.mrf.mxu3  ;;  %v621_v41 = vadd.f32 %v620_v34, %v607_v37 }
  0xb1   :  { %v635_v45 = vadd.f32 %v634_v35, %v621_v41 }
  0xbe   :  { %v646_v38 = vpop.f32.mrf.mxu0 }
  0xbf   :  { %v660_v39 = vpop.f32.mrf.mxu1  ;;  %v647_v42 = vadd.f32 %v646_v38, %v633_v40 }
  0xc1   :  { %v661_v47 = vadd.f32 %v660_v39, %v647_v42 }
  0xc6   :  { %v674_v43 = vpop.f32.mrf.mxu2  ;;  %v648_v46 = vpop.f32.mrf.mxu0 }
  0xc7   :  { %v688_v44 = vpop.f32.mrf.mxu3  ;;  %v649_v48 = vadd.f32 %v648_v46, %v635_v45  ;;  %v675_v49 = vadd.f32 %v674_v43, %v661_v47  ;;  %v662_v50 = vpop.f32.mrf.mxu1 }
  0xc9   :  { %v663_v51 = vadd.f32 %v662_v50, %v649_v48  ;;  %v689_v53 = vadd.f32 %v688_v44, %v675_v49 }
  0xcb   :  { %v701_v57 = vmul.f32 %v689_v53, %v689_v53 }
  0xce   :  { %v676_v52 = vpop.f32.mrf.mxu2 }
  0xcf   :  { %v677_v54 = vadd.f32 %v676_v52, %v663_v51  ;;  %v690_v55 = vpop.f32.mrf.mxu3 }
  0xd1   :  { %v691_v56 = vadd.f32 %v690_v55, %v677_v54 }
  0xd3   :  { %v693_v58 = vadd.f32 %v691_v56, %v689_v53  ;;  %v702_v59 = vmul.f32 %v691_v56, %v691_v56  ;;  %v1090_v60 = vpack.c.bf16 %v691_v56, %v689_v53 }
  0xd5   :  { %v694_v61 = vrot.slane %v693_v58, 4  ;;  %v703_v62 = vadd.f32 %v702_v59, %v701_v57  ;;  %1091 = vst [vmem:[%s1378_s3] sm:$0xff] %v1090_v60  }
  0xd7   :  { %v695_v63 = vadd.f32 %v694_v61, %v693_v58  ;;  %v704_v0 = vrot.slane %v703_v62, 4 }
  0xd9   :  { %v696_v1 = vrot.slane %v695_v63, 2  ;;  %v705_v2 = vadd.f32 %v704_v0, %v703_v62 }
  0xdb   :  { %v697_v3 = vadd.f32 %v696_v1, %v695_v63  ;;  %v706_v4 = vrot.slane %v705_v2, 2 }
  0xdd   :  { %v698_v5 = vrot.slane %v697_v3, 1  ;;  %v707_v6 = vadd.f32 %v706_v4, %v705_v2 }
  0xdf   :  { %v699_v7 = vadd.f32 %v698_v5, %v697_v3  ;;  %v708_v8 = vrot.slane %v707_v6, 1 }
  0xe1   :  { %700 = vst [vmem:[%s1379_s4] sm:$0x1] %v699_v7  ;;  %v709_v9 = vadd.f32 %v708_v8, %v707_v6 }
  0xe3   :  { %710 = vst [vmem:[%s1380_s5] sm:$0x1] %v709_v9 }

// kernel: discriminator_forward.14
= control target key start
LH: loop header
LB: loop body
LE: loop exit
PB: predicated region body
PF: predicated region fallthrough
CT: control target
= control target key end

     0   :  { %s98_s0 = inlined_call_operand.vmem [shape: bf16[16,256], index: 0, kind: input, shape index: {}]   ;;  %s99_s1 = inlined_call_operand.vmem [shape: f32[1,256], index: 1, kind: input, shape index: {}]   ;;  %s100_s2 = inlined_call_operand.vmem [shape: f32[1,256], index: 2, kind: input, shape index: {}]   ;;  %s101_s3 = inlined_call_operand.vmem [shape: bf16[16,256], index: 3, kind: output, shape index: {}]  }
   0x1   :  { %v14_v0 = vld [vmem:[%s98_s0] sm:$0xff]  ;;  %v15_v7 = vld [vmem:[%s98_s0 + $0x8] sm:$0xff] }
   0x2   :  { %v20_v1 = vld [vmem:[%s99_s1] sm:$0x3]  ;;  %v16_v3 = vunpack.c.l.bf16 %v14_v0  ;;  %v17_v4 = vunpack.c.h.bf16 %v14_v0  ;;  %v18_v10 = vunpack.c.l.bf16 %v15_v7  ;;  %v19_v11 = vunpack.c.h.bf16 %v15_v7 }
   0x3   :  { %v30_v2 = vld [vmem:[%s100_s2] sm:$0x3]  ;;  %v22_v5 = vperm.slane %v20_v1, 0  ;;  %v23_v6 = vperm.slane %v20_v1, 1 }
   0x4   :  { %v32_v8 = vperm.slane %v30_v2, 0  ;;  %v33_v9 = vperm.slane %v30_v2, 1 }
   0x5   :  { %v26_v12 = vmul.f32 %v22_v5, %v16_v3  ;;  %v27_v13 = vmul.f32 %v23_v6, %v17_v4  ;;  %v28_v14 = vmul.f32 %v22_v5, %v18_v10  ;;  %v29_v15 = vmul.f32 %v23_v6, %v19_v11 }
   0x7   :  { %v36_v16 = vadd.f32 %v32_v8, %v26_v12  ;;  %v37_v17 = vadd.f32 %v33_v9, %v27_v13  ;;  %v38_v18 = vadd.f32 %v32_v8, %v28_v14  ;;  %v39_v19 = vadd.f32 %v33_v9, %v29_v15 }
   0x9   :  { %vm40_vm0 = vcmp.ge.f32.partialorder %v36_v16, 0.0  ;;  %vm41_vm1 = vcmp.ge.f32.partialorder %v37_v17, 0.0  ;;  %v44_v20 = vmul.f32 0.2, %v36_v16  ;;  %v45_v21 = vmul.f32 0.2, %v37_v17 }
   0xa   :  { %vm42_vm2 = vcmp.ge.f32.partialorder %v38_v18, 0.0  ;;  %vm43_vm3 = vcmp.ge.f32.partialorder %v39_v19, 0.0  ;;  %v46_v22 = vmul.f32 0.2, %v38_v18  ;;  %v47_v23 = vmul.f32 0.2, %v39_v19 }
   0xb   :  { %v48_v24 = vsel %vm40_vm0, %v36_v16, %v44_v20  ;;  %v49_v25 = vsel %vm41_vm1, %v37_v17, %v45_v21 }
   0xc   :  { %v52_v26 = vpack.c.bf16 %v49_v25, %v48_v24  ;;  %v50_v27 = vsel %vm42_vm2, %v38_v18, %v46_v22  ;;  %v51_v28 = vsel %vm43_vm3, %v39_v19, %v47_v23 }
   0xd   :  { %v53_v29 = vpack.c.bf16 %v51_v28, %v50_v27 }
   0xe   :  { %54 = vst [vmem:[%s101_s3] sm:$0xff] %v52_v26 }
   0xf   :  { %55 = vst [vmem:[%s101_s3 + $0x8] sm:$0xff] %v53_v29 }

// kernel: discriminator_forward.13
= control target key start
LH: loop header
LB: loop body
LE: loop exit
PB: predicated region body
PF: predicated region fallthrough
CT: control target
= control target key end

     0   :  { %vm2120_vm0 = vcmask 1040384   ;;  %s5305_s1 = inlined_call_operand.vmem [shape: bf16[2048,256], index: 1, kind: input, shape index: {}]   ;;  %s5306_s0 = inlined_call_operand.vmem [shape: bf16[16,2048], index: 0, kind: input, shape index: {}]   ;;  %s5307_s2 = inlined_call_operand.vmem [shape: f32[1,256], index: 2, kind: input, shape index: {}]   ;;  %s5308_s3 = inlined_call_operand.vmem [shape: bf16[16,256], index: 3, kind: output, shape index: {0}]   ;;  %s5309_s4 = inlined_call_operand.vmem [shape: f32[1,1,256], index: 4, kind: output, shape index: {1}]   ;;  %s5310_s5 = inlined_call_operand.vmem [shape: f32[1,1,256], index: 5, kind: output, shape index: {2}]  }
   0x1   :  { %v2290_v0 = vld [vmem:[%s5305_s1 + $0x70] sm:$0xf]  ;;  %v3287_v1 = vld [vmem:[%s5305_s1 + $0x74] sm:$0xf0]  ;;  %v2282_v11 = vld [vmem:[%s5305_s1 + $0x60] sm:$0xf] }
   0x2   :  { %v2354_v2 = vld [vmem:[%s5305_s1 + $0xf0] sm:$0xf]  ;;  %v2291_v3 = vor.u32 %v3287_v1, %v2290_v0  ;;  %v3303_v4 = vld [vmem:[%s5305_s1 + $0xf4] sm:$0xf0]  ;;  %v3285_v13 = vld [vmem:[%s5305_s1 + $0x64] sm:$0xf0] }
   0x3   :  { %v2418_v5 = vld [vmem:[%s5305_s1 + $0x170] sm:$0xf]  ;;  %v3319_v6 = vld [vmem:[%s5305_s1 + $0x174] sm:$0xf0]  ;;  %v2355_v7 = vor.u32 %v3303_v4, %v2354_v2  ;;  %v2346_v14 = vld [vmem:[%s5305_s1 + $0xe0] sm:$0xf]  ;;  %v2283_v16 = vor.u32 %v3285_v13, %v2282_v11 }
   0x4   :  { %v2419_v8 = vor.u32 %v3319_v6, %v2418_v5  ;;  %v2482_v9 = vld [vmem:[%s5305_s1 + $0x1f0] sm:$0xf]  ;;  %v3335_v10 = vld [vmem:[%s5305_s1 + $0x1f4] sm:$0xf0]  ;;  %1655 = vmatpush.bf16.msra.mxu0 %v2291_v3  ;;  %v3301_v15 = vld [vmem:[%s5305_s1 + $0xe4] sm:$0xf0] }
   0x5   :  { %v2483_v12 = vor.u32 %v3335_v10, %v2482_v9  ;;  %1669 = vmatpush.bf16.msra.mxu1 %v2355_v7  ;;  %v2347_v17 = vor.u32 %v3301_v15, %v2346_v14  ;;  %v2410_v18 = vld [vmem:[%s5305_s1 + $0x160] sm:$0xf]  ;;  %v3317_v19 = vld [vmem:[%s5305_s1 + $0x164] sm:$0xf0]  ;;  %v2274_v23 = vld [vmem:[%s5305_s1 + $0x50] sm:$0xf] }
   0x6   :  { %1683 = vmatpush.bf16.msra.mxu2 %v2419_v8  ;;  %v2474_v20 = vld [vmem:[%s5305_s1 + $0x1e0] sm:$0xf]  ;;  %v2411_v21 = vor.u32 %v3317_v19, %v2410_v18  ;;  %v3333_v22 = vld [vmem:[%s5305_s1 + $0x1e4] sm:$0xf0]  ;;  %v3283_v24 = vld [vmem:[%s5305_s1 + $0x54] sm:$0xf0] }
   0x7   :  { %1697 = vmatpush.bf16.msra.mxu3 %v2483_v12  ;;  %v2475_v25 = vor.u32 %v3333_v22, %v2474_v20  ;;  %v2338_v26 = vld [vmem:[%s5305_s1 + $0xd0] sm:$0xf]  ;;  %v3299_v27 = vld [vmem:[%s5305_s1 + $0xd4] sm:$0xf0]  ;;  %v2275_v29 = vor.u32 %v3283_v24, %v2274_v23  ;;  %v2266_v35 = vld [vmem:[%s5305_s1 + $0x40] sm:$0xf] }
   0x8   :  { %v2402_v28 = vld [vmem:[%s5305_s1 + $0x150] sm:$0xf]  ;;  %1656 = vmatpush.bf16.msra.mxu0 %v2283_v16  ;;  %v3315_v30 = vld [vmem:[%s5305_s1 + $0x154] sm:$0xf0]  ;;  %v2339_v33 = vor.u32 %v3299_v27, %v2338_v26  ;;  %v3281_v36 = vld [vmem:[%s5305_s1 + $0x44] sm:$0xf0] }
   0x9   :  { %v2466_v31 = vld [vmem:[%s5305_s1 + $0x1d0] sm:$0xf]  ;;  %v3331_v32 = vld [vmem:[%s5305_s1 + $0x1d4] sm:$0xf0]  ;;  %1670 = vmatpush.bf16.msra.mxu1 %v2347_v17  ;;  %v2403_v34 = vor.u32 %v3315_v30, %v2402_v28  ;;  %v2330_v37 = vld [vmem:[%s5305_s1 + $0xc0] sm:$0xf]  ;;  %v2267_v44 = vor.u32 %v3281_v36, %v2266_v35 }
   0xa   :  { %1684 = vmatpush.bf16.msra.mxu2 %v2411_v21  ;;  %v2467_v38 = vor.u32 %v3331_v32, %v2466_v31  ;;  %v3297_v39 = vld [vmem:[%s5305_s1 + $0xc4] sm:$0xf0]  ;;  %v2394_v40 = vld [vmem:[%s5305_s1 + $0x140] sm:$0xf]  ;;  %v2258_v47 = vld [vmem:[%s5305_s1 + $0x30] sm:$0xf] }
   0xb   :  { %1698 = vmatpush.bf16.msra.mxu3 %v2475_v25  ;;  %v3313_v41 = vld [vmem:[%s5305_s1 + $0x144] sm:$0xf0]  ;;  %v2458_v42 = vld [vmem:[%s5305_s1 + $0x1c0] sm:$0xf]  ;;  %v2331_v45 = vor.u32 %v3297_v39, %v2330_v37  ;;  %v3279_v48 = vld [vmem:[%s5305_s1 + $0x34] sm:$0xf0] }
   0xc   :  { %v3329_v43 = vld [vmem:[%s5305_s1 + $0x1c4] sm:$0xf0]  ;;  %1657 = vmatpush.bf16.msra.mxu0 %v2275_v29  ;;  %v2395_v46 = vor.u32 %v3313_v41, %v2394_v40  ;;  %v2322_v49 = vld [vmem:[%s5305_s1 + $0xb0] sm:$0xf]  ;;  %v3295_v51 = vld [vmem:[%s5305_s1 + $0xb4] sm:$0xf0]  ;;  %v2259_v56 = vor.u32 %v3279_v48, %v2258_v47 }
   0xd   :  { %1671 = vmatpush.bf16.msra.mxu1 %v2339_v33  ;;  %v2459_v50 = vor.u32 %v3329_v43, %v2458_v42  ;;  %v2386_v52 = vld [vmem:[%s5305_s1 + $0x130] sm:$0xf]  ;;  %v3311_v53 = vld [vmem:[%s5305_s1 + $0x134] sm:$0xf0]  ;;  %v2323_v57 = vor.u32 %v3295_v51, %v2322_v49  ;;  %v2250_v59 = vld [vmem:[%s5305_s1 + $0x20] sm:$0xf] }
   0xe   :  { %1685 = vmatpush.bf16.msra.mxu2 %v2403_v34  ;;  %v2450_v54 = vld [vmem:[%s5305_s1 + $0x1b0] sm:$0xf]  ;;  %v3327_v55 = vld [vmem:[%s5305_s1 + $0x1b4] sm:$0xf0]  ;;  %v2387_v58 = vor.u32 %v3311_v53, %v2386_v52  ;;  %v3277_v60 = vld [vmem:[%s5305_s1 + $0x24] sm:$0xf0] }
   0xf   :  { %1699 = vmatpush.bf16.msra.mxu3 %v2467_v38  ;;  %v2314_v61 = vld [vmem:[%s5305_s1 + $0xa0] sm:$0xf]  ;;  %v2451_v62 = vor.u32 %v3327_v55, %v2450_v54  ;;  %v3293_v63 = vld [vmem:[%s5305_s1 + $0xa4] sm:$0xf0]  ;;  %v2251_v4 = vor.u32 %v3277_v60, %v2250_v59  ;;  %v2242_v7 = vld [vmem:[%s5305_s1 + $0x10] sm:$0xf] }
  0x10   :  { %1658 = vmatpush.bf16.msra.mxu0 %v2267_v44  ;;  %v2378_v0 = vld [vmem:[%s5305_s1 + $0x120] sm:$0xf]  ;;  %v3309_v1 = vld [vmem:[%s5305_s1 + $0x124] sm:$0xf0]  ;;  %v2315_v5 = vor.u32 %v3293_v63, %v2314_v61  ;;  %v3275_v8 = vld [vmem:[%s5305_s1 + $0x14] sm:$0xf0] }
  0x11   :  { %1672 = vmatpush.bf16.msra.mxu1 %v2331_v45  ;;  %v2442_v2 = vld [vmem:[%s5305_s1 + $0x1a0] sm:$0xf]  ;;  %v3325_v3 = vld [vmem:[%s5305_s1 + $0x1a4] sm:$0xf0]  ;;  %v2379_v6 = vor.u32 %v3309_v1, %v2378_v0  ;;  %v2306_v9 = vld [vmem:[%s5305_s1 + $0x90] sm:$0xf]  ;;  %v2243_v16 = vor.u32 %v3275_v8, %v2242_v7 }
  0x12   :  { %1686 = vmatpush.bf16.msra.mxu2 %v2395_v46  ;;  %v2443_v10 = vor.u32 %v3325_v3, %v2442_v2  ;;  %v3291_v11 = vld [vmem:[%s5305_s1 + $0x94] sm:$0xf0]  ;;  %v2370_v12 = vld [vmem:[%s5305_s1 + $0x110] sm:$0xf]  ;;  %v2234_v17 = vld [vmem:[%s5305_s1] sm:$0xf] }
  0x13   :  { %1700 = vmatpush.bf16.msra.mxu3 %v2459_v50  ;;  %v3307_v13 = vld [vmem:[%s5305_s1 + $0x114] sm:$0xf0]  ;;  %v2434_v14 = vld [vmem:[%s5305_s1 + $0x190] sm:$0xf]  ;;  %v3273_v18 = vld [vmem:[%s5305_s1 + $0x4] sm:$0xf0]  ;;  %v2307_v19 = vor.u32 %v3291_v11, %v2306_v9 }
  0x14   :  { %1659 = vmatpush.bf16.msra.mxu0 %v2259_v56  ;;  %v3323_v15 = vld [vmem:[%s5305_s1 + $0x194] sm:$0xf0]  ;;  %v2371_v20 = vor.u32 %v3307_v13, %v2370_v12  ;;  %v2298_v21 = vld [vmem:[%s5305_s1 + $0x80] sm:$0xf]  ;;  %v3289_v22 = vld [vmem:[%s5305_s1 + $0x84] sm:$0xf0]  ;;  %v2235_v31 = vor.u32 %v3273_v18, %v2234_v17 }
  0x15   :  { %1673 = vmatpush.bf16.msra.mxu1 %v2323_v57  ;;  %v2362_v23 = vld [vmem:[%s5305_s1 + $0x100] sm:$0xf]  ;;  %v2435_v24 = vor.u32 %v3323_v15, %v2434_v14  ;;  %v3305_v25 = vld [vmem:[%s5305_s1 + $0x104] sm:$0xf0]  ;;  %v2546_v28 = vld [vmem:[%s5305_s1 + $0x270] sm:$0xf]  ;;  %v2299_v35 = vor.u32 %v3289_v22, %v2298_v21 }
  0x16   :  { %1687 = vmatpush.bf16.msra.mxu2 %v2387_v58  ;;  %v2426_v26 = vld [vmem:[%s5305_s1 + $0x180] sm:$0xf]  ;;  %v3321_v27 = vld [vmem:[%s5305_s1 + $0x184] sm:$0xf0]  ;;  %v3351_v29 = vld [vmem:[%s5305_s1 + $0x274] sm:$0xf0]  ;;  %v2363_v36 = vor.u32 %v3305_v25, %v2362_v23 }
  0x17   :  { %1701 = vmatpush.bf16.msra.mxu3 %v2451_v62  ;;  %v2610_v30 = vld [vmem:[%s5305_s1 + $0x2f0] sm:$0xf]  ;;  %v3367_v32 = vld [vmem:[%s5305_s1 + $0x2f4] sm:$0xf0]  ;;  %v2427_v39 = vor.u32 %v3321_v27, %v2426_v26  ;;  %v2547_v40 = vor.u32 %v3351_v29, %v2546_v28  ;;  %v2538_v41 = vld [vmem:[%s5305_s1 + $0x260] sm:$0xf] }
  0x18   :  { %1660 = vmatpush.bf16.msra.mxu0 %v2251_v4  ;;  %v2674_v33 = vld [vmem:[%s5305_s1 + $0x370] sm:$0xf]  ;;  %v3383_v34 = vld [vmem:[%s5305_s1 + $0x374] sm:$0xf0]  ;;  %v3349_v42 = vld [vmem:[%s5305_s1 + $0x264] sm:$0xf0]  ;;  %v2611_v43 = vor.u32 %v3367_v32, %v2610_v30 }
  0x19   :  { %1674 = vmatpush.bf16.msra.mxu1 %v2315_v5  ;;  %v2738_v37 = vld [vmem:[%s5305_s1 + $0x3f0] sm:$0xf]  ;;  %v3399_v38 = vld [vmem:[%s5305_s1 + $0x3f4] sm:$0xf0]  ;;  %v2675_v44 = vor.u32 %v3383_v34, %v2674_v33  ;;  %v2602_v45 = vld [vmem:[%s5305_s1 + $0x2e0] sm:$0xf]  ;;  %v2539_v55 = vor.u32 %v3349_v42, %v2538_v41 }
  0x1a   :  { %1688 = vmatpush.bf16.msra.mxu2 %v2379_v6  ;;  %v3365_v46 = vld [vmem:[%s5305_s1 + $0x2e4] sm:$0xf0]  ;;  %v2666_v47 = vld [vmem:[%s5305_s1 + $0x360] sm:$0xf]  ;;  %v2739_v48 = vor.u32 %v3399_v38, %v2738_v37  ;;  %v2530_v56 = vld [vmem:[%s5305_s1 + $0x250] sm:$0xf] }
  0x1b   :  { %1702 = vmatpush.bf16.msra.mxu3 %v2443_v10  ;;  %v3381_v49 = vld [vmem:[%s5305_s1 + $0x364] sm:$0xf0]  ;;  %v2730_v50 = vld [vmem:[%s5305_s1 + $0x3e0] sm:$0xf]  ;;  %v3347_v57 = vld [vmem:[%s5305_s1 + $0x254] sm:$0xf0]  ;;  %v2603_v60 = vor.u32 %v3365_v46, %v2602_v45 }
  0x1c   :  { %1661 = vmatpush.bf16.msra.mxu0 %v2243_v16  ;;  %v3397_v51 = vld [vmem:[%s5305_s1 + $0x3e4] sm:$0xf0]  ;;  %v2170_v52 = vld [vmem:[%s5306_s0] sm:$0xf]  ;;  %v2667_v61 = vor.u32 %v3381_v49, %v2666_v47  ;;  %v2594_v62 = vld [vmem:[%s5305_s1 + $0x2d0] sm:$0xf]  ;;  %v2531_v9 = vor.u32 %v3347_v57, %v2530_v56 }
  0x1d   :  { %1675 = vmatpush.bf16.msra.mxu1 %v2307_v19  ;;  %v3264_v53 = vld [vmem:[%s5306_s0 + $0x3c] sm:$0xf0]  ;;  %v2178_v54 = vld [vmem:[%s5306_s0 + $0x8] sm:$0xf]  ;;  %v3363_v63 = vld [vmem:[%s5305_s1 + $0x2d4] sm:$0xf0]  ;;  %v2731_v2 = vor.u32 %v3397_v51, %v2730_v50 }
  0x1e   :  { %1689 = vmatpush.bf16.msra.mxu2 %v2371_v20  ;;  %v3813_v58 = vor.u32 %v3264_v53, %v2170_v52  ;;  %v3265_v59 = vld [vmem:[%s5306_s0 + $0x44] sm:$0xf0]  ;;  %v2658_v0 = vld [vmem:[%s5305_s1 + $0x350] sm:$0xf]  ;;  %v3379_v3 = vld [vmem:[%s5305_s1 + $0x354] sm:$0xf0]  ;;  %v2595_v12 = vor.u32 %v3363_v63, %v2594_v62 }
  0x1f   :  { %1703 = vmatpush.bf16.msra.mxu3 %v2435_v24  ;;  %v3827_v1 = vor.u32 %v3265_v59, %v2178_v54  ;;  %v2722_v4 = vld [vmem:[%s5305_s1 + $0x3d0] sm:$0xf]  ;;  %v3395_v5 = vld [vmem:[%s5305_s1 + $0x3d4] sm:$0xf0]  ;;  %v3256_v6 = vld [vmem:[%s5306_s0 + $0x4] sm:$0xf]  ;;  %v2659_v13 = vor.u32 %v3379_v3, %v2658_v0 }
  0x20   :  { %1662 = vmatpush.bf16.msra.mxu0 %v2235_v31  ;;  %v2172_v7 = vld [vmem:[%s5306_s0 + $0x40] sm:$0xf0]  ;;  %v3257_v8 = vld [vmem:[%s5306_s0 + $0xc] sm:$0xf]  ;;  %v2522_v14 = vld [vmem:[%s5305_s1 + $0x240] sm:$0xf]  ;;  %v2723_v18 = vor.u32 %v3395_v5, %v2722_v4 }
  0x21   :  { %1676 = vmatpush.bf16.msra.mxu1 %v2299_v35  ;;  %v3849_v10 = vor.u32 %v3256_v6, %v2172_v7  ;;  %v2180_v11 = vld [vmem:[%s5306_s0 + $0x48] sm:$0xf0]  ;;  %v3345_v15 = vld [vmem:[%s5305_s1 + $0x244] sm:$0xf0]  ;;  %v2586_v16 = vld [vmem:[%s5305_s1 + $0x2c0] sm:$0xf] }
  0x22   :  { %1690 = vmatpush.bf16.msra.mxu2 %v2363_v36  ;;  %v3863_v17 = vor.u32 %v3257_v8, %v2180_v11  ;;  %v3361_v19 = vld [vmem:[%s5305_s1 + $0x2c4] sm:$0xf0]  ;;  %v2650_v20 = vld [vmem:[%s5305_s1 + $0x340] sm:$0xf]  ;;  %v2523_v24 = vor.u32 %v3345_v15, %v2522_v14  ;;  %v2514_v27 = vld [vmem:[%s5305_s1 + $0x230] sm:$0xf] }
  0x23   :  { %1704 = vmatpush.bf16.msra.mxu3 %v2427_v39  ;;  %1663 = vmatmul.bf16.vlgmr.msra.gmra.mxu0 %v3813_v58  ;;  %v3377_v21 = vld [vmem:[%s5305_s1 + $0x344] sm:$0xf0]  ;;  %v2714_v22 = vld [vmem:[%s5305_s1 + $0x3c0] sm:$0xf]  ;;  %v2587_v25 = vor.u32 %v3361_v19, %v2586_v16  ;;  %v3343_v28 = vld [vmem:[%s5305_s1 + $0x234] sm:$0xf0] }
  0x24   :  { %1711 = vmatpush.bf16.msrb.mxu0 %v2547_v40  ;;  %1677 = vmatmul.bf16.vlgmr.msra.gmra.mxu1 %v3849_v10  ;;  %v3393_v23 = vld [vmem:[%s5305_s1 + $0x3c4] sm:$0xf0]  ;;  %v2651_v26 = vor.u32 %v3377_v21, %v2650_v20  ;;  %v2578_v29 = vld [vmem:[%s5305_s1 + $0x2b0] sm:$0xf]  ;;  %v3359_v31 = vld [vmem:[%s5305_s1 + $0x2b4] sm:$0xf0]  ;;  %v2515_v36 = vor.u32 %v3343_v28, %v2514_v27 }
  0x25   :  { %1725 = vmatpush.bf16.msrb.mxu1 %v2611_v43  ;;  %1691 = vmatmul.bf16.vlgmr.msra.gmra.mxu2 %v3827_v1  ;;  %v2715_v30 = vor.u32 %v3393_v23, %v2714_v22  ;;  %v2642_v32 = vld [vmem:[%s5305_s1 + $0x330] sm:$0xf]  ;;  %v3375_v33 = vld [vmem:[%s5305_s1 + $0x334] sm:$0xf0]  ;;  %v2579_v37 = vor.u32 %v3359_v31, %v2578_v29  ;;  %v2506_v39 = vld [vmem:[%s5305_s1 + $0x220] sm:$0xf] }
  0x26   :  { %1739 = vmatpush.bf16.msrb.mxu2 %v2675_v44  ;;  %1705 = vmatmul.bf16.vlgmr.msra.gmra.mxu3 %v3863_v17  ;;  %v2706_v34 = vld [vmem:[%s5305_s1 + $0x3b0] sm:$0xf]  ;;  %v3391_v35 = vld [vmem:[%s5305_s1 + $0x3b4] sm:$0xf0]  ;;  %v2643_v38 = vor.u32 %v3375_v33, %v2642_v32  ;;  %v3341_v40 = vld [vmem:[%s5305_s1 + $0x224] sm:$0xf0] }
  0x27   :  { %1753 = vmatpush.bf16.msrb.mxu3 %v2739_v48  ;;  %v2570_v41 = vld [vmem:[%s5305_s1 + $0x2a0] sm:$0xf]  ;;  %v2707_v42 = vor.u32 %v3391_v35, %v2706_v34  ;;  %v3357_v43 = vld [vmem:[%s5305_s1 + $0x2a4] sm:$0xf0]  ;;  %v2507_v48 = vor.u32 %v3341_v40, %v2506_v39  ;;  %v2498_v49 = vld [vmem:[%s5305_s1 + $0x210] sm:$0xf] }
  0x28   :  { %1712 = vmatpush.bf16.msrb.mxu0 %v2539_v55  ;;  %v2634_v44 = vld [vmem:[%s5305_s1 + $0x320] sm:$0xf]  ;;  %v3373_v45 = vld [vmem:[%s5305_s1 + $0x324] sm:$0xf0]  ;;  %v2571_v50 = vor.u32 %v3357_v43, %v2570_v41  ;;  %v3339_v52 = vld [vmem:[%s5305_s1 + $0x214] sm:$0xf0] }
  0x29   :  { %1726 = vmatpush.bf16.msrb.mxu1 %v2603_v60  ;;  %v2698_v46 = vld [vmem:[%s5305_s1 + $0x3a0] sm:$0xf]  ;;  %v3389_v47 = vld [vmem:[%s5305_s1 + $0x3a4] sm:$0xf0]  ;;  %v2635_v51 = vor.u32 %v3373_v45, %v2634_v44  ;;  %v2562_v53 = vld [vmem:[%s5305_s1 + $0x290] sm:$0xf]  ;;  %v2499_v63 = vor.u32 %v3339_v52, %v2498_v49 }
  0x2a   :  { %1740 = vmatpush.bf16.msrb.mxu2 %v2667_v61  ;;  %v3355_v54 = vld [vmem:[%s5305_s1 + $0x294] sm:$0xf0]  ;;  %v2699_v55 = vor.u32 %v3389_v47, %v2698_v46  ;;  %v2626_v56 = vld [vmem:[%s5305_s1 + $0x310] sm:$0xf]  ;;  %v2490_v61 = vld [vmem:[%s5305_s1 + $0x200] sm:$0xf] }
  0x2b   :  { %1754 = vmatpush.bf16.msrb.mxu3 %v2731_v2  ;;  %v3371_v57 = vld [vmem:[%s5305_s1 + $0x314] sm:$0xf0]  ;;  %v2690_v59 = vld [vmem:[%s5305_s1 + $0x390] sm:$0xf]  ;;  %v3337_v62 = vld [vmem:[%s5305_s1 + $0x204] sm:$0xf0]  ;;  %v2563_v5 = vor.u32 %v3355_v54, %v2562_v53 }
  0x2c   :  { %1713 = vmatpush.bf16.msrb.mxu0 %v2531_v9  ;;  %v3387_v60 = vld [vmem:[%s5305_s1 + $0x394] sm:$0xf0]  ;;  %v2554_v0 = vld [vmem:[%s5305_s1 + $0x280] sm:$0xf]  ;;  %v3353_v2 = vld [vmem:[%s5305_s1 + $0x284] sm:$0xf0]  ;;  %v2627_v6 = vor.u32 %v3371_v57, %v2626_v56  ;;  %v2491_v19 = vor.u32 %v3337_v62, %v2490_v61 }
  0x2d   :  { %1727 = vmatpush.bf16.msrb.mxu1 %v2595_v12  ;;  %v2618_v3 = vld [vmem:[%s5305_s1 + $0x300] sm:$0xf]  ;;  %v3369_v4 = vld [vmem:[%s5305_s1 + $0x304] sm:$0xf0]  ;;  %v2802_v9 = vld [vmem:[%s5305_s1 + $0x470] sm:$0xf]  ;;  %v2691_v11 = vor.u32 %v3387_v60, %v2690_v59  ;;  %v2555_v23 = vor.u32 %v3353_v2, %v2554_v0 }
  0x2e   :  { %1741 = vmatpush.bf16.msrb.mxu2 %v2659_v13  ;;  %v2682_v7 = vld [vmem:[%s5305_s1 + $0x380] sm:$0xf]  ;;  %v3385_v8 = vld [vmem:[%s5305_s1 + $0x384] sm:$0xf0]  ;;  %v3415_v12 = vld [vmem:[%s5305_s1 + $0x474] sm:$0xf0] }
  0x2f   :  { %1755 = vmatpush.bf16.msrb.mxu3 %v2723_v18  ;;  %v2866_v13 = vld [vmem:[%s5305_s1 + $0x4f0] sm:$0xf]  ;;  %v3431_v14 = vld [vmem:[%s5305_s1 + $0x4f4] sm:$0xf0]  ;;  %v3258_v27 = vld [vmem:[%s5306_s0 + $0x14] sm:$0xf]  ;;  %v2683_v28 = vor.u32 %v3385_v8, %v2682_v7  ;;  %v2803_v29 = vor.u32 %v3415_v12, %v2802_v9 }
  0x30   :  { %1714 = vmatpush.bf16.msrb.mxu0 %v2523_v24  ;;  %v2930_v15 = vld [vmem:[%s5305_s1 + $0x570] sm:$0xf]  ;;  %v3447_v16 = vld [vmem:[%s5305_s1 + $0x574] sm:$0xf0]  ;;  %v2619_v24 = vor.u32 %v3369_v4, %v2618_v3  ;;  %v3259_v31 = vld [vmem:[%s5306_s0 + $0x1c] sm:$0xf]  ;;  %v2867_v33 = vor.u32 %v3431_v14, %v2866_v13 }
  0x31   :  { %1728 = vmatpush.bf16.msrb.mxu1 %v2587_v25  ;;  %v2994_v18 = vld [vmem:[%s5305_s1 + $0x5f0] sm:$0xf]  ;;  %v3463_v20 = vld [vmem:[%s5305_s1 + $0x5f4] sm:$0xf0]  ;;  %v2196_v32 = vld [vmem:[%s5306_s0 + $0x58] sm:$0xf0]  ;;  %v2931_v34 = vor.u32 %v3447_v16, %v2930_v15 }
  0x32   :  { %1742 = vmatpush.bf16.msrb.mxu2 %v2651_v26  ;;  %v2186_v21 = vld [vmem:[%s5306_s0 + $0x10] sm:$0xf]  ;;  %v2194_v25 = vld [vmem:[%s5306_s0 + $0x18] sm:$0xf]  ;;  %v2794_v35 = vld [vmem:[%s5305_s1 + $0x460] sm:$0xf]  ;;  %v4056_v47 = vor.u32 %v3259_v31, %v2196_v32 }
  0x33   :  { %1756 = vmatpush.bf16.msrb.mxu3 %v2715_v30  ;;  %v3266_v22 = vld [vmem:[%s5306_s0 + $0x4c] sm:$0xf0]  ;;  %v3267_v26 = vld [vmem:[%s5306_s0 + $0x54] sm:$0xf0]  ;;  %v2188_v30 = vld [vmem:[%s5306_s0 + $0x50] sm:$0xf0] }
  0x34   :  { %1715 = vmatpush.bf16.msrb.mxu0 %v2515_v36  ;;  %v3413_v36 = vld [vmem:[%s5305_s1 + $0x464] sm:$0xf0]  ;;  %v4035_v39 = vor.u32 %v3266_v22, %v2186_v21  ;;  %v2922_v41 = vld [vmem:[%s5305_s1 + $0x560] sm:$0xf]  ;;  %v4046_v43 = vor.u32 %v3267_v26, %v2194_v25  ;;  %v4048_v44 = vor.u32 %v3258_v27, %v2188_v30  ;;  %v3411_v52 = vld [vmem:[%s5305_s1 + $0x454] sm:$0xf0] }
  0x35   :  { %1729 = vmatpush.bf16.msrb.mxu1 %v2579_v37  ;;  %v2858_v37 = vld [vmem:[%s5305_s1 + $0x4e0] sm:$0xf]  ;;  %v3429_v40 = vld [vmem:[%s5305_s1 + $0x4e4] sm:$0xf0]  ;;  %v2850_v53 = vld [vmem:[%s5305_s1 + $0x4d0] sm:$0xf] }
  0x36   :  { %1743 = vmatpush.bf16.msrb.mxu2 %v2643_v38  ;;  %v2995_v38 = vor.u32 %v3463_v20, %v2994_v18  ;;  %v2986_v45 = vld [vmem:[%s5305_s1 + $0x5e0] sm:$0xf]  ;;  %v3461_v46 = vld [vmem:[%s5305_s1 + $0x5e4] sm:$0xf0]  ;;  %v2859_v49 = vor.u32 %v3429_v40, %v2858_v37  ;;  %v2914_v56 = vld [vmem:[%s5305_s1 + $0x550] sm:$0xf] }
  0x37   :  { %1757 = vmatpush.bf16.msrb.mxu3 %v2707_v42  ;;  %v3445_v42 = vld [vmem:[%s5305_s1 + $0x564] sm:$0xf0]  ;;  %v2987_v54 = vor.u32 %v3461_v46, %v2986_v45  ;;  %v3443_v57 = vld [vmem:[%s5305_s1 + $0x554] sm:$0xf0]  ;;  %v2978_v59 = vld [vmem:[%s5305_s1 + $0x5d0] sm:$0xf] }
  0x38   :  { %1716 = vmatpush.bf16.msrb.mxu0 %v2507_v48  ;;  %v2795_v48 = vor.u32 %v3413_v36, %v2794_v35  ;;  %v3459_v60 = vld [vmem:[%s5305_s1 + $0x5d4] sm:$0xf0]  ;;  %v2778_v0 = vld [vmem:[%s5305_s1 + $0x440] sm:$0xf]  ;;  %v3409_v2 = vld [vmem:[%s5305_s1 + $0x444] sm:$0xf0] }
  0x39   :  { %1730 = vmatpush.bf16.msrb.mxu1 %v2571_v50  ;;  %v2923_v50 = vor.u32 %v3445_v42, %v2922_v41  ;;  %v2842_v3 = vld [vmem:[%s5305_s1 + $0x4c0] sm:$0xf]  ;;  %v2979_v4 = vor.u32 %v3459_v60, %v2978_v59  ;;  %v3441_v7 = vld [vmem:[%s5305_s1 + $0x544] sm:$0xf0]  ;;  %v2770_v14 = vld [vmem:[%s5305_s1 + $0x430] sm:$0xf] }
  0x3a   :  { %1744 = vmatpush.bf16.msrb.mxu2 %v2635_v51  ;;  %v2786_v51 = vld [vmem:[%s5305_s1 + $0x450] sm:$0xf]  ;;  %v2970_v8 = vld [vmem:[%s5305_s1 + $0x5c0] sm:$0xf]  ;;  %v3457_v9 = vld [vmem:[%s5305_s1 + $0x5c4] sm:$0xf0] }
  0x3b   :  { %1758 = vmatpush.bf16.msrb.mxu3 %v2699_v55  ;;  %v3427_v55 = vld [vmem:[%s5305_s1 + $0x4d4] sm:$0xf0]  ;;  %v2787_v61 = vor.u32 %v3411_v52, %v2786_v51  ;;  %v2834_v16 = vld [vmem:[%s5305_s1 + $0x4b0] sm:$0xf]  ;;  %v2971_v18 = vor.u32 %v3457_v9, %v2970_v8  ;;  %v2762_v27 = vld [vmem:[%s5305_s1 + $0x420] sm:$0xf] }
  0x3c   :  { %1717 = vmatpush.bf16.msrb.mxu0 %v2499_v63  ;;  %v2851_v62 = vor.u32 %v3427_v55, %v2850_v53  ;;  %v2915_v63 = vor.u32 %v3443_v57, %v2914_v56  ;;  %v3407_v15 = vld [vmem:[%s5305_s1 + $0x434] sm:$0xf0]  ;;  %v2898_v20 = vld [vmem:[%s5305_s1 + $0x530] sm:$0xf]  ;;  %v3421_v31 = vld [vmem:[%s5305_s1 + $0x4a4] sm:$0xf0] }
  0x3d   :  { %1731 = vmatpush.bf16.msrb.mxu1 %v2563_v5  ;;  %v3425_v5 = vld [vmem:[%s5305_s1 + $0x4c4] sm:$0xf0]  ;;  %v3439_v21 = vld [vmem:[%s5305_s1 + $0x534] sm:$0xf0]  ;;  %v2962_v22 = vld [vmem:[%s5305_s1 + $0x5b0] sm:$0xf] }
  0x3e   :  { %1745 = vmatpush.bf16.msrb.mxu2 %v2627_v6  ;;  %v2906_v6 = vld [vmem:[%s5305_s1 + $0x540] sm:$0xf]  ;;  %v2843_v12 = vor.u32 %v3425_v5, %v2842_v3  ;;  %v2899_v26 = vor.u32 %v3439_v21, %v2898_v20  ;;  %v3453_v35 = vld [vmem:[%s5305_s1 + $0x5a4] sm:$0xf0]  ;;  %v2754_v37 = vld [vmem:[%s5305_s1 + $0x410] sm:$0xf] }
  0x3f   :  { %1759 = vmatpush.bf16.msrb.mxu3 %v2691_v11  ;;  %v2779_v11 = vor.u32 %v3409_v2, %v2778_v0  ;;  %v2907_v13 = vor.u32 %v3441_v7, %v2906_v6  ;;  %v2890_v32 = vld [vmem:[%s5305_s1 + $0x520] sm:$0xf]  ;;  %v3403_v41 = vld [vmem:[%s5305_s1 + $0x414] sm:$0xf0]  ;;  %v2818_v42 = vld [vmem:[%s5305_s1 + $0x490] sm:$0xf] }
  0x40   :  { %1718 = vmatpush.bf16.msrb.mxu0 %v2491_v19  ;;  %v3423_v19 = vld [vmem:[%s5305_s1 + $0x4b4] sm:$0xf0]  ;;  %v2746_v52 = vld [vmem:[%s5305_s1 + $0x400] sm:$0xf]  ;;  %v3401_v53 = vld [vmem:[%s5305_s1 + $0x404] sm:$0xf0] }
  0x41   :  { %1732 = vmatpush.bf16.msrb.mxu1 %v2555_v23  ;;  %v3455_v23 = vld [vmem:[%s5305_s1 + $0x5b4] sm:$0xf0]  ;;  %v2835_v25 = vor.u32 %v3423_v19, %v2834_v16  ;;  %v2810_v55 = vld [vmem:[%s5305_s1 + $0x480] sm:$0xf]  ;;  %v3417_v56 = vld [vmem:[%s5305_s1 + $0x484] sm:$0xf0]  ;;  %v2747_v9 = vor.u32 %v3401_v53, %v2746_v52 }
  0x42   :  { %1746 = vmatpush.bf16.msrb.mxu2 %v2619_v24  ;;  %v2771_v24 = vor.u32 %v3407_v15, %v2770_v14  ;;  %v2963_v30 = vor.u32 %v3455_v23, %v2962_v22  ;;  %v3419_v45 = vld [vmem:[%s5305_s1 + $0x494] sm:$0xf0]  ;;  %v2874_v57 = vld [vmem:[%s5305_s1 + $0x500] sm:$0xf]  ;;  %v3433_v59 = vld [vmem:[%s5305_s1 + $0x504] sm:$0xf0]  ;;  %v2811_v14 = vor.u32 %v3417_v56, %v2810_v55 }
  0x43   :  { %1760 = vmatpush.bf16.msrb.mxu3 %v2683_v28  ;;  %1719 = vmatmul.bf16.vlgmr.msrb.gmra.mxu0 %v4035_v39  ;;  %v3405_v28 = vld [vmem:[%s5305_s1 + $0x424] sm:$0xf0]  ;;  %v3451_v51 = vld [vmem:[%s5305_s1 + $0x594] sm:$0xf0]  ;;  %v2819_v60 = vor.u32 %v3419_v45, %v2818_v42  ;;  %v3058_v0 = vld [vmem:[%s5305_s1 + $0x670] sm:$0xf]  ;;  %v2875_v15 = vor.u32 %v3433_v59, %v2874_v57 }
  0x44   :  { %1767 = vmatpush.bf16.msra.mxu0 %v2803_v29  ;;  %1733 = vmatmul.bf16.vlgmr.msrb.gmra.mxu1 %v4048_v44  ;;  %v2826_v29 = vld [vmem:[%s5305_s1 + $0x4a0] sm:$0xf]  ;;  %v2763_v36 = vor.u32 %v3405_v28, %v2762_v27  ;;  %v3479_v3 = vld [vmem:[%s5305_s1 + $0x674] sm:$0xf0]  ;;  %v3186_v6 = vld [vmem:[%s5305_s1 + $0x770] sm:$0xf] }
  0x45   :  { %1781 = vmatpush.bf16.msra.mxu1 %v2867_v33  ;;  %1747 = vmatmul.bf16.vlgmr.msrb.gmra.mxu2 %v4046_v43  ;;  %v3437_v33 = vld [vmem:[%s5305_s1 + $0x524] sm:$0xf0]  ;;  %v3495_v5 = vld [vmem:[%s5305_s1 + $0x6f4] sm:$0xf0]  ;;  %v3250_v8 = vld [vmem:[%s5305_s1 + $0x7f0] sm:$0xf]  ;;  %v3059_v21 = vor.u32 %v3479_v3, %v3058_v0 }
  0x46   :  { %1795 = vmatpush.bf16.msra.mxu2 %v2931_v34  ;;  %1761 = vmatmul.bf16.vlgmr.msrb.gmra.mxu3 %v4056_v47  ;;  %v2954_v34 = vld [vmem:[%s5305_s1 + $0x5a0] sm:$0xf]  ;;  %v2891_v40 = vor.u32 %v3437_v33, %v2890_v32  ;;  %v3511_v7 = vld [vmem:[%s5305_s1 + $0x774] sm:$0xf0]  ;;  %v2210_v16 = vld [vmem:[%s5306_s0 + $0x28] sm:$0xf] }
  0x47   :  { %1809 = vmatpush.bf16.msra.mxu3 %v2995_v38  ;;  %v2827_v38 = vor.u32 %v3421_v31, %v2826_v29  ;;  %v2955_v46 = vor.u32 %v3453_v35, %v2954_v34  ;;  %v3260_v19 = vld [vmem:[%s5306_s0 + $0x24] sm:$0xf]  ;;  %v3261_v23 = vld [vmem:[%s5306_s0 + $0x2c] sm:$0xf]  ;;  %v3050_v27 = vld [vmem:[%s5305_s1 + $0x660] sm:$0xf] }
  0x48   :  { %1768 = vmatpush.bf16.msra.mxu0 %v2795_v48  ;;  %v2882_v48 = vld [vmem:[%s5305_s1 + $0x510] sm:$0xf]  ;;  %v2204_v22 = vld [vmem:[%s5306_s0 + $0x60] sm:$0xf0]  ;;  %v3477_v28 = vld [vmem:[%s5305_s1 + $0x664] sm:$0xf0] }
  0x49   :  { %1782 = vmatpush.bf16.msra.mxu1 %v2859_v49  ;;  %v3435_v49 = vld [vmem:[%s5305_s1 + $0x514] sm:$0xf0]  ;;  %v3114_v29 = vld [vmem:[%s5305_s1 + $0x6e0] sm:$0xf]  ;;  %v3493_v32 = vld [vmem:[%s5305_s1 + $0x6e4] sm:$0xf0] }
  0x4a   :  { %1796 = vmatpush.bf16.msra.mxu2 %v2923_v50  ;;  %v2946_v50 = vld [vmem:[%s5305_s1 + $0x590] sm:$0xf]  ;;  %v3178_v33 = vld [vmem:[%s5305_s1 + $0x760] sm:$0xf]  ;;  %v3509_v34 = vld [vmem:[%s5305_s1 + $0x764] sm:$0xf0]  ;;  %v3115_v42 = vor.u32 %v3493_v32, %v3114_v29 }
  0x4b   :  { %1810 = vmatpush.bf16.msra.mxu3 %v2987_v54  ;;  %v2755_v54 = vor.u32 %v3403_v41, %v2754_v37  ;;  %v2947_v2 = vor.u32 %v3451_v51, %v2946_v50  ;;  %v3242_v37 = vld [vmem:[%s5305_s1 + $0x7e0] sm:$0xf]  ;;  %v3051_v41 = vor.u32 %v3477_v28, %v3050_v27  ;;  %v3179_v45 = vor.u32 %v3509_v34, %v3178_v33  ;;  %v3491_v51 = vld [vmem:[%s5305_s1 + $0x6d4] sm:$0xf0]  ;;  %v3170_v52 = vld [vmem:[%s5305_s1 + $0x750] sm:$0xf] }
  0x4c   :  { %1769 = vmatpush.bf16.msra.mxu0 %v2787_v61  ;;  %v2883_v61 = vor.u32 %v3435_v49, %v2882_v48  ;;  %v3475_v48 = vld [vmem:[%s5305_s1 + $0x654] sm:$0xf0]  ;;  %v3106_v49 = vld [vmem:[%s5305_s1 + $0x6d0] sm:$0xf]  ;;  %v3489_v0 = vld [vmem:[%s5305_s1 + $0x6c4] sm:$0xf0] }
  0x4d   :  { %1783 = vmatpush.bf16.msra.mxu1 %v2851_v62  ;;  %v2938_v62 = vld [vmem:[%s5305_s1 + $0x580] sm:$0xf]  ;;  %v3507_v53 = vld [vmem:[%s5305_s1 + $0x754] sm:$0xf0]  ;;  %v3107_v57 = vor.u32 %v3491_v51, %v3106_v49  ;;  %v3505_v3 = vld [vmem:[%s5305_s1 + $0x744] sm:$0xf0] }
  0x4e   :  { %1797 = vmatpush.bf16.msra.mxu2 %v2915_v63  ;;  %v3449_v63 = vld [vmem:[%s5305_s1 + $0x584] sm:$0xf0]  ;;  %v3523_v55 = vld [vmem:[%s5305_s1 + $0x7d4] sm:$0xf0]  ;;  %v3171_v59 = vor.u32 %v3507_v53, %v3170_v52  ;;  %v3146_v28 = vld [vmem:[%s5305_s1 + $0x720] sm:$0xf] }
  0x4f   :  { %1811 = vmatpush.bf16.msra.mxu3 %v2979_v4  ;;  %v3122_v4 = vld [vmem:[%s5305_s1 + $0x6f0] sm:$0xf]  ;;  %v2939_v20 = vor.u32 %v3449_v63, %v2938_v62  ;;  %v3098_v62 = vld [vmem:[%s5305_s1 + $0x6c0] sm:$0xf]  ;;  %v3485_v27 = vld [vmem:[%s5305_s1 + $0x6a4] sm:$0xf0] }
  0x50   :  { %1770 = vmatpush.bf16.msra.mxu0 %v2779_v11  ;;  %v3527_v11 = vld [vmem:[%s5305_s1 + $0x7f4] sm:$0xf0]  ;;  %v3501_v29 = vld [vmem:[%s5305_s1 + $0x724] sm:$0xf0]  ;;  %v3010_v34 = vld [vmem:[%s5305_s1 + $0x610] sm:$0xf] }
  0x51   :  { %1784 = vmatpush.bf16.msra.mxu1 %v2843_v12  ;;  %v2202_v12 = vld [vmem:[%s5306_s0 + $0x20] sm:$0xf]  ;;  %v3517_v32 = vld [vmem:[%s5305_s1 + $0x7a4] sm:$0xf0]  ;;  %v3499_v49 = vld [vmem:[%s5305_s1 + $0x714] sm:$0xf0] }
  0x52   :  { %1798 = vmatpush.bf16.msra.mxu2 %v2907_v13  ;;  %v3268_v13 = vld [vmem:[%s5306_s0 + $0x5c] sm:$0xf0]  ;;  %v3515_v51 = vld [vmem:[%s5305_s1 + $0x794] sm:$0xf0]  ;;  %v3465_v53 = vld [vmem:[%s5305_s1 + $0x604] sm:$0xf0] }
  0x53   :  { %1812 = vmatpush.bf16.msra.mxu3 %v2971_v18  ;;  %v3269_v18 = vld [vmem:[%s5306_s0 + $0x64] sm:$0xf0]  ;;  %v4263_v31 = vor.u32 %v3268_v13, %v2202_v12  ;;  %v3090_v12 = vld [vmem:[%s5305_s1 + $0x6b0] sm:$0xf]  ;;  %v3002_v52 = vld [vmem:[%s5305_s1 + $0x600] sm:$0xf] }
  0x54   :  { %1771 = vmatpush.bf16.msra.mxu0 %v2771_v24  ;;  %v2212_v24 = vld [vmem:[%s5306_s0 + $0x68] sm:$0xf0]  ;;  %v4274_v35 = vor.u32 %v3269_v18, %v2210_v16  ;;  %v3503_v16 = vld [vmem:[%s5305_s1 + $0x734] sm:$0xf0]  ;;  %v3218_v18 = vld [vmem:[%s5305_s1 + $0x7b0] sm:$0xf] }
  0x55   :  { %1785 = vmatpush.bf16.msra.mxu1 %v2835_v25  ;;  %v3123_v25 = vor.u32 %v3495_v5, %v3122_v4  ;;  %v3226_v4 = vld [vmem:[%s5305_s1 + $0x7c0] sm:$0xf]  ;;  %v3521_v5 = vld [vmem:[%s5305_s1 + $0x7c4] sm:$0xf0] }
  0x56   :  { %1799 = vmatpush.bf16.msra.mxu2 %v2899_v26  ;;  %v3187_v26 = vor.u32 %v3511_v7, %v3186_v6  ;;  %v3099_v7 = vor.u32 %v3489_v0, %v3098_v62  ;;  %v3227_v13 = vor.u32 %v3521_v5, %v3226_v4  ;;  %v3194_v62 = vld [vmem:[%s5305_s1 + $0x780] sm:$0xf]  ;;  %v3286_v0 = vld [vmem:[%s5305_s1 + $0x74] sm:$0xf]  ;;  %v2356_v5 = vld [vmem:[%s5305_s1 + $0xf8] sm:$0xf0] }
  0x57   :  { %1813 = vmatpush.bf16.msra.mxu3 %v2963_v30  ;;  %v3251_v30 = vor.u32 %v3527_v11, %v3250_v8  ;;  %v3471_v11 = vld [vmem:[%s5305_s1 + $0x634] sm:$0xf0]  ;;  %v3302_v4 = vld [vmem:[%s5305_s1 + $0xf4] sm:$0xf] }
  0x58   :  { %1772 = vmatpush.bf16.msra.mxu0 %v2763_v36  ;;  %v4276_v36 = vor.u32 %v3260_v19, %v2204_v22  ;;  %v3519_v19 = vld [vmem:[%s5305_s1 + $0x7b4] sm:$0xf0] }
  0x59   :  { %1786 = vmatpush.bf16.msra.mxu1 %v2827_v38  ;;  %v3525_v38 = vld [vmem:[%s5305_s1 + $0x7e4] sm:$0xf0] }
  0x5a   :  { %1800 = vmatpush.bf16.msra.mxu2 %v2891_v40  ;;  %v4284_v40 = vor.u32 %v3261_v23, %v2212_v24  ;;  %v3243_v50 = vor.u32 %v3525_v38, %v3242_v37  ;;  %v3018_v23 = vld [vmem:[%s5305_s1 + $0x620] sm:$0xf]  ;;  %v3469_v24 = vld [vmem:[%s5305_s1 + $0x624] sm:$0xf0]  ;;  %v3147_v38 = vor.u32 %v3501_v29, %v3146_v28  ;;  %v2284_v28 = vld [vmem:[%s5305_s1 + $0x68] sm:$0xf0] }
  0x5b   :  { %1814 = vmatpush.bf16.msra.mxu3 %v2955_v46  ;;  %v3042_v46 = vld [vmem:[%s5305_s1 + $0x650] sm:$0xf]  ;;  %v3019_v33 = vor.u32 %v3469_v24, %v3018_v23  ;;  %v3263_v23 = vld [vmem:[%s5306_s0 + $0x3c] sm:$0xf]  ;;  %v3300_v29 = vld [vmem:[%s5305_s1 + $0xe4] sm:$0xf] }
  0x5c   :  { %1773 = vmatpush.bf16.msra.mxu0 %v2755_v54  ;;  %v3234_v54 = vld [vmem:[%s5305_s1 + $0x7d0] sm:$0xf]  ;;  %v3043_v56 = vor.u32 %v3475_v48, %v3042_v46  ;;  %v2228_v24 = vld [vmem:[%s5306_s0 + $0x78] sm:$0xf0] }
  0x5d   :  { %1787 = vmatpush.bf16.msra.mxu1 %v2819_v60  ;;  %v3034_v60 = vld [vmem:[%s5305_s1 + $0x640] sm:$0xf]  ;;  %v3235_v63 = vor.u32 %v3523_v55, %v3234_v54  ;;  %v3138_v48 = vld [vmem:[%s5305_s1 + $0x710] sm:$0xf] }
  0x5e   :  { %1801 = vmatpush.bf16.msra.mxu2 %v2883_v61  ;;  %v3473_v61 = vld [vmem:[%s5305_s1 + $0x644] sm:$0xf0]  ;;  %v3066_v55 = vld [vmem:[%s5305_s1 + $0x680] sm:$0xf] }
  0x5f   :  { %1815 = vmatpush.bf16.msra.mxu3 %v2947_v2  ;;  %v3162_v2 = vld [vmem:[%s5305_s1 + $0x740] sm:$0xf]  ;;  %v3035_v6 = vor.u32 %v3473_v61, %v3034_v60  ;;  %v3139_v61 = vor.u32 %v3499_v49, %v3138_v48 }
  0x60   :  { %1774 = vmatpush.bf16.msra.mxu0 %v2747_v9  ;;  %v3163_v8 = vor.u32 %v3505_v3, %v3162_v2  ;;  %v3026_v9 = vld [vmem:[%s5305_s1 + $0x630] sm:$0xf]  ;;  %v2292_v3 = vld [vmem:[%s5305_s1 + $0x78] sm:$0xf0] }
  0x61   :  { %1788 = vmatpush.bf16.msra.mxu1 %v2811_v14  ;;  %v3487_v14 = vld [vmem:[%s5305_s1 + $0x6b4] sm:$0xf0] }
  0x62   :  { %1802 = vmatpush.bf16.msra.mxu2 %v2875_v15  ;;  %v3154_v15 = vld [vmem:[%s5305_s1 + $0x730] sm:$0xf] }
  0x63   :  { %1816 = vmatpush.bf16.msra.mxu3 %v2939_v20  ;;  %1775 = vmatmul.bf16.vlgmr.msra.gmra.mxu0 %v4263_v31  ;;  %v3027_v20 = vor.u32 %v3471_v11, %v3026_v9  ;;  %v3155_v22 = vor.u32 %v3503_v16, %v3154_v15  ;;  %v3003_v9 = vor.u32 %v3465_v53, %v3002_v52  ;;  %v2484_v11 = vld [vmem:[%s5305_s1 + $0x1f8] sm:$0xf0]  ;;  %v2226_v16 = vld [vmem:[%s5306_s0 + $0x38] sm:$0xf]  ;;  %v3298_v53 = vld [vmem:[%s5305_s1 + $0xd4] sm:$0xf] }
  0x64   :  { %1823 = vmatpush.bf16.msrb.mxu0 %v3059_v21  ;;  %1789 = vmatmul.bf16.vlgmr.msra.gmra.mxu1 %v4276_v36  ;;  %v3091_v21 = vor.u32 %v3487_v14, %v3090_v12  ;;  %v2218_v12 = vld [vmem:[%s5306_s0 + $0x30] sm:$0xf]  ;;  %v2276_v52 = vld [vmem:[%s5305_s1 + $0x58] sm:$0xf0] }
  0x65   :  { %1837 = vmatpush.bf16.msrb.mxu1 %v3123_v25  ;;  %1803 = vmatmul.bf16.vlgmr.msra.gmra.mxu2 %v4274_v35  ;;  %v3082_v25 = vld [vmem:[%s5305_s1 + $0x6a0] sm:$0xf] }
  0x66   :  { %1851 = vmatpush.bf16.msrb.mxu2 %v3187_v26  ;;  %1817 = vmatmul.bf16.vlgmr.msra.gmra.mxu3 %v4284_v40  ;;  %v3219_v26 = vor.u32 %v3519_v19, %v3218_v18  ;;  %v3083_v37 = vor.u32 %v3485_v27, %v3082_v25  ;;  %v3271_v18 = vld [vmem:[%s5306_s0 + $0x74] sm:$0xf0]  ;;  %v3262_v19 = vld [vmem:[%s5306_s0 + $0x34] sm:$0xf]  ;;  %v2359_v25 = vor.u32 %v3302_v4, %v2356_v5  ;;  %v3284_v27 = vld [vmem:[%s5305_s1 + $0x64] sm:$0xf] }
  0x67   :  { %1865 = vmatpush.bf16.msrb.mxu3 %v3251_v30  ;;  %v3210_v30 = vld [vmem:[%s5305_s1 + $0x7a0] sm:$0xf]  ;;  %v2287_v48 = vor.u32 %v3284_v27, %v2284_v28  ;;  %v2332_v5 = vld [vmem:[%s5305_s1 + $0xc8] sm:$0xf0]  ;;  %v3276_v27 = vld [vmem:[%s5305_s1 + $0x24] sm:$0xf] }
  0x68   :  { %1824 = vmatpush.bf16.msrb.mxu0 %v3051_v41  ;;  %v3467_v41 = vld [vmem:[%s5305_s1 + $0x614] sm:$0xf0]  ;;  %v3211_v46 = vor.u32 %v3517_v32, %v3210_v30  ;;  %v2252_v28 = vld [vmem:[%s5305_s1 + $0x28] sm:$0xf0] }
  0x69   :  { %1838 = vmatpush.bf16.msrb.mxu1 %v3115_v42  ;;  %v3074_v42 = vld [vmem:[%s5305_s1 + $0x690] sm:$0xf]  ;;  %v3011_v54 = vor.u32 %v3467_v41, %v3010_v34  ;;  %v3316_v34 = vld [vmem:[%s5305_s1 + $0x164] sm:$0xf] }
  0x6a   :  { %1852 = vmatpush.bf16.msrb.mxu2 %v3179_v45  ;;  %v3483_v45 = vld [vmem:[%s5305_s1 + $0x694] sm:$0xf0] }
  0x6b   :  { %1866 = vmatpush.bf16.msrb.mxu3 %v3243_v50  ;;  %v3202_v50 = vld [vmem:[%s5305_s1 + $0x790] sm:$0xf]  ;;  %v3075_v60 = vor.u32 %v3483_v45, %v3074_v42  ;;  %v3332_v42 = vld [vmem:[%s5305_s1 + $0x1e4] sm:$0xf]  ;;  %v2476_v45 = vld [vmem:[%s5305_s1 + $0x1e8] sm:$0xf0] }
  0x6c   :  { %1825 = vmatpush.bf16.msrb.mxu0 %v3043_v56  ;;  %v3481_v56 = vld [vmem:[%s5305_s1 + $0x684] sm:$0xf0]  ;;  %v3203_v2 = vor.u32 %v3515_v51, %v3202_v50  ;;  %v3282_v51 = vld [vmem:[%s5305_s1 + $0x54] sm:$0xf] }
  0x6d   :  { %1839 = vmatpush.bf16.msrb.mxu1 %v3107_v57  ;;  %v3130_v57 = vld [vmem:[%s5305_s1 + $0x700] sm:$0xf]  ;;  %v3067_v14 = vor.u32 %v3481_v56, %v3066_v55  ;;  %v2340_v55 = vld [vmem:[%s5305_s1 + $0xd8] sm:$0xf0]  ;;  %v3314_v56 = vld [vmem:[%s5305_s1 + $0x154] sm:$0xf] }
  0x6e   :  { %1853 = vmatpush.bf16.msrb.mxu2 %v3171_v59  ;;  %v3497_v59 = vld [vmem:[%s5305_s1 + $0x704] sm:$0xf0] }
  0x6f   :  { %1867 = vmatpush.bf16.msrb.mxu3 %v3235_v63  ;;  %v3513_v63 = vld [vmem:[%s5305_s1 + $0x784] sm:$0xf0]  ;;  %v3131_v15 = vor.u32 %v3497_v59, %v3130_v57  ;;  %v2404_v57 = vld [vmem:[%s5305_s1 + $0x158] sm:$0xf0]  ;;  %v3330_v59 = vld [vmem:[%s5305_s1 + $0x1d4] sm:$0xf] }
  0x70   :  { %1826 = vmatpush.bf16.msrb.mxu0 %v3035_v6  ;;  %v3318_v6 = vld [vmem:[%s5305_s1 + $0x174] sm:$0xf] }
  0x71   :  { %1840 = vmatpush.bf16.msrb.mxu1 %v3099_v7  ;;  %v2420_v7 = vld [vmem:[%s5305_s1 + $0x178] sm:$0xf0] }
  0x72   :  { %1854 = vmatpush.bf16.msrb.mxu2 %v3163_v8  ;;  %v3334_v8 = vld [vmem:[%s5305_s1 + $0x1f4] sm:$0xf] }
  0x73   :  { %1868 = vmatpush.bf16.msrb.mxu3 %v3227_v13  ;;  %v3270_v13 = vld [vmem:[%s5306_s0 + $0x6c] sm:$0xf0]  ;;  %v2487_v30 = vor.u32 %v3334_v8, %v2484_v11  ;;  %v3328_v8 = vld [vmem:[%s5305_s1 + $0x1c4] sm:$0xf] }
  0x74   :  { %1827 = vmatpush.bf16.msrb.mxu0 %v3027_v20  ;;  %v3195_v20 = vor.u32 %v3513_v63, %v3194_v62  ;;  %v4491_v32 = vor.u32 %v3270_v13, %v2218_v12  ;;  %v2343_v62 = vor.u32 %v3298_v53, %v2340_v55  ;;  %v2407_v63 = vor.u32 %v3314_v56, %v2404_v57  ;;  %v3290_v53 = vld [vmem:[%s5305_s1 + $0x94] sm:$0xf]  ;;  %v2308_v55 = vld [vmem:[%s5305_s1 + $0x98] sm:$0xf0] }
  0x75   :  { %1841 = vmatpush.bf16.msrb.mxu1 %v3091_v21  ;;  %v2295_v21 = vor.u32 %v3286_v0, %v2292_v3  ;;  %v3280_v0 = vld [vmem:[%s5305_s1 + $0x44] sm:$0xf]  ;;  %v3306_v56 = vld [vmem:[%s5305_s1 + $0x114] sm:$0xf]  ;;  %v2372_v57 = vld [vmem:[%s5305_s1 + $0x118] sm:$0xf0] }
  0x76   :  { %1855 = vmatpush.bf16.msrb.mxu2 %v3155_v22  ;;  %v2220_v22 = vld [vmem:[%s5306_s0 + $0x70] sm:$0xf0]  ;;  %v3296_v3 = vld [vmem:[%s5305_s1 + $0xc4] sm:$0xf] }
  0x77   :  { %1869 = vmatpush.bf16.msrb.mxu3 %v3219_v26  ;;  %v2423_v26 = vor.u32 %v3318_v6, %v2420_v7  ;;  %v4504_v41 = vor.u32 %v3262_v19, %v2220_v22  ;;  %v3312_v6 = vld [vmem:[%s5305_s1 + $0x144] sm:$0xf]  ;;  %v2396_v7 = vld [vmem:[%s5305_s1 + $0x148] sm:$0xf0]  ;;  %v2335_v12 = vor.u32 %v3296_v3, %v2332_v5  ;;  %v2324_v19 = vld [vmem:[%s5305_s1 + $0xb8] sm:$0xf0] }
  0x78   :  { %1828 = vmatpush.bf16.msrb.mxu0 %v3019_v33  ;;  %v2348_v33 = vld [vmem:[%s5305_s1 + $0xe8] sm:$0xf0]  ;;  %v2399_v13 = vor.u32 %v3312_v6, %v2396_v7  ;;  %v3326_v22 = vld [vmem:[%s5305_s1 + $0x1b4] sm:$0xf]  ;;  %v3288_v3 = vld [vmem:[%s5305_s1 + $0x84] sm:$0xf] }
  0x79   :  { %1842 = vmatpush.bf16.msrb.mxu1 %v3083_v37  ;;  %v2412_v37 = vld [vmem:[%s5305_s1 + $0x168] sm:$0xf0]  ;;  %v2351_v49 = vor.u32 %v3300_v29, %v2348_v33  ;;  %v3292_v29 = vld [vmem:[%s5305_s1 + $0xa4] sm:$0xf] }
  0x7a   :  { %1856 = vmatpush.bf16.msrb.mxu2 %v3147_v38  ;;  %v4502_v38 = vor.u32 %v3271_v18, %v2226_v16  ;;  %v2415_v50 = vor.u32 %v3316_v34, %v2412_v37  ;;  %v3294_v16 = vld [vmem:[%s5305_s1 + $0xb4] sm:$0xf]  ;;  %v2316_v33 = vld [vmem:[%s5305_s1 + $0xa8] sm:$0xf0]  ;;  %v3308_v34 = vld [vmem:[%s5305_s1 + $0x124] sm:$0xf] }
  0x7b   :  { %1870 = vmatpush.bf16.msrb.mxu3 %v3211_v46  ;;  %v4512_v46 = vor.u32 %v3263_v23, %v2228_v24  ;;  %v2452_v23 = vld [vmem:[%s5305_s1 + $0x1b8] sm:$0xf0]  ;;  %v2380_v37 = vld [vmem:[%s5305_s1 + $0x128] sm:$0xf0]  ;;  %v3304_v5 = vld [vmem:[%s5305_s1 + $0x104] sm:$0xf] }
  0x7c   :  { %1829 = vmatpush.bf16.msrb.mxu0 %v3011_v54  ;;  %v2479_v54 = vor.u32 %v3332_v42, %v2476_v45  ;;  %v3324_v42 = vld [vmem:[%s5305_s1 + $0x1a4] sm:$0xf]  ;;  %v2444_v45 = vld [vmem:[%s5305_s1 + $0x1a8] sm:$0xf0] }
  0x7d   :  { %1843 = vmatpush.bf16.msrb.mxu1 %v3075_v60  ;;  %v2468_v60 = vld [vmem:[%s5305_s1 + $0x1d8] sm:$0xf0]  ;;  %v2364_v7 = vld [vmem:[%s5305_s1 + $0x108] sm:$0xf0] }
  0x7e   :  { %1857 = vmatpush.bf16.msrb.mxu2 %v3139_v61  ;;  %v2279_v61 = vor.u32 %v3282_v51, %v2276_v52  ;;  %v2471_v4 = vor.u32 %v3330_v59, %v2468_v60  ;;  %v3274_v51 = vld [vmem:[%s5305_s1 + $0x14] sm:$0xf]  ;;  %v2244_v52 = vld [vmem:[%s5305_s1 + $0x18] sm:$0xf0] }
  0x7f   :  { %1871 = vmatpush.bf16.msrb.mxu3 %v3203_v2  ;;  %v2268_v2 = vld [vmem:[%s5305_s1 + $0x48] sm:$0xf0]  ;;  %v3322_v59 = vld [vmem:[%s5305_s1 + $0x194] sm:$0xf]  ;;  %v2436_v60 = vld [vmem:[%s5305_s1 + $0x198] sm:$0xf0] }
  0x80   :  { %1830 = vmatpush.bf16.msrb.mxu0 %v3003_v9  ;;  %v2460_v9 = vld [vmem:[%s5305_s1 + $0x1c8] sm:$0xf0]  ;;  %v2271_v11 = vor.u32 %v3280_v0, %v2268_v2  ;;  %v2311_v0 = vor.u32 %v3290_v53, %v2308_v55  ;;  %v2375_v2 = vor.u32 %v3306_v56, %v2372_v57  ;;  %v2439_v6 = vor.u32 %v3322_v59, %v2436_v60  ;;  %v3362_v53 = vld [vmem:[%s5305_s1 + $0x2d4] sm:$0xf]  ;;  %v2596_v56 = vld [vmem:[%s5305_s1 + $0x2d8] sm:$0xf0] }
  0x81   :  { %1844 = vmatpush.bf16.msrb.mxu1 %v3067_v14  ;;  %v3278_v14 = vld [vmem:[%s5305_s1 + $0x34] sm:$0xf]  ;;  %v2463_v18 = vor.u32 %v3328_v8, %v2460_v9  ;;  %v3320_v8 = vld [vmem:[%s5305_s1 + $0x184] sm:$0xf]  ;;  %v2428_v9 = vld [vmem:[%s5305_s1 + $0x188] sm:$0xf0] }
  0x82   :  { %1858 = vmatpush.bf16.msrb.mxu2 %v3131_v15  ;;  %v2260_v15 = vld [vmem:[%s5305_s1 + $0x38] sm:$0xf0]  ;;  %v3378_v57 = vld [vmem:[%s5305_s1 + $0x354] sm:$0xf] }
  0x83   :  { %1872 = vmatpush.bf16.msrb.mxu3 %v3195_v20  ;;  %1831 = vmatmul.bf16.vlgmr.msrb.gmra.mxu0 %v4491_v32  ;;  %v3310_v20 = vld [vmem:[%s5305_s1 + $0x134] sm:$0xf]  ;;  %v2263_v24 = vor.u32 %v3278_v14, %v2260_v15  ;;  %v2612_v15 = vld [vmem:[%s5305_s1 + $0x2f8] sm:$0xf0] }
  0x84   :  { %1879 = vmatpush.bf16.msra.mxu0 %v2295_v21  ;;  %1845 = vmatmul.bf16.vlgmr.msrb.gmra.mxu1 %v4504_v41  ;;  %v2388_v21 = vld [vmem:[%s5305_s1 + $0x138] sm:$0xf0]  ;;  %v3394_v60 = vld [vmem:[%s5305_s1 + $0x3d4] sm:$0xf] }
  0x85   :  { %1893 = vmatpush.bf16.msra.mxu1 %v2359_v25  ;;  %1859 = vmatmul.bf16.vlgmr.msrb.gmra.mxu2 %v4502_v38  ;;  %v2327_v25 = vor.u32 %v3294_v16, %v2324_v19  ;;  %v3382_v16 = vld [vmem:[%s5305_s1 + $0x374] sm:$0xf]  ;;  %v2660_v59 = vld [vmem:[%s5305_s1 + $0x358] sm:$0xf0] }
  0x86   :  { %1907 = vmatpush.bf16.msra.mxu2 %v2423_v26  ;;  %1873 = vmatmul.bf16.vlgmr.msrb.gmra.mxu3 %v4512_v46  ;;  %v2391_v26 = vor.u32 %v3310_v20, %v2388_v21  ;;  %v2367_v20 = vor.u32 %v3304_v5, %v2364_v7  ;;  %v3398_v21 = vld [vmem:[%s5305_s1 + $0x3f4] sm:$0xf]  ;;  %v2652_v5 = vld [vmem:[%s5305_s1 + $0x348] sm:$0xf0] }
  0x87   :  { %1921 = vmatpush.bf16.msra.mxu3 %v2487_v30  ;;  %v2455_v30 = vor.u32 %v3326_v22, %v2452_v23  ;;  %v2740_v22 = vld [vmem:[%s5305_s1 + $0x3f8] sm:$0xf0]  ;;  %v2431_v23 = vor.u32 %v3320_v8, %v2428_v9  ;;  %v2716_v7 = vld [vmem:[%s5305_s1 + $0x3c8] sm:$0xf0] }
  0x88   :  { %1880 = vmatpush.bf16.msra.mxu0 %v2287_v48  ;;  %v2255_v48 = vor.u32 %v3276_v27, %v2252_v28  ;;  %v3348_v27 = vld [vmem:[%s5305_s1 + $0x264] sm:$0xf]  ;;  %v2540_v28 = vld [vmem:[%s5305_s1 + $0x268] sm:$0xf0] }
  0x89   :  { %1894 = vmatpush.bf16.msra.mxu1 %v2351_v49  ;;  %v2319_v49 = vor.u32 %v3292_v29, %v2316_v33  ;;  %v3364_v29 = vld [vmem:[%s5305_s1 + $0x2e4] sm:$0xf]  ;;  %v2604_v33 = vld [vmem:[%s5305_s1 + $0x2e8] sm:$0xf0] }
  0x8a   :  { %1908 = vmatpush.bf16.msra.mxu2 %v2415_v50  ;;  %v2383_v50 = vor.u32 %v3308_v34, %v2380_v37  ;;  %v3380_v34 = vld [vmem:[%s5305_s1 + $0x364] sm:$0xf]  ;;  %v2668_v37 = vld [vmem:[%s5305_s1 + $0x368] sm:$0xf0] }
  0x8b   :  { %1922 = vmatpush.bf16.msra.mxu3 %v2479_v54  ;;  %v2447_v54 = vor.u32 %v3324_v42, %v2444_v45  ;;  %v3396_v42 = vld [vmem:[%s5305_s1 + $0x3e4] sm:$0xf]  ;;  %v2732_v45 = vld [vmem:[%s5305_s1 + $0x3e8] sm:$0xf0] }
  0x8c   :  { %1881 = vmatpush.bf16.msra.mxu0 %v2279_v61  ;;  %v2247_v61 = vor.u32 %v3274_v51, %v2244_v52  ;;  %v2671_v51 = vor.u32 %v3380_v34, %v2668_v37  ;;  %v2532_v52 = vld [vmem:[%s5305_s1 + $0x258] sm:$0xf0]  ;;  %v2735_v55 = vor.u32 %v3396_v42, %v2732_v45  ;;  %v2572_v37 = vld [vmem:[%s5305_s1 + $0x2a8] sm:$0xf0]  ;;  %v3372_v42 = vld [vmem:[%s5305_s1 + $0x324] sm:$0xf] }
  0x8d   :  { %1895 = vmatpush.bf16.msra.mxu1 %v2343_v62  ;;  %v3272_v62 = vld [vmem:[%s5305_s1 + $0x4] sm:$0xf]  ;;  %v2636_v45 = vld [vmem:[%s5305_s1 + $0x328] sm:$0xf0] }
  0x8e   :  { %1909 = vmatpush.bf16.msra.mxu2 %v2407_v63  ;;  %v2236_v63 = vld [vmem:[%s5305_s1 + $0x8] sm:$0xf0] }
  0x8f   :  { %1923 = vmatpush.bf16.msra.mxu3 %v2471_v4  ;;  %v2300_v4 = vld [vmem:[%s5305_s1 + $0x88] sm:$0xf0]  ;;  %v2239_v14 = vor.u32 %v3272_v62, %v2236_v63 }
  0x90   :  { %1882 = vmatpush.bf16.msra.mxu0 %v2271_v11  ;;  %v3350_v11 = vld [vmem:[%s5305_s1 + $0x274] sm:$0xf]  ;;  %v2303_v19 = vor.u32 %v3288_v3, %v2300_v4  ;;  %v2588_v3 = vld [vmem:[%s5305_s1 + $0x2c8] sm:$0xf0]  ;;  %v3376_v4 = vld [vmem:[%s5305_s1 + $0x344] sm:$0xf] }
  0x91   :  { %1896 = vmatpush.bf16.msra.mxu1 %v2335_v12  ;;  %v2548_v12 = vld [vmem:[%s5305_s1 + $0x278] sm:$0xf0] }
  0x92   :  { %1910 = vmatpush.bf16.msra.mxu2 %v2399_v13  ;;  %v3366_v13 = vld [vmem:[%s5305_s1 + $0x2f4] sm:$0xf] }
  0x93   :  { %1924 = vmatpush.bf16.msra.mxu3 %v2463_v18  ;;  %v2676_v18 = vld [vmem:[%s5305_s1 + $0x378] sm:$0xf0] }
  0x94   :  { %1883 = vmatpush.bf16.msra.mxu0 %v2263_v24  ;;  %v2551_v24 = vor.u32 %v3350_v11, %v2548_v12 }
  0x95   :  { %1897 = vmatpush.bf16.msra.mxu1 %v2327_v25  ;;  %v2615_v25 = vor.u32 %v3366_v13, %v2612_v15  ;;  %v2655_v13 = vor.u32 %v3376_v4, %v2652_v5  ;;  %v2516_v15 = vld [vmem:[%s5305_s1 + $0x238] sm:$0xf0]  ;;  %v3336_v5 = vld [vmem:[%s5305_s1 + $0x204] sm:$0xf] }
  0x96   :  { %1911 = vmatpush.bf16.msra.mxu2 %v2391_v26  ;;  %v2679_v26 = vor.u32 %v3382_v16, %v2676_v18  ;;  %v3358_v16 = vld [vmem:[%s5305_s1 + $0x2b4] sm:$0xf] }
  0x97   :  { %1925 = vmatpush.bf16.msra.mxu3 %v2455_v30  ;;  %v2743_v30 = vor.u32 %v3398_v21, %v2740_v22  ;;  %v2644_v21 = vld [vmem:[%s5305_s1 + $0x338] sm:$0xf0]  ;;  %v3390_v22 = vld [vmem:[%s5305_s1 + $0x3b4] sm:$0xf] }
  0x98   :  { %1884 = vmatpush.bf16.msra.mxu0 %v2255_v48  ;;  %v2543_v48 = vor.u32 %v3348_v27, %v2540_v28 }
  0x99   :  { %1898 = vmatpush.bf16.msra.mxu1 %v2319_v49  ;;  %v3346_v49 = vld [vmem:[%s5305_s1 + $0x254] sm:$0xf] }
  0x9a   :  { %1912 = vmatpush.bf16.msra.mxu2 %v2383_v50  ;;  %v2607_v50 = vor.u32 %v3364_v29, %v2604_v33  ;;  %v2535_v62 = vor.u32 %v3346_v49, %v2532_v52  ;;  %v3340_v29 = vld [vmem:[%s5305_s1 + $0x224] sm:$0xf] }
  0x9b   :  { %1926 = vmatpush.bf16.msra.mxu3 %v2447_v54  ;;  %v4722_v54 = vld [vmem:[%s5307_s2] sm:$0x3]  ;;  %v3356_v33 = vld [vmem:[%s5305_s1 + $0x2a4] sm:$0xf] }
  0x9c   :  { %1885 = vmatpush.bf16.msra.mxu0 %v2247_v61  ;;  %v2724_v61 = vld [vmem:[%s5305_s1 + $0x3d8] sm:$0xf0]  ;;  %v291_v63 = vperm.slane %v4722_v54, 0  ;;  %v3388_v49 = vld [vmem:[%s5305_s1 + $0x3a4] sm:$0xf] }
  0x9d   :  { %1899 = vmatpush.bf16.msra.mxu1 %v2311_v0  ;;  %v2663_v0 = vor.u32 %v3378_v57, %v2660_v59  ;;  %v2639_v57 = vor.u32 %v3372_v42, %v2636_v45  ;;  %v3338_v59 = vld [vmem:[%s5305_s1 + $0x214] sm:$0xf] }
  0x9e   :  { %1913 = vmatpush.bf16.msra.mxu2 %v2375_v2  ;;  %v3344_v2 = vld [vmem:[%s5305_s1 + $0x244] sm:$0xf] }
  0x9f   :  { %1927 = vmatpush.bf16.msra.mxu3 %v2439_v6  ;;  %v3392_v6 = vld [vmem:[%s5305_s1 + $0x3c4] sm:$0xf] }
  0xa0   :  { %1886 = vmatpush.bf16.msra.mxu0 %v2239_v14  ;;  %v1664_v8 = vpop.f32.mrf.mxu0  ;;  %v3342_v14 = vld [vmem:[%s5305_s1 + $0x234] sm:$0xf]  ;;  %v2719_v18 = vor.u32 %v3392_v6, %v2716_v7  ;;  %v2492_v6 = vld [vmem:[%s5305_s1 + $0x208] sm:$0xf0] }
  0xa1   :  { %1900 = vmatpush.bf16.msra.mxu1 %v2303_v19  ;;  %v1665_v11 = vadd.f32 %v1664_v8, %v291_v63  ;;  %v2580_v19 = vld [vmem:[%s5305_s1 + $0x2b8] sm:$0xf0] }
  0xa2   :  { %1914 = vmatpush.bf16.msra.mxu2 %v2367_v20  ;;  %v3374_v20 = vld [vmem:[%s5305_s1 + $0x334] sm:$0xf]  ;;  %v2583_v27 = vor.u32 %v3358_v16, %v2580_v19  ;;  %v3384_v16 = vld [vmem:[%s5305_s1 + $0x384] sm:$0xf] }
  0xa3   :  { %1928 = vmatpush.bf16.msra.mxu3 %v2431_v23  ;;  %1887 = vmatmul.bf16.vlgmr.msra.gmra.mxu0 %v3813_v58  ;;  %v2599_v58 = vor.u32 %v3362_v53, %v2596_v56  ;;  %v2708_v23 = vld [vmem:[%s5305_s1 + $0x3b8] sm:$0xf0]  ;;  %v2647_v28 = vor.u32 %v3374_v20, %v2644_v21  ;;  %v2575_v56 = vor.u32 %v3356_v33, %v2572_v37  ;;  %v3414_v20 = vld [vmem:[%s5305_s1 + $0x474] sm:$0xf] }
  0xa4   :  { %1935 = vmatpush.bf16.msrb.mxu0 %v2551_v24  ;;  %1901 = vmatmul.bf16.vlgmr.msra.gmra.mxu1 %v3849_v10  ;;  %v3360_v10 = vld [vmem:[%s5305_s1 + $0x2c4] sm:$0xf]  ;;  %v1678_v24 = vpop.f32.mrf.mxu1  ;;  %v2711_v34 = vor.u32 %v3390_v22, %v2708_v23  ;;  %v2804_v21 = vld [vmem:[%s5305_s1 + $0x478] sm:$0xf0]  ;;  %v3430_v22 = vld [vmem:[%s5305_s1 + $0x4f4] sm:$0xf] }
  0xa5   :  { %1949 = vmatpush.bf16.msrb.mxu1 %v2615_v25  ;;  %1915 = vmatmul.bf16.vlgmr.msra.gmra.mxu2 %v3827_v1  ;;  %v2524_v1 = vld [vmem:[%s5305_s1 + $0x248] sm:$0xf0]  ;;  %v2591_v12 = vor.u32 %v3360_v10, %v2588_v3  ;;  %v2519_v25 = vor.u32 %v3342_v14, %v2516_v15  ;;  %v2692_v10 = vld [vmem:[%s5305_s1 + $0x398] sm:$0xf0]  ;;  %v2807_v37 = vor.u32 %v3414_v20, %v2804_v21 }
  0xa6   :  { %1963 = vmatpush.bf16.msrb.mxu2 %v2679_v26  ;;  %1929 = vmatmul.bf16.vlgmr.msra.gmra.mxu3 %v3863_v17  ;;  %v2727_v17 = vor.u32 %v3394_v60, %v2724_v61  ;;  %v2527_v9 = vor.u32 %v3344_v2, %v2524_v1  ;;  %v1679_v26 = vadd.f32 %v1678_v24, %v1665_v11  ;;  %v2500_v60 = vld [vmem:[%s5305_s1 + $0x218] sm:$0xf0]  ;;  %v3354_v61 = vld [vmem:[%s5305_s1 + $0x294] sm:$0xf]  ;;  %v3352_v11 = vld [vmem:[%s5305_s1 + $0x284] sm:$0xf] }
  0xa7   :  { %1977 = vmatpush.bf16.msrb.mxu3 %v2743_v30  ;;  %v2508_v30 = vld [vmem:[%s5305_s1 + $0x228] sm:$0xf0]  ;;  %v3386_v1 = vld [vmem:[%s5305_s1 + $0x394] sm:$0xf]  ;;  %v2503_v4 = vor.u32 %v3338_v59, %v2500_v60  ;;  %v2495_v24 = vor.u32 %v3336_v5, %v2492_v6  ;;  %v2996_v33 = vld [vmem:[%s5305_s1 + $0x5f8] sm:$0xf0] }
  0xa8   :  { %1936 = vmatpush.bf16.msrb.mxu0 %v2543_v48  ;;  %v1692_v48 = vpop.f32.mrf.mxu2  ;;  %v1666_v52 = vpop.f32.mrf.mxu0  ;;  %v2511_v53 = vor.u32 %v3340_v29, %v2508_v30  ;;  %v2695_v14 = vor.u32 %v3386_v1, %v2692_v10  ;;  %v2620_v15 = vld [vmem:[%s5305_s1 + $0x308] sm:$0xf0]  ;;  %v3462_v30 = vld [vmem:[%s5305_s1 + $0x5f4] sm:$0xf]  ;;  %v3460_v59 = vld [vmem:[%s5305_s1 + $0x5e4] sm:$0xf] }
  0xa9   :  { %1950 = vmatpush.bf16.msrb.mxu1 %v2607_v50  ;;  %v2700_v50 = vld [vmem:[%s5305_s1 + $0x3a8] sm:$0xf0]  ;;  %v1706_v2 = vpop.f32.mrf.mxu3  ;;  %v2852_v10 = vld [vmem:[%s5305_s1 + $0x4d8] sm:$0xf0] }
  0xaa   :  { %1964 = vmatpush.bf16.msrb.mxu2 %v2671_v51  ;;  %v1693_v51 = vadd.f32 %v1692_v48, %v1679_v26  ;;  %v3446_v26 = vld [vmem:[%s5305_s1 + $0x574] sm:$0xf]  ;;  %v2988_v60 = vld [vmem:[%s5305_s1 + $0x5e8] sm:$0xf0]  ;;  %v2980_v5 = vld [vmem:[%s5305_s1 + $0x5d8] sm:$0xf0] }
  0xab   :  { %1978 = vmatpush.bf16.msrb.mxu3 %v2735_v55  ;;  %v1667_v55 = vadd.f32 %v1666_v52, %v291_v63  ;;  %v2564_v63 = vld [vmem:[%s5305_s1 + $0x298] sm:$0xf0]  ;;  %v2991_v1 = vor.u32 %v3460_v59, %v2988_v60 }
  0xac   :  { %1937 = vmatpush.bf16.msrb.mxu0 %v2535_v62  ;;  %v2703_v62 = vor.u32 %v3388_v49, %v2700_v50  ;;  %v1680_v3 = vpop.f32.mrf.mxu1  ;;  %v2567_v8 = vor.u32 %v3354_v61, %v2564_v63  ;;  %v3412_v49 = vld [vmem:[%s5305_s1 + $0x464] sm:$0xf]  ;;  %v2796_v50 = vld [vmem:[%s5305_s1 + $0x468] sm:$0xf0] }
  0xad   :  { %1951 = vmatpush.bf16.msrb.mxu1 %v2599_v58  ;;  %v3370_v58 = vld [vmem:[%s5305_s1 + $0x314] sm:$0xf]  ;;  %v1681_v7 = vadd.f32 %v1680_v3, %v1667_v55  ;;  %v2860_v55 = vld [vmem:[%s5305_s1 + $0x4e8] sm:$0xf0]  ;;  %v2799_v61 = vor.u32 %v3412_v49, %v2796_v50  ;;  %v3420_v49 = vld [vmem:[%s5305_s1 + $0x4a4] sm:$0xf] }
  0xae   :  { %1965 = vmatpush.bf16.msrb.mxu2 %v2663_v0  ;;  %v2628_v0 = vld [vmem:[%s5305_s1 + $0x318] sm:$0xf0]  ;;  %v3442_v3 = vld [vmem:[%s5305_s1 + $0x554] sm:$0xf] }
  0xaf   :  { %1979 = vmatpush.bf16.msrb.mxu3 %v2727_v17  ;;  %v4840_v17 = vadd.f32 %v1706_v2, %v1693_v51  ;;  %v3428_v51 = vld [vmem:[%s5305_s1 + $0x4e4] sm:$0xf]  ;;  %v3426_v2 = vld [vmem:[%s5305_s1 + $0x4d4] sm:$0xf] }
  0xb0   :  { %1938 = vmatpush.bf16.msrb.mxu0 %v2527_v9  ;;  %v2631_v9 = vor.u32 %v3370_v58, %v2628_v0  ;;  %v1694_v19 = vpop.f32.mrf.mxu2  ;;  %v3410_v58 = vld [vmem:[%s5305_s1 + $0x454] sm:$0xf]  ;;  %v2788_v0 = vld [vmem:[%s5305_s1 + $0x458] sm:$0xf0] }
  0xb1   :  { %1952 = vmatpush.bf16.msrb.mxu1 %v2591_v12  ;;  %v2556_v12 = vld [vmem:[%s5305_s1 + $0x288] sm:$0xf0]  ;;  %v1695_v23 = vadd.f32 %v1694_v19, %v1681_v7  ;;  %v1708_v42 = vpop.f32.mrf.mxu3  ;;  %v2791_v6 = vor.u32 %v3410_v58, %v2788_v0  ;;  %v2855_v7 = vor.u32 %v3426_v2, %v2852_v10 }
  0xb2   :  { %1966 = vmatpush.bf16.msrb.mxu2 %v2655_v13  ;;  %v3368_v13 = vld [vmem:[%s5305_s1 + $0x304] sm:$0xf] }
  0xb3   :  { %1980 = vmatpush.bf16.msrb.mxu3 %v2719_v18  ;;  %v2684_v18 = vld [vmem:[%s5305_s1 + $0x388] sm:$0xf0]  ;;  %v2623_v29 = vor.u32 %v3368_v13, %v2620_v15  ;;  %v4899_v52 = vadd.f32 %v1708_v42, %v1695_v23  ;;  %v3456_v15 = vld [vmem:[%s5305_s1 + $0x5c4] sm:$0xf]  ;;  %v3406_v23 = vld [vmem:[%s5305_s1 + $0x434] sm:$0xf] }
  0xb4   :  { %1939 = vmatpush.bf16.msrb.mxu0 %v2519_v25  ;;  %v2868_v25 = vld [vmem:[%s5305_s1 + $0x4f8] sm:$0xf0]  ;;  %v2908_v13 = vld [vmem:[%s5305_s1 + $0x548] sm:$0xf0] }
  0xb5   :  { %1953 = vmatpush.bf16.msrb.mxu1 %v2583_v27  ;;  %v2932_v27 = vld [vmem:[%s5305_s1 + $0x578] sm:$0xf0]  ;;  %v2871_v45 = vor.u32 %v3430_v22, %v2868_v25  ;;  %v3422_v25 = vld [vmem:[%s5305_s1 + $0x4b4] sm:$0xf] }
  0xb6   :  { %1967 = vmatpush.bf16.msrb.mxu2 %v2647_v28  ;;  %v2559_v28 = vor.u32 %v3352_v11, %v2556_v12  ;;  %v2935_v48 = vor.u32 %v3446_v26, %v2932_v27  ;;  %v2844_v11 = vld [vmem:[%s5305_s1 + $0x4c8] sm:$0xf0]  ;;  %v3440_v12 = vld [vmem:[%s5305_s1 + $0x544] sm:$0xf]  ;;  %v2836_v27 = vld [vmem:[%s5305_s1 + $0x4b8] sm:$0xf0] }
  0xb7   :  { %1981 = vmatpush.bf16.msrb.mxu3 %v2711_v34  ;;  %v2687_v34 = vor.u32 %v3384_v16, %v2684_v18  ;;  %v2972_v16 = vld [vmem:[%s5305_s1 + $0x5c8] sm:$0xf0]  ;;  %v2911_v22 = vor.u32 %v3440_v12, %v2908_v13 }
  0xb8   :  { %1940 = vmatpush.bf16.msrb.mxu0 %v2511_v53  ;;  %v2999_v53 = vor.u32 %v3462_v30, %v2996_v33  ;;  %v3454_v30 = vld [vmem:[%s5305_s1 + $0x5b4] sm:$0xf]  ;;  %v2964_v33 = vld [vmem:[%s5305_s1 + $0x5b8] sm:$0xf0] }
  0xb9   :  { %1954 = vmatpush.bf16.msrb.mxu1 %v2575_v56  ;;  %v3444_v56 = vld [vmem:[%s5305_s1 + $0x564] sm:$0xf]  ;;  %v2967_v50 = vor.u32 %v3454_v30, %v2964_v33  ;;  %v3188_v30 = vld [vmem:[%s5305_s1 + $0x778] sm:$0xf0] }
  0xba   :  { %1968 = vmatpush.bf16.msrb.mxu2 %v2639_v57  ;;  %v2924_v57 = vld [vmem:[%s5305_s1 + $0x568] sm:$0xf0] }
  0xbb   :  { %1982 = vmatpush.bf16.msrb.mxu3 %v2703_v62  ;;  %v2863_v62 = vor.u32 %v3428_v51, %v2860_v55  ;;  %v2927_v63 = vor.u32 %v3444_v56, %v2924_v57  ;;  %v3436_v55 = vld [vmem:[%s5305_s1 + $0x524] sm:$0xf]  ;;  %v2892_v56 = vld [vmem:[%s5305_s1 + $0x528] sm:$0xf0] }
  0xbc   :  { %1941 = vmatpush.bf16.msrb.mxu0 %v2503_v4  ;;  %v2916_v4 = vld [vmem:[%s5305_s1 + $0x558] sm:$0xf0]  ;;  %v2895_v10 = vor.u32 %v3436_v55, %v2892_v56  ;;  %v3052_v55 = vld [vmem:[%s5305_s1 + $0x668] sm:$0xf0]  ;;  %v3492_v56 = vld [vmem:[%s5305_s1 + $0x6e4] sm:$0xf] }
  0xbd   :  { %1955 = vmatpush.bf16.msrb.mxu1 %v2567_v8  ;;  %v2919_v8 = vor.u32 %v3442_v3, %v2916_v4  ;;  %v3402_v3 = vld [vmem:[%s5305_s1 + $0x414] sm:$0xf]  ;;  %v2756_v4 = vld [vmem:[%s5305_s1 + $0x418] sm:$0xf0] }
  0xbe   :  { %1969 = vmatpush.bf16.msrb.mxu2 %v2631_v9  ;;  %v3424_v9 = vld [vmem:[%s5305_s1 + $0x4c4] sm:$0xf] }
  0xbf   :  { %1983 = vmatpush.bf16.msrb.mxu3 %v2695_v14  ;;  %v2847_v21 = vor.u32 %v3424_v9, %v2844_v11  ;;  %v2759_v9 = vor.u32 %v3402_v3, %v2756_v4  ;;  %v2748_v11 = vld [vmem:[%s5305_s1 + $0x408] sm:$0xf0]  ;;  %v3044_v3 = vld [vmem:[%s5305_s1 + $0x658] sm:$0xf0]  ;;  %v3490_v4 = vld [vmem:[%s5305_s1 + $0x6d4] sm:$0xf] }
  0xc0   :  { %1942 = vmatpush.bf16.msrb.mxu0 %v2495_v24  ;;  %v1720_v14 = vpop.f32.mrf.mxu0  ;;  %v2772_v24 = vld [vmem:[%s5305_s1 + $0x438] sm:$0xf0] }
  0xc1   :  { %1956 = vmatpush.bf16.msrb.mxu1 %v2559_v28  ;;  %v1721_v18 = vadd.f32 %v1720_v14, %v4840_v17  ;;  %v1734_v20 = vpop.f32.mrf.mxu1  ;;  %v2975_v17 = vor.u32 %v3456_v15, %v2972_v16  ;;  %v3438_v28 = vld [vmem:[%s5305_s1 + $0x534] sm:$0xf]  ;;  %v3416_v14 = vld [vmem:[%s5305_s1 + $0x484] sm:$0xf]  ;;  %v2812_v15 = vld [vmem:[%s5305_s1 + $0x488] sm:$0xf0] }
  0xc2   :  { %1970 = vmatpush.bf16.msrb.mxu2 %v2623_v29  ;;  %v2900_v29 = vld [vmem:[%s5305_s1 + $0x538] sm:$0xf0]  ;;  %v3432_v16 = vld [vmem:[%s5305_s1 + $0x504] sm:$0xf] }
  0xc3   :  { %1984 = vmatpush.bf16.msrb.mxu3 %v2687_v34  ;;  %1943 = vmatmul.bf16.vlgmr.msrb.gmra.mxu0 %v4035_v39  ;;  %v3458_v39 = vld [vmem:[%s5305_s1 + $0x5d4] sm:$0xf]  ;;  %v1735_v26 = vadd.f32 %v1734_v20, %v1721_v18  ;;  %v2775_v34 = vor.u32 %v3406_v23, %v2772_v24  ;;  %v2903_v42 = vor.u32 %v3438_v28, %v2900_v29  ;;  %v2876_v20 = vld [vmem:[%s5305_s1 + $0x508] sm:$0xf0]  ;;  %v3124_v28 = vld [vmem:[%s5305_s1 + $0x6f8] sm:$0xf0] }
  0xc4   :  { %1991 = vmatpush.bf16.msra.mxu0 %v2807_v37  ;;  %1957 = vmatmul.bf16.vlgmr.msrb.gmra.mxu1 %v4048_v44  ;;  %v2780_v44 = vld [vmem:[%s5305_s1 + $0x448] sm:$0xf0]  ;;  %v2839_v37 = vor.u32 %v3422_v25, %v2836_v27  ;;  %v3478_v25 = vld [vmem:[%s5305_s1 + $0x674] sm:$0xf] }
  0xc5   :  { %2005 = vmatpush.bf16.msra.mxu1 %v2871_v45  ;;  %1971 = vmatmul.bf16.vlgmr.msrb.gmra.mxu2 %v4046_v43  ;;  %v3408_v43 = vld [vmem:[%s5305_s1 + $0x444] sm:$0xf]  ;;  %v3510_v29 = vld [vmem:[%s5305_s1 + $0x774] sm:$0xf] }
  0xc6   :  { %2019 = vmatpush.bf16.msra.mxu2 %v2935_v48  ;;  %1985 = vmatmul.bf16.vlgmr.msrb.gmra.mxu3 %v4056_v47  ;;  %v2983_v47 = vor.u32 %v3458_v39, %v2980_v5  ;;  %v2783_v19 = vor.u32 %v3408_v43, %v2780_v44  ;;  %v3404_v45 = vld [vmem:[%s5305_s1 + $0x424] sm:$0xf]  ;;  %v2764_v48 = vld [vmem:[%s5305_s1 + $0x428] sm:$0xf0]  ;;  %v3450_v43 = vld [vmem:[%s5305_s1 + $0x594] sm:$0xf] }
  0xc7   :  { %2033 = vmatpush.bf16.msra.mxu3 %v2999_v53  ;;  %v2828_v53 = vld [vmem:[%s5305_s1 + $0x4a8] sm:$0xf0]  ;;  %v2767_v58 = vor.u32 %v3404_v45, %v2764_v48  ;;  %v2948_v44 = vld [vmem:[%s5305_s1 + $0x598] sm:$0xf0] }
  0xc8   :  { %1992 = vmatpush.bf16.msra.mxu0 %v2799_v61  ;;  %v1748_v51 = vpop.f32.mrf.mxu2  ;;  %v1722_v59 = vpop.f32.mrf.mxu0  ;;  %v3452_v61 = vld [vmem:[%s5305_s1 + $0x5a4] sm:$0xf]  ;;  %v2951_v18 = vor.u32 %v3450_v43, %v2948_v44  ;;  %v3252_v45 = vld [vmem:[%s5305_s1 + $0x7f8] sm:$0xf0] }
  0xc9   :  { %2006 = vmatpush.bf16.msra.mxu1 %v2863_v62  ;;  %v1749_v57 = vadd.f32 %v1748_v51, %v1735_v26  ;;  %v1762_v60 = vpop.f32.mrf.mxu3  ;;  %v2956_v62 = vld [vmem:[%s5305_s1 + $0x5a8] sm:$0xf0]  ;;  %v1736_v0 = vpop.f32.mrf.mxu1  ;;  %v3494_v26 = vld [vmem:[%s5305_s1 + $0x6f4] sm:$0xf]  ;;  %v3191_v51 = vor.u32 %v3510_v29, %v3188_v30  ;;  %v3220_v29 = vld [vmem:[%s5305_s1 + $0x7b8] sm:$0xf0] }
  0xca   :  { %2020 = vmatpush.bf16.msra.mxu2 %v2927_v63  ;;  %v1723_v63 = vadd.f32 %v1722_v59, %v4899_v52  ;;  %v3418_v52 = vld [vmem:[%s5305_s1 + $0x494] sm:$0xf]  ;;  %v2959_v39 = vor.u32 %v3452_v61, %v2956_v62  ;;  %v3116_v59 = vld [vmem:[%s5305_s1 + $0x6e8] sm:$0xf0]  ;;  %v3524_v62 = vld [vmem:[%s5305_s1 + $0x7e4] sm:$0xf] }
  0xcb   :  { %2034 = vmatpush.bf16.msra.mxu3 %v2991_v1  ;;  %v5018_v2 = vadd.f32 %v1762_v60, %v1749_v57  ;;  %v2831_v1 = vor.u32 %v3420_v49, %v2828_v53  ;;  %v3476_v53 = vld [vmem:[%s5305_s1 + $0x664] sm:$0xf]  ;;  %v3180_v61 = vld [vmem:[%s5305_s1 + $0x768] sm:$0xf0] }
  0xcc   :  { %1993 = vmatpush.bf16.msra.mxu0 %v2791_v6  ;;  %v1737_v5 = vadd.f32 %v1736_v0, %v1723_v63  ;;  %v2820_v6 = vld [vmem:[%s5305_s1 + $0x498] sm:$0xf0]  ;;  %v3508_v60 = vld [vmem:[%s5305_s1 + $0x764] sm:$0xf]  ;;  %v3244_v63 = vld [vmem:[%s5305_s1 + $0x7e8] sm:$0xf0]  ;;  %v3119_v0 = vor.u32 %v3492_v56, %v3116_v59 }
  0xcd   :  { %2007 = vmatpush.bf16.msra.mxu1 %v2855_v7  ;;  %v3434_v7 = vld [vmem:[%s5305_s1 + $0x514] sm:$0xf]  ;;  %v2823_v12 = vor.u32 %v3418_v52, %v2820_v6  ;;  %v3247_v52 = vor.u32 %v3524_v62, %v3244_v63  ;;  %v3172_v6 = vld [vmem:[%s5305_s1 + $0x758] sm:$0xf0] }
  0xce   :  { %2021 = vmatpush.bf16.msra.mxu2 %v2919_v8  ;;  %v2884_v8 = vld [vmem:[%s5305_s1 + $0x518] sm:$0xf0] }
  0xcf   :  { %2035 = vmatpush.bf16.msra.mxu3 %v2983_v47  ;;  %v3400_v47 = vld [vmem:[%s5305_s1 + $0x404] sm:$0xf]  ;;  %v2887_v13 = vor.u32 %v3434_v7, %v2884_v8  ;;  %v3236_v7 = vld [vmem:[%s5305_s1 + $0x7d8] sm:$0xf0] }
  0xd0   :  { %1994 = vmatpush.bf16.msra.mxu0 %v2783_v19  ;;  %v1750_v19 = vpop.f32.mrf.mxu2  ;;  %v2751_v27 = vor.u32 %v3400_v47, %v2748_v11  ;;  %v3100_v47 = vld [vmem:[%s5305_s1 + $0x6c8] sm:$0xf0]  ;;  %v3504_v11 = vld [vmem:[%s5305_s1 + $0x744] sm:$0xf] }
  0xd1   :  { %2008 = vmatpush.bf16.msra.mxu1 %v2847_v21  ;;  %v3448_v21 = vld [vmem:[%s5305_s1 + $0x584] sm:$0xf]  ;;  %v1751_v23 = vadd.f32 %v1750_v19, %v1737_v5  ;;  %v1764_v24 = vpop.f32.mrf.mxu3  ;;  %v3506_v5 = vld [vmem:[%s5305_s1 + $0x754] sm:$0xf] }
  0xd2   :  { %2022 = vmatpush.bf16.msra.mxu2 %v2911_v22  ;;  %v2940_v22 = vld [vmem:[%s5305_s1 + $0x588] sm:$0xf0]  ;;  %v3175_v44 = vor.u32 %v3506_v5, %v3172_v6  ;;  %v3076_v5 = vld [vmem:[%s5305_s1 + $0x698] sm:$0xf0]  ;;  %v3498_v6 = vld [vmem:[%s5305_s1 + $0x714] sm:$0xf] }
  0xd3   :  { %2036 = vmatpush.bf16.msra.mxu3 %v2975_v17  ;;  %v3060_v17 = vld [vmem:[%s5305_s1 + $0x678] sm:$0xf0]  ;;  %v5086_v33 = vadd.f32 %v1764_v24, %v1751_v23  ;;  %v2943_v48 = vor.u32 %v3448_v21, %v2940_v22  ;;  %v3470_v22 = vld [vmem:[%s5305_s1 + $0x634] sm:$0xf] }
  0xd4   :  { %1995 = vmatpush.bf16.msra.mxu0 %v2775_v34  ;;  %v2815_v34 = vor.u32 %v3416_v14, %v2812_v15  ;;  %v3063_v49 = vor.u32 %v3478_v25, %v3060_v17  ;;  %v3520_v14 = vld [vmem:[%s5305_s1 + $0x7c4] sm:$0xf]  ;;  %v3228_v15 = vld [vmem:[%s5305_s1 + $0x7c8] sm:$0xf0]  ;;  %v3028_v23 = vld [vmem:[%s5305_s1 + $0x638] sm:$0xf0] }
  0xd5   :  { %2009 = vmatpush.bf16.msra.mxu1 %v2839_v37  ;;  %v2879_v37 = vor.u32 %v3432_v16, %v2876_v20  ;;  %v3486_v24 = vld [vmem:[%s5305_s1 + $0x6b4] sm:$0xf]  ;;  %v3092_v17 = vld [vmem:[%s5305_s1 + $0x6b8] sm:$0xf0]  ;;  %v3031_v30 = vor.u32 %v3470_v22, %v3028_v23 }
  0xd6   :  { %2023 = vmatpush.bf16.msra.mxu2 %v2903_v42  ;;  %v3526_v42 = vld [vmem:[%s5305_s1 + $0x7f4] sm:$0xf] }
  0xd7   :  { %2037 = vmatpush.bf16.msra.mxu3 %v2967_v50  ;;  %v3127_v50 = vor.u32 %v3494_v26, %v3124_v28  ;;  %v3255_v57 = vor.u32 %v3526_v42, %v3252_v45  ;;  %v3502_v26 = vld [vmem:[%s5305_s1 + $0x734] sm:$0xf]  ;;  %v3468_v42 = vld [vmem:[%s5305_s1 + $0x624] sm:$0xf]  ;;  %v3020_v45 = vld [vmem:[%s5305_s1 + $0x628] sm:$0xf0] }
  0xd8   :  { %1996 = vmatpush.bf16.msra.mxu0 %v2767_v58  ;;  %v3055_v58 = vor.u32 %v3476_v53, %v3052_v55  ;;  %v3518_v28 = vld [vmem:[%s5305_s1 + $0x7b4] sm:$0xf]  ;;  %v3500_v53 = vld [vmem:[%s5305_s1 + $0x724] sm:$0xf]  ;;  %v3148_v55 = vld [vmem:[%s5305_s1 + $0x728] sm:$0xf0]  ;;  %v3023_v63 = vor.u32 %v3468_v42, %v3020_v45 }
  0xd9   :  { %2010 = vmatpush.bf16.msra.mxu1 %v2831_v1  ;;  %v3183_v1 = vor.u32 %v3508_v60, %v3180_v61  ;;  %v3516_v60 = vld [vmem:[%s5305_s1 + $0x7a4] sm:$0xf]  ;;  %v3212_v61 = vld [vmem:[%s5305_s1 + $0x7a8] sm:$0xf0] }
  0xda   :  { %2024 = vmatpush.bf16.msra.mxu2 %v2895_v10  ;;  %v3474_v10 = vld [vmem:[%s5305_s1 + $0x654] sm:$0xf] }
  0xdb   :  { %2038 = vmatpush.bf16.msra.mxu3 %v2959_v39  ;;  %v3108_v39 = vld [vmem:[%s5305_s1 + $0x6d8] sm:$0xf0]  ;;  %v3047_v8 = vor.u32 %v3474_v10, %v3044_v3  ;;  %v3151_v10 = vor.u32 %v3500_v53, %v3148_v55  ;;  %v3466_v3 = vld [vmem:[%s5305_s1 + $0x614] sm:$0xf] }
  0xdc   :  { %1997 = vmatpush.bf16.msra.mxu0 %v2759_v9  ;;  %v3111_v43 = vor.u32 %v3490_v4, %v3108_v39  ;;  %v3488_v9 = vld [vmem:[%s5305_s1 + $0x6c4] sm:$0xf]  ;;  %v3012_v4 = vld [vmem:[%s5305_s1 + $0x618] sm:$0xf0] }
  0xdd   :  { %2011 = vmatpush.bf16.msra.mxu1 %v2823_v12  ;;  %v3164_v12 = vld [vmem:[%s5305_s1 + $0x748] sm:$0xf0]  ;;  %v3103_v20 = vor.u32 %v3488_v9, %v3100_v47 }
  0xde   :  { %2025 = vmatpush.bf16.msra.mxu2 %v2887_v13  ;;  %v3167_v21 = vor.u32 %v3504_v11, %v3164_v12  ;;  %v3004_v9 = vld [vmem:[%s5305_s1 + $0x608] sm:$0xf0] }
  0xdf   :  { %2039 = vmatpush.bf16.msra.mxu3 %v2951_v18  ;;  %v3068_v12 = vld [vmem:[%s5305_s1 + $0x688] sm:$0xf0] }
  0xe0   :  { %1998 = vmatpush.bf16.msra.mxu0 %v2751_v27  ;;  %v1776_v13 = vpop.f32.mrf.mxu0  ;;  %v3156_v27 = vld [vmem:[%s5305_s1 + $0x738] sm:$0xf0] }
  0xe1   :  { %2012 = vmatpush.bf16.msra.mxu1 %v2815_v34  ;;  %v1777_v16 = vadd.f32 %v1776_v13, %v5018_v2  ;;  %v1790_v19 = vpop.f32.mrf.mxu1  ;;  %v3231_v2 = vor.u32 %v3520_v14, %v3228_v15  ;;  %v3095_v34 = vor.u32 %v3486_v24, %v3092_v17  ;;  %v3496_v13 = vld [vmem:[%s5305_s1 + $0x704] sm:$0xf]  ;;  %v3132_v14 = vld [vmem:[%s5305_s1 + $0x708] sm:$0xf0] }
  0xe2   :  { %2026 = vmatpush.bf16.msra.mxu2 %v2879_v37  ;;  %v3159_v37 = vor.u32 %v3502_v26, %v3156_v27  ;;  %v3135_v23 = vor.u32 %v3496_v13, %v3132_v14 }
  0xe3   :  { %2040 = vmatpush.bf16.msra.mxu3 %v2943_v48  ;;  %1999 = vmatmul.bf16.vlgmr.msra.gmra.mxu0 %v4263_v31  ;;  %v3522_v31 = vld [vmem:[%s5305_s1 + $0x7d4] sm:$0xf]  ;;  %v1791_v25 = vadd.f32 %v1790_v19, %v1777_v16  ;;  %v3484_v48 = vld [vmem:[%s5305_s1 + $0x6a4] sm:$0xf]  ;;  %v3196_v19 = vld [vmem:[%s5305_s1 + $0x788] sm:$0xf0] }
  0xe4   :  { %2047 = vmatpush.bf16.msrb.mxu0 %v3063_v49  ;;  %2013 = vmatmul.bf16.vlgmr.msra.gmra.mxu1 %v4276_v36  ;;  %v3036_v36 = vld [vmem:[%s5305_s1 + $0x648] sm:$0xf0]  ;;  %v3223_v49 = vor.u32 %v3518_v28, %v3220_v29 }
  0xe5   :  { %2061 = vmatpush.bf16.msrb.mxu1 %v3127_v50  ;;  %2027 = vmatmul.bf16.vlgmr.msra.gmra.mxu2 %v4274_v35  ;;  %v3472_v35 = vld [vmem:[%s5305_s1 + $0x644] sm:$0xf] }
  0xe6   :  { %2075 = vmatpush.bf16.msrb.mxu2 %v3191_v51  ;;  %2041 = vmatmul.bf16.vlgmr.msra.gmra.mxu3 %v4284_v40  ;;  %v3239_v40 = vor.u32 %v3522_v31, %v3236_v7  ;;  %v3039_v18 = vor.u32 %v3472_v35, %v3036_v36  ;;  %v3084_v51 = vld [vmem:[%s5305_s1 + $0x6a8] sm:$0xf0]  ;;  %v3140_v31 = vld [vmem:[%s5305_s1 + $0x718] sm:$0xf0]  ;;  %v3514_v7 = vld [vmem:[%s5305_s1 + $0x794] sm:$0xf] }
  0xe7   :  { %2089 = vmatpush.bf16.msrb.mxu3 %v3255_v57  ;;  %v3143_v35 = vor.u32 %v3498_v6, %v3140_v31  ;;  %v3464_v36 = vld [vmem:[%s5305_s1 + $0x604] sm:$0xf] }
  0xe8   :  { %2048 = vmatpush.bf16.msrb.mxu0 %v3055_v58  ;;  %v1804_v50 = vpop.f32.mrf.mxu2  ;;  %v1778_v57 = vpop.f32.mrf.mxu0 }
  0xe9   :  { %2062 = vmatpush.bf16.msrb.mxu1 %v3119_v0  ;;  %v1805_v56 = vadd.f32 %v1804_v50, %v1791_v25  ;;  %v1818_v59 = vpop.f32.mrf.mxu3  ;;  %v1779_v62 = vadd.f32 %v1778_v57, %v5086_v33  ;;  %v1792_v58 = vpop.f32.mrf.mxu1  ;;  %v3215_v33 = vor.u32 %v3516_v60, %v3212_v61  ;;  %v292_v60 = vperm.slane %v4722_v54, 1 }
  0xea   :  { %2076 = vmatpush.bf16.msrb.mxu2 %v3183_v1  ;;  %v3087_v1 = vor.u32 %v3484_v48, %v3084_v51 }
  0xeb   :  { %2090 = vmatpush.bf16.msrb.mxu3 %v3247_v52  ;;  %v1819_v0 = vadd.f32 %v1818_v59, %v1805_v56  ;;  %v3482_v52 = vld [vmem:[%s5305_s1 + $0x694] sm:$0xf]  ;;  %v1793_v39 = vadd.f32 %v1792_v58, %v1779_v62 }
  0xec   :  { %2049 = vmatpush.bf16.msrb.mxu0 %v3047_v8  ;;  %v3204_v8 = vld [vmem:[%s5305_s1 + $0x798] sm:$0xf0] }
  0xed   :  { %2063 = vmatpush.bf16.msrb.mxu1 %v3111_v43  ;;  %v3015_v43 = vor.u32 %v3466_v3, %v3012_v4  ;;  %v3207_v47 = vor.u32 %v3514_v7, %v3204_v8 }
  0xee   :  { %2077 = vmatpush.bf16.msrb.mxu2 %v3175_v44  ;;  %v3079_v44 = vor.u32 %v3482_v52, %v3076_v5 }
  0xef   :  { %2091 = vmatpush.bf16.msrb.mxu3 %v3239_v40  ;;  %v3480_v40 = vld [vmem:[%s5305_s1 + $0x684] sm:$0xf] }
  0xf0   :  { %2050 = vmatpush.bf16.msrb.mxu0 %v3039_v18  ;;  %v1806_v11 = vpop.f32.mrf.mxu2  ;;  %v3512_v18 = vld [vmem:[%s5305_s1 + $0x784] sm:$0xf]  ;;  %v3071_v22 = vor.u32 %v3480_v40, %v3068_v12 }
  0xf1   :  { %2064 = vmatpush.bf16.msrb.mxu1 %v3103_v20  ;;  %v1807_v15 = vadd.f32 %v1806_v11, %v1793_v39  ;;  %v1820_v16 = vpop.f32.mrf.mxu3  ;;  %v3007_v20 = vor.u32 %v3464_v36, %v3004_v9  ;;  %v3199_v24 = vor.u32 %v3512_v18, %v3196_v19 }
  0xf2   :  { %2078 = vmatpush.bf16.msrb.mxu2 %v3167_v21 }
  0xf3   :  { %2092 = vmatpush.bf16.msrb.mxu3 %v3231_v2  ;;  %v1821_v21 = vadd.f32 %v1820_v16, %v1807_v15 }
  0xf4   :  { %2051 = vmatpush.bf16.msrb.mxu0 %v3031_v30 }
  0xf5   :  { %2065 = vmatpush.bf16.msrb.mxu1 %v3095_v34 }
  0xf6   :  { %2079 = vmatpush.bf16.msrb.mxu2 %v3159_v37 }
  0xf7   :  { %2093 = vmatpush.bf16.msrb.mxu3 %v3223_v49 }
  0xf8   :  { %2052 = vmatpush.bf16.msrb.mxu0 %v3023_v63 }
  0xf9   :  { %2066 = vmatpush.bf16.msrb.mxu1 %v3087_v1 }
  0xfa   :  { %2080 = vmatpush.bf16.msrb.mxu2 %v3151_v10 }
  0xfb   :  { %2094 = vmatpush.bf16.msrb.mxu3 %v3215_v33 }
  0xfc   :  { %2053 = vmatpush.bf16.msrb.mxu0 %v3015_v43 }
  0xfd   :  { %2067 = vmatpush.bf16.msrb.mxu1 %v3079_v44 }
  0xfe   :  { %2081 = vmatpush.bf16.msrb.mxu2 %v3143_v35 }
  0xff   :  { %2095 = vmatpush.bf16.msrb.mxu3 %v3207_v47 }
 0x100   :  { %2054 = vmatpush.bf16.msrb.mxu0 %v3007_v20  ;;  %v1832_v2 = vpop.f32.mrf.mxu0 }
 0x101   :  { %2068 = vmatpush.bf16.msrb.mxu1 %v3071_v22  ;;  %v1833_v25 = vadd.f32 %v1832_v2, %v1819_v0  ;;  %v1846_v17 = vpop.f32.mrf.mxu1 }
 0x102   :  { %2082 = vmatpush.bf16.msrb.mxu2 %v3135_v23 }
 0x103   :  { %2096 = vmatpush.bf16.msrb.mxu3 %v3199_v24  ;;  %2055 = vmatmul.bf16.vlgmr.msrb.gmra.mxu0 %v4491_v32  ;;  %v1847_v26 = vadd.f32 %v1846_v17, %v1833_v25 }
 0x104   :  { %2069 = vmatmul.bf16.vlgmr.msrb.gmra.mxu1 %v4504_v41 }
 0x105   :  { %2083 = vmatmul.bf16.vlgmr.msrb.gmra.mxu2 %v4502_v38 }
 0x106   :  { %2097 = vmatmul.bf16.vlgmr.msrb.gmra.mxu3 %v4512_v46 }
 0x108   :  { %v1860_v27 = vpop.f32.mrf.mxu2  ;;  %v1834_v29 = vpop.f32.mrf.mxu0 }
 0x109   :  { %v1861_v28 = vadd.f32 %v1860_v27, %v1847_v26  ;;  %v1874_v30 = vpop.f32.mrf.mxu3  ;;  %v1835_v34 = vadd.f32 %v1834_v29, %v1821_v21  ;;  %v1848_v37 = vpop.f32.mrf.mxu1 }
 0x10b   :  { %v5272_v42 = vadd.f32 %v1874_v30, %v1861_v28  ;;  %v1849_v45 = vadd.f32 %v1848_v37, %v1835_v34 }
 0x10d   :  { %v2128_v38 = vmul.f32 %v5272_v42, %v5272_v42 }
 0x110   :  { %v1862_v32 = vpop.f32.mrf.mxu2 }
 0x111   :  { %v1863_v48 = vadd.f32 %v1862_v32, %v1849_v45  ;;  %v1876_v41 = vpop.f32.mrf.mxu3 }
 0x113   :  { %v5274_v49 = vadd.f32 %v1876_v41, %v1863_v48 }
 0x115   :  { %v5280_v46 = vadd.f32 %v5274_v49, %v5272_v42  ;;  %v2130_v50 = vmul.f32 %v5274_v49, %v5274_v49 }
 0x117   :  { %v5284_v51 = vadd.f32 %v2130_v50, %v2128_v38 }
 0x120   :  { %v1888_v53 = vpop.f32.mrf.mxu0 }
 0x121   :  { %v1902_v55 = vpop.f32.mrf.mxu1  ;;  %v1889_v62 = vadd.f32 %v1888_v53, %v292_v60 }
 0x123   :  { %v1903_v0 = vadd.f32 %v1902_v55, %v1889_v62  ;;  %v2104_v55 = vrot.slane %v5280_v46, 4 }
 0x125   :  { %v2105_v62 = vadd.f32 %v2104_v55, %v5280_v46 }
 0x128   :  { %v1916_v56 = vpop.f32.mrf.mxu2  ;;  %v1890_v59 = vpop.f32.mrf.mxu0 }
 0x129   :  { %v1930_v57 = vpop.f32.mrf.mxu3  ;;  %v1904_v61 = vpop.f32.mrf.mxu1  ;;  %v1917_v3 = vadd.f32 %v1916_v56, %v1903_v0  ;;  %v1891_v4 = vadd.f32 %v1890_v59, %v292_v60 }
 0x12b   :  { %v1931_v33 = vadd.f32 %v1930_v57, %v1917_v3  ;;  %v1905_v5 = vadd.f32 %v1904_v61, %v1891_v4  ;;  %v2133_v57 = vrot.slane %v5284_v51, 4  ;;  %v2106_v3 = vrot.slane %v2105_v62, 2 }
 0x130   :  { %v1918_v63 = vpop.f32.mrf.mxu2 }
 0x131   :  { %v1932_v58 = vpop.f32.mrf.mxu3  ;;  %v1919_v8 = vadd.f32 %v1918_v63, %v1905_v5 }
 0x133   :  { %v1933_v54 = vadd.f32 %v1932_v58, %v1919_v8  ;;  %v2134_v58 = vadd.f32 %v2133_v57, %v5284_v51 }
 0x140   :  { %v1944_v1 = vpop.f32.mrf.mxu0 }
 0x141   :  { %v1958_v10 = vpop.f32.mrf.mxu1  ;;  %v1945_v31 = vadd.f32 %v1944_v1, %v1931_v33  ;;  %v2135_v33 = vrot.slane %v2134_v58, 2 }
 0x143   :  { %v1959_v43 = vadd.f32 %v1958_v10, %v1945_v31 }
 0x148   :  { %v1972_v52 = vpop.f32.mrf.mxu2  ;;  %v1946_v6 = vpop.f32.mrf.mxu0 }
 0x149   :  { %v1986_v39 = vpop.f32.mrf.mxu3  ;;  %v1960_v7 = vpop.f32.mrf.mxu1  ;;  %v1973_v9 = vadd.f32 %v1972_v52, %v1959_v43  ;;  %v1947_v47 = vadd.f32 %v1946_v6, %v1933_v54  ;;  %v2107_v6 = vadd.f32 %v2106_v3, %v2105_v62  ;;  %v2123_v54 = vlaneseq }
 0x14b   :  { %v1987_v11 = vadd.f32 %v1986_v39, %v1973_v9  ;;  %v1961_v13 = vadd.f32 %v1960_v7, %v1947_v47  ;;  %v2136_v7 = vadd.f32 %v2135_v33, %v2134_v58  ;;  %v2108_v43 = vrot.slane %v2107_v6, 1 }
 0x14c   :  { %vm2125_vm1 = vcmp.lt.s32.totalorder %v2123_v54, 256 }
 0x150   :  { %v1974_v44 = vpop.f32.mrf.mxu2 }
 0x151   :  { %v1988_v35 = vpop.f32.mrf.mxu3  ;;  %v1975_v16 = vadd.f32 %v1974_v44, %v1961_v13 }
 0x153   :  { %v1989_v21 = vadd.f32 %v1988_v35, %v1975_v16  ;;  %v2137_v35 = vrot.slane %v2136_v7, 1 }
 0x160   :  { %v2000_v36 = vpop.f32.mrf.mxu0 }
 0x161   :  { %v2014_v40 = vpop.f32.mrf.mxu1  ;;  %v2001_v14 = vadd.f32 %v2000_v36, %v1987_v11 }
 0x163   :  { %v2015_v19 = vadd.f32 %v2014_v40, %v2001_v14  ;;  %v2109_v40 = vadd.f32 %v2108_v43, %v2107_v6 }
 0x168   :  { %v2028_v12 = vpop.f32.mrf.mxu2  ;;  %v2002_v18 = vpop.f32.mrf.mxu0 }
 0x169   :  { %v2042_v15 = vpop.f32.mrf.mxu3  ;;  %v2016_v20 = vpop.f32.mrf.mxu1  ;;  %v2029_v22 = vadd.f32 %v2028_v12, %v2015_v19  ;;  %v2003_v23 = vadd.f32 %v2002_v18, %v1989_v21  ;;  %v2138_v12 = vadd.f32 %v2137_v35, %v2136_v7 }
 0x16b   :  { %v2043_v2 = vadd.f32 %v2042_v15, %v2029_v22  ;;  %v2017_v26 = vadd.f32 %v2016_v20, %v2003_v23 }
 0x170   :  { %v2030_v24 = vpop.f32.mrf.mxu2 }
 0x171   :  { %v2044_v25 = vpop.f32.mrf.mxu3  ;;  %v2031_v29 = vadd.f32 %v2030_v24, %v2017_v26 }
 0x173   :  { %v2045_v37 = vadd.f32 %v2044_v25, %v2031_v29 }
 0x180   :  { %v2056_v17 = vpop.f32.mrf.mxu0 }
 0x181   :  { %v2057_v27 = vadd.f32 %v2056_v17, %v2043_v2  ;;  %v2070_v28 = vpop.f32.mrf.mxu1 }
 0x183   :  { %v2071_v30 = vadd.f32 %v2070_v28, %v2057_v27 }
 0x188   :  { %v2084_v34 = vpop.f32.mrf.mxu2  ;;  %v2058_v48 = vpop.f32.mrf.mxu0 }
 0x189   :  { %v2085_v45 = vadd.f32 %v2084_v34, %v2071_v30  ;;  %v2098_v32 = vpop.f32.mrf.mxu3  ;;  %v2059_v38 = vadd.f32 %v2058_v48, %v2045_v37  ;;  %v2072_v53 = vpop.f32.mrf.mxu1 }
 0x18b   :  { %v2099_v41 = vadd.f32 %v2098_v32, %v2085_v45  ;;  %v2073_v56 = vadd.f32 %v2072_v53, %v2059_v38 }
 0x18d   :  { %v2152_v50 = vpack.c.bf16 %v2099_v41, %v5272_v42  ;;  %v2129_v0 = vmul.f32 %v2099_v41, %v2099_v41 }
 0x18f   :  { %2154 = vst [vmem:[%s5308_s3] sm:$0xff] %v2152_v50 }
 0x190   :  { %v2086_v59 = vpop.f32.mrf.mxu2 }
 0x191   :  { %v2087_v60 = vadd.f32 %v2086_v59, %v2073_v56  ;;  %v2100_v61 = vpop.f32.mrf.mxu3 }
 0x193   :  { %v2101_v63 = vadd.f32 %v2100_v61, %v2087_v60 }
 0x195   :  { %v2110_v42 = vadd.f32 %v2101_v63, %v2099_v41  ;;  %v2131_v1 = vmul.f32 %v2101_v63, %v2101_v63  ;;  %v2153_v10 = vpack.c.bf16 %v2101_v63, %v5274_v49 }
 0x197   :  { %v2111_v4 = vrot.slane %v2110_v42, 4  ;;  %v2139_v52 = vadd.f32 %v2131_v1, %v2129_v0  ;;  %2155 = vst [vmem:[%s5308_s3 + $0x8] sm:$0xff] %v2153_v10 }
 0x199   :  { %v2112_v39 = vadd.f32 %v2111_v4, %v2110_v42  ;;  %v2140_v5 = vrot.slane %v2139_v52, 4 }
 0x19b   :  { %v2113_v46 = vrot.slane %v2112_v39, 2  ;;  %v2141_v31 = vadd.f32 %v2140_v5, %v2139_v52 }
 0x19d   :  { %v2114_v51 = vadd.f32 %v2113_v46, %v2112_v39  ;;  %v2142_v8 = vrot.slane %v2141_v31, 2 }
 0x19f   :  { %v2115_v44 = vrot.slane %v2114_v51, 1  ;;  %v2143_v49 = vadd.f32 %v2142_v8, %v2141_v31 }
 0x1a1   :  { %v2116_v36 = vadd.f32 %v2115_v44, %v2114_v51  ;;  %v2144_v9 = vrot.slane %v2143_v49, 1 }
 0x1a3   :  { %v2119_v47 = vrot.slane %v2116_v36, 7  ;;  %v2145_v11 = vadd.f32 %v2144_v9, %v2143_v49 }
 0x1a5   :  { %v2121_v13 = vsel %vm2120_vm0, %v2109_v40, %v2119_v47  ;;  %v2148_v14 = vrot.slane %v2145_v11, 7 }
 0x1a6   :  { %2127 = vst.msk [vmem:[%s5309_s4] sm:$0x3] %vm2125_vm1, %v2121_v13 }
 0x1a7   :  { %v2149_v15 = vsel %vm2120_vm0, %v2138_v12, %v2148_v14 }
 0x1a8   :  { %2151 = vst.msk [vmem:[%s5310_s5] sm:$0x3] %vm2125_vm1, %v2149_v15 }

// kernel: discriminator_forward.15
= control target key start
LH: loop header
LB: loop body
LE: loop exit
PB: predicated region body
PF: predicated region fallthrough
CT: control target
= control target key end

     0   :  { %s5142_s1 = inlined_call_operand.vmem [shape: bf16[4096,128], index: 1, kind: input, shape index: {}]   ;;  %s5143_s0 = inlined_call_operand.vmem [shape: bf16[16,4096], index: 0, kind: input, shape index: {}]   ;;  %s5144_s2 = inlined_call_operand.vmem [shape: f32[1,128], index: 2, kind: input, shape index: {}]   ;;  %s5145_s3 = inlined_call_operand.vmem [shape: f32[16,128], index: 3, kind: output, shape index: {}]  }
   0x1   :  { %v3903_v0 = vld [vmem:[%s5142_s1 + $0x38] sm:$0xff]  ;;  %v3902_v4 = vld [vmem:[%s5142_s1 + $0x30] sm:$0xff]  ;;  %v3901_v8 = vld [vmem:[%s5142_s1 + $0x28] sm:$0xff] }
   0x2   :  { %v3911_v1 = vld [vmem:[%s5142_s1 + $0x78] sm:$0xff]  ;;  %2258 = vmatpush.bf16.msra.mxu0 %v3903_v0  ;;  %v3910_v5 = vld [vmem:[%s5142_s1 + $0x70] sm:$0xff]  ;;  %v3909_v9 = vld [vmem:[%s5142_s1 + $0x68] sm:$0xff] }
   0x3   :  { %v3919_v2 = vld [vmem:[%s5142_s1 + $0xb8] sm:$0xff]  ;;  %2272 = vmatpush.bf16.msra.mxu1 %v3911_v1  ;;  %v3918_v6 = vld [vmem:[%s5142_s1 + $0xb0] sm:$0xff]  ;;  %v3917_v10 = vld [vmem:[%s5142_s1 + $0xa8] sm:$0xff] }
   0x4   :  { %v3927_v3 = vld [vmem:[%s5142_s1 + $0xf8] sm:$0xff]  ;;  %2286 = vmatpush.bf16.msra.mxu2 %v3919_v2  ;;  %v3926_v7 = vld [vmem:[%s5142_s1 + $0xf0] sm:$0xff]  ;;  %v3925_v11 = vld [vmem:[%s5142_s1 + $0xe8] sm:$0xff] }
   0x5   :  { %2300 = vmatpush.bf16.msra.mxu3 %v3927_v3  ;;  %v3900_v12 = vld [vmem:[%s5142_s1 + $0x20] sm:$0xff]  ;;  %v3899_v16 = vld [vmem:[%s5142_s1 + $0x18] sm:$0xff]  ;;  %v3898_v20 = vld [vmem:[%s5142_s1 + $0x10] sm:$0xff] }
   0x6   :  { %2259 = vmatpush.bf16.msra.mxu0 %v3902_v4  ;;  %v3908_v13 = vld [vmem:[%s5142_s1 + $0x60] sm:$0xff]  ;;  %v3907_v17 = vld [vmem:[%s5142_s1 + $0x58] sm:$0xff]  ;;  %v3906_v21 = vld [vmem:[%s5142_s1 + $0x50] sm:$0xff] }
   0x7   :  { %2273 = vmatpush.bf16.msra.mxu1 %v3910_v5  ;;  %v3916_v14 = vld [vmem:[%s5142_s1 + $0xa0] sm:$0xff]  ;;  %v3915_v18 = vld [vmem:[%s5142_s1 + $0x98] sm:$0xff]  ;;  %v3914_v22 = vld [vmem:[%s5142_s1 + $0x90] sm:$0xff] }
   0x8   :  { %2287 = vmatpush.bf16.msra.mxu2 %v3918_v6  ;;  %v3924_v15 = vld [vmem:[%s5142_s1 + $0xe0] sm:$0xff]  ;;  %v3923_v19 = vld [vmem:[%s5142_s1 + $0xd8] sm:$0xff]  ;;  %v3922_v23 = vld [vmem:[%s5142_s1 + $0xd0] sm:$0xff] }
   0x9   :  { %2301 = vmatpush.bf16.msra.mxu3 %v3926_v7  ;;  %v3897_v24 = vld [vmem:[%s5142_s1 + $0x8] sm:$0xff]  ;;  %v3896_v28 = vld [vmem:[%s5142_s1] sm:$0xff]  ;;  %v3935_v32 = vld [vmem:[%s5142_s1 + $0x138] sm:$0xff] }
   0xa   :  { %2260 = vmatpush.bf16.msra.mxu0 %v3901_v8  ;;  %v3905_v25 = vld [vmem:[%s5142_s1 + $0x48] sm:$0xff]  ;;  %v3904_v29 = vld [vmem:[%s5142_s1 + $0x40] sm:$0xff]  ;;  %v3943_v33 = vld [vmem:[%s5142_s1 + $0x178] sm:$0xff] }
   0xb   :  { %2274 = vmatpush.bf16.msra.mxu1 %v3909_v9  ;;  %v3913_v26 = vld [vmem:[%s5142_s1 + $0x88] sm:$0xff]  ;;  %v3912_v30 = vld [vmem:[%s5142_s1 + $0x80] sm:$0xff]  ;;  %v3951_v42 = vld [vmem:[%s5142_s1 + $0x1b8] sm:$0xff] }
   0xc   :  { %2288 = vmatpush.bf16.msra.mxu2 %v3917_v10  ;;  %v3921_v27 = vld [vmem:[%s5142_s1 + $0xc8] sm:$0xff]  ;;  %v3920_v31 = vld [vmem:[%s5142_s1 + $0xc0] sm:$0xff]  ;;  %v3959_v43 = vld [vmem:[%s5142_s1 + $0x1f8] sm:$0xff] }
   0xd   :  { %2302 = vmatpush.bf16.msra.mxu3 %v3925_v11  ;;  %v2714_v34 = vld [vmem:[%s5143_s0] sm:$0xf]  ;;  %v2722_v36 = vld [vmem:[%s5143_s0 + $0x8] sm:$0xf]  ;;  %v3864_v38 = vld [vmem:[%s5143_s0 + $0x4] sm:$0xf] }
   0xe   :  { %2261 = vmatpush.bf16.msra.mxu0 %v3900_v12  ;;  %v3880_v35 = vld [vmem:[%s5143_s0 + $0x7c] sm:$0xf0]  ;;  %v3881_v37 = vld [vmem:[%s5143_s0 + $0x84] sm:$0xf0]  ;;  %v2716_v39 = vld [vmem:[%s5143_s0 + $0x80] sm:$0xf0] }
   0xf   :  { %2275 = vmatpush.bf16.msra.mxu1 %v3908_v13  ;;  %v3865_v40 = vld [vmem:[%s5143_s0 + $0xc] sm:$0xf]  ;;  %v2715_v44 = vor.u32 %v3880_v35, %v2714_v34  ;;  %v2723_v45 = vor.u32 %v3881_v37, %v2722_v36  ;;  %v2719_v46 = vor.u32 %v3864_v38, %v2716_v39  ;;  %v3934_v48 = vld [vmem:[%s5142_s1 + $0x130] sm:$0xff]  ;;  %v3932_v56 = vld [vmem:[%s5142_s1 + $0x120] sm:$0xff] }
  0x10   :  { %2289 = vmatpush.bf16.msra.mxu2 %v3916_v14  ;;  %v2724_v41 = vld [vmem:[%s5143_s0 + $0x88] sm:$0xf0]  ;;  %v3942_v49 = vld [vmem:[%s5142_s1 + $0x170] sm:$0xff]  ;;  %v3940_v57 = vld [vmem:[%s5142_s1 + $0x160] sm:$0xff] }
  0x11   :  { %2303 = vmatpush.bf16.msra.mxu3 %v3924_v15  ;;  %v2727_v47 = vor.u32 %v3865_v40, %v2724_v41  ;;  %v3950_v50 = vld [vmem:[%s5142_s1 + $0x1b0] sm:$0xff]  ;;  %v3933_v52 = vld [vmem:[%s5142_s1 + $0x128] sm:$0xff]  ;;  %v3948_v58 = vld [vmem:[%s5142_s1 + $0x1a0] sm:$0xff] }
  0x12   :  { %2262 = vmatpush.bf16.msra.mxu0 %v3899_v16  ;;  %v3958_v51 = vld [vmem:[%s5142_s1 + $0x1f0] sm:$0xff]  ;;  %v3941_v53 = vld [vmem:[%s5142_s1 + $0x168] sm:$0xff]  ;;  %v3956_v59 = vld [vmem:[%s5142_s1 + $0x1e0] sm:$0xff] }
  0x13   :  { %2276 = vmatpush.bf16.msra.mxu1 %v3907_v17  ;;  %v3949_v54 = vld [vmem:[%s5142_s1 + $0x1a8] sm:$0xff]  ;;  %v3931_v60 = vld [vmem:[%s5142_s1 + $0x118] sm:$0xff]  ;;  %v3930_v0 = vld [vmem:[%s5142_s1 + $0x110] sm:$0xff] }
  0x14   :  { %2290 = vmatpush.bf16.msra.mxu2 %v3915_v18  ;;  %v3957_v55 = vld [vmem:[%s5142_s1 + $0x1e8] sm:$0xff]  ;;  %v3939_v61 = vld [vmem:[%s5142_s1 + $0x158] sm:$0xff]  ;;  %v3938_v1 = vld [vmem:[%s5142_s1 + $0x150] sm:$0xff] }
  0x15   :  { %2304 = vmatpush.bf16.msra.mxu3 %v3923_v19  ;;  %v3947_v62 = vld [vmem:[%s5142_s1 + $0x198] sm:$0xff]  ;;  %v3946_v2 = vld [vmem:[%s5142_s1 + $0x190] sm:$0xff]  ;;  %v3929_v4 = vld [vmem:[%s5142_s1 + $0x108] sm:$0xff] }
  0x16   :  { %2263 = vmatpush.bf16.msra.mxu0 %v3898_v20  ;;  %v3955_v63 = vld [vmem:[%s5142_s1 + $0x1d8] sm:$0xff]  ;;  %v3954_v3 = vld [vmem:[%s5142_s1 + $0x1d0] sm:$0xff]  ;;  %v3937_v5 = vld [vmem:[%s5142_s1 + $0x148] sm:$0xff] }
  0x17   :  { %2277 = vmatpush.bf16.msra.mxu1 %v3906_v21  ;;  %v3945_v6 = vld [vmem:[%s5142_s1 + $0x188] sm:$0xff]  ;;  %v3928_v8 = vld [vmem:[%s5142_s1 + $0x100] sm:$0xff]  ;;  %v3967_v12 = vld [vmem:[%s5142_s1 + $0x238] sm:$0xff] }
  0x18   :  { %2291 = vmatpush.bf16.msra.mxu2 %v3914_v22  ;;  %v3953_v7 = vld [vmem:[%s5142_s1 + $0x1c8] sm:$0xff]  ;;  %v3936_v9 = vld [vmem:[%s5142_s1 + $0x140] sm:$0xff]  ;;  %v3975_v13 = vld [vmem:[%s5142_s1 + $0x278] sm:$0xff] }
  0x19   :  { %2305 = vmatpush.bf16.msra.mxu3 %v3922_v23  ;;  %v3944_v10 = vld [vmem:[%s5142_s1 + $0x180] sm:$0xff]  ;;  %v2730_v14 = vld [vmem:[%s5143_s0 + $0x10] sm:$0xf]  ;;  %v2738_v16 = vld [vmem:[%s5143_s0 + $0x18] sm:$0xf] }
  0x1a   :  { %2264 = vmatpush.bf16.msra.mxu0 %v3897_v24  ;;  %v3952_v11 = vld [vmem:[%s5142_s1 + $0x1c0] sm:$0xff]  ;;  %v3882_v15 = vld [vmem:[%s5143_s0 + $0x8c] sm:$0xf0]  ;;  %v3883_v17 = vld [vmem:[%s5143_s0 + $0x94] sm:$0xf0] }
  0x1b   :  { %2278 = vmatpush.bf16.msra.mxu1 %v3905_v25  ;;  %v3866_v18 = vld [vmem:[%s5143_s0 + $0x14] sm:$0xf]  ;;  %v3867_v20 = vld [vmem:[%s5143_s0 + $0x1c] sm:$0xf]  ;;  %v2731_v24 = vor.u32 %v3882_v15, %v2730_v14  ;;  %v2739_v25 = vor.u32 %v3883_v17, %v2738_v16  ;;  %v3981_v34 = vld [vmem:[%s5142_s1 + $0x2a8] sm:$0xff] }
  0x1c   :  { %2292 = vmatpush.bf16.msra.mxu2 %v3913_v26  ;;  %v2732_v19 = vld [vmem:[%s5143_s0 + $0x90] sm:$0xf0]  ;;  %v2740_v21 = vld [vmem:[%s5143_s0 + $0x98] sm:$0xf0]  ;;  %v3989_v35 = vld [vmem:[%s5142_s1 + $0x2e8] sm:$0xff] }
  0x1d   :  { %2306 = vmatpush.bf16.msra.mxu3 %v3921_v27  ;;  %v3983_v22 = vld [vmem:[%s5142_s1 + $0x2b8] sm:$0xff]  ;;  %v2735_v26 = vor.u32 %v3866_v18, %v2732_v19  ;;  %v2743_v27 = vor.u32 %v3867_v20, %v2740_v21  ;;  %v3964_v36 = vld [vmem:[%s5142_s1 + $0x220] sm:$0xff]  ;;  %v4013_v14 = vld [vmem:[%s5142_s1 + $0x3a8] sm:$0xff] }
  0x1e   :  { %2265 = vmatpush.bf16.msra.mxu0 %v3896_v28  ;;  %v3991_v23 = vld [vmem:[%s5142_s1 + $0x2f8] sm:$0xff]  ;;  %v3966_v28 = vld [vmem:[%s5142_s1 + $0x230] sm:$0xff]  ;;  %v3972_v37 = vld [vmem:[%s5142_s1 + $0x260] sm:$0xff] }
  0x1f   :  { %2279 = vmatpush.bf16.msra.mxu1 %v3904_v29  ;;  %v3974_v29 = vld [vmem:[%s5142_s1 + $0x270] sm:$0xff]  ;;  %v3980_v38 = vld [vmem:[%s5142_s1 + $0x2a0] sm:$0xff]  ;;  %v3963_v40 = vld [vmem:[%s5142_s1 + $0x218] sm:$0xff] }
  0x20   :  { %2293 = vmatpush.bf16.msra.mxu2 %v3912_v30  ;;  %v3982_v30 = vld [vmem:[%s5142_s1 + $0x2b0] sm:$0xff]  ;;  %v3988_v39 = vld [vmem:[%s5142_s1 + $0x2e0] sm:$0xff]  ;;  %v3971_v41 = vld [vmem:[%s5142_s1 + $0x258] sm:$0xff] }
  0x21   :  { %2307 = vmatpush.bf16.msra.mxu3 %v3920_v31  ;;  %2266 = vmatmul.bf16.vlgmr.msra.gmra.mxu0 %v2715_v44  ;;  %v3990_v31 = vld [vmem:[%s5142_s1 + $0x2f0] sm:$0xff]  ;;  %v4021_v15 = vld [vmem:[%s5142_s1 + $0x3e8] sm:$0xff]  ;;  %v3996_v16 = vld [vmem:[%s5142_s1 + $0x320] sm:$0xff] }
  0x22   :  { %2314 = vmatpush.bf16.msrb.mxu0 %v3935_v32  ;;  %2280 = vmatmul.bf16.vlgmr.msra.gmra.mxu1 %v2719_v46  ;;  %v3965_v32 = vld [vmem:[%s5142_s1 + $0x228] sm:$0xff]  ;;  %v3962_v44 = vld [vmem:[%s5142_s1 + $0x210] sm:$0xff]  ;;  %v4004_v17 = vld [vmem:[%s5142_s1 + $0x360] sm:$0xff] }
  0x23   :  { %2328 = vmatpush.bf16.msrb.mxu1 %v3943_v33  ;;  %2294 = vmatmul.bf16.vlgmr.msra.gmra.mxu2 %v2723_v45  ;;  %v3973_v33 = vld [vmem:[%s5142_s1 + $0x268] sm:$0xff]  ;;  %v3970_v45 = vld [vmem:[%s5142_s1 + $0x250] sm:$0xff]  ;;  %v4012_v18 = vld [vmem:[%s5142_s1 + $0x3a0] sm:$0xff] }
  0x24   :  { %2342 = vmatpush.bf16.msrb.mxu2 %v3951_v42  ;;  %2308 = vmatmul.bf16.vlgmr.msra.gmra.mxu3 %v2727_v47  ;;  %v3979_v42 = vld [vmem:[%s5142_s1 + $0x298] sm:$0xff]  ;;  %v3978_v46 = vld [vmem:[%s5142_s1 + $0x290] sm:$0xff]  ;;  %v4020_v19 = vld [vmem:[%s5142_s1 + $0x3e0] sm:$0xff] }
  0x25   :  { %2356 = vmatpush.bf16.msrb.mxu3 %v3959_v43  ;;  %v3987_v43 = vld [vmem:[%s5142_s1 + $0x2d8] sm:$0xff]  ;;  %v3986_v47 = vld [vmem:[%s5142_s1 + $0x2d0] sm:$0xff] }
  0x26   :  { %2315 = vmatpush.bf16.msrb.mxu0 %v3934_v48  ;;  %v3961_v48 = vld [vmem:[%s5142_s1 + $0x208] sm:$0xff]  ;;  %v3995_v20 = vld [vmem:[%s5142_s1 + $0x318] sm:$0xff] }
  0x27   :  { %2329 = vmatpush.bf16.msrb.mxu1 %v3942_v49  ;;  %v3969_v49 = vld [vmem:[%s5142_s1 + $0x248] sm:$0xff]  ;;  %v4003_v21 = vld [vmem:[%s5142_s1 + $0x358] sm:$0xff] }
  0x28   :  { %2343 = vmatpush.bf16.msrb.mxu2 %v3950_v50  ;;  %v3977_v50 = vld [vmem:[%s5142_s1 + $0x288] sm:$0xff] }
  0x29   :  { %2357 = vmatpush.bf16.msrb.mxu3 %v3958_v51  ;;  %v3985_v51 = vld [vmem:[%s5142_s1 + $0x2c8] sm:$0xff] }
  0x2a   :  { %2316 = vmatpush.bf16.msrb.mxu0 %v3933_v52  ;;  %v3960_v52 = vld [vmem:[%s5142_s1 + $0x200] sm:$0xff] }
  0x2b   :  { %2330 = vmatpush.bf16.msrb.mxu1 %v3941_v53  ;;  %v3968_v53 = vld [vmem:[%s5142_s1 + $0x240] sm:$0xff] }
  0x2c   :  { %2344 = vmatpush.bf16.msrb.mxu2 %v3949_v54  ;;  %v3976_v54 = vld [vmem:[%s5142_s1 + $0x280] sm:$0xff] }
  0x2d   :  { %2358 = vmatpush.bf16.msrb.mxu3 %v3957_v55  ;;  %v3984_v55 = vld [vmem:[%s5142_s1 + $0x2c0] sm:$0xff] }
  0x2e   :  { %2317 = vmatpush.bf16.msrb.mxu0 %v3932_v56  ;;  %v3999_v56 = vld [vmem:[%s5142_s1 + $0x338] sm:$0xff] }
  0x2f   :  { %2331 = vmatpush.bf16.msrb.mxu1 %v3940_v57  ;;  %v4007_v57 = vld [vmem:[%s5142_s1 + $0x378] sm:$0xff] }
  0x30   :  { %2345 = vmatpush.bf16.msrb.mxu2 %v3948_v58  ;;  %v2746_v58 = vld [vmem:[%s5143_s0 + $0x20] sm:$0xf] }
  0x31   :  { %2359 = vmatpush.bf16.msrb.mxu3 %v3956_v59  ;;  %v3884_v59 = vld [vmem:[%s5143_s0 + $0x9c] sm:$0xf0] }
  0x32   :  { %2318 = vmatpush.bf16.msrb.mxu0 %v3931_v60  ;;  %v2754_v60 = vld [vmem:[%s5143_s0 + $0x28] sm:$0xf] }
  0x33   :  { %2332 = vmatpush.bf16.msrb.mxu1 %v3939_v61  ;;  %v3885_v61 = vld [vmem:[%s5143_s0 + $0xa4] sm:$0xf0] }
  0x34   :  { %2346 = vmatpush.bf16.msrb.mxu2 %v3947_v62  ;;  %v3868_v62 = vld [vmem:[%s5143_s0 + $0x24] sm:$0xf] }
  0x35   :  { %2360 = vmatpush.bf16.msrb.mxu3 %v3955_v63  ;;  %v2748_v63 = vld [vmem:[%s5143_s0 + $0xa0] sm:$0xf0] }
  0x36   :  { %2319 = vmatpush.bf16.msrb.mxu0 %v3930_v0  ;;  %v3869_v0 = vld [vmem:[%s5143_s0 + $0x2c] sm:$0xf] }
  0x37   :  { %2333 = vmatpush.bf16.msrb.mxu1 %v3938_v1  ;;  %v2756_v1 = vld [vmem:[%s5143_s0 + $0xa8] sm:$0xf0] }
  0x38   :  { %2347 = vmatpush.bf16.msrb.mxu2 %v3946_v2  ;;  %v4015_v2 = vld [vmem:[%s5142_s1 + $0x3b8] sm:$0xff] }
  0x39   :  { %2361 = vmatpush.bf16.msrb.mxu3 %v3954_v3  ;;  %v4023_v3 = vld [vmem:[%s5142_s1 + $0x3f8] sm:$0xff] }
  0x3a   :  { %2320 = vmatpush.bf16.msrb.mxu0 %v3929_v4  ;;  %v2747_v4 = vor.u32 %v3884_v59, %v2746_v58  ;;  %v4045_v58 = vld [vmem:[%s5142_s1 + $0x4a8] sm:$0xff] }
  0x3b   :  { %2334 = vmatpush.bf16.msrb.mxu1 %v3937_v5  ;;  %v2755_v5 = vor.u32 %v3885_v61, %v2754_v60  ;;  %v4053_v59 = vld [vmem:[%s5142_s1 + $0x4e8] sm:$0xff]  ;;  %v4028_v60 = vld [vmem:[%s5142_s1 + $0x420] sm:$0xff] }
  0x3c   :  { %2348 = vmatpush.bf16.msrb.mxu2 %v3945_v6  ;;  %v2751_v6 = vor.u32 %v3868_v62, %v2748_v63  ;;  %v4036_v61 = vld [vmem:[%s5142_s1 + $0x460] sm:$0xff] }
  0x3d   :  { %2362 = vmatpush.bf16.msrb.mxu3 %v3953_v7  ;;  %v2759_v7 = vor.u32 %v3869_v0, %v2756_v1  ;;  %v4044_v62 = vld [vmem:[%s5142_s1 + $0x4a0] sm:$0xff]  ;;  %v4027_v0 = vld [vmem:[%s5142_s1 + $0x418] sm:$0xff] }
  0x3e   :  { %2321 = vmatpush.bf16.msrb.mxu0 %v3928_v8  ;;  %v3998_v8 = vld [vmem:[%s5142_s1 + $0x330] sm:$0xff]  ;;  %v4052_v63 = vld [vmem:[%s5142_s1 + $0x4e0] sm:$0xff]  ;;  %v4035_v1 = vld [vmem:[%s5142_s1 + $0x458] sm:$0xff] }
  0x3f   :  { %2335 = vmatpush.bf16.msrb.mxu1 %v3936_v9  ;;  %v4006_v9 = vld [vmem:[%s5142_s1 + $0x370] sm:$0xff] }
  0x40   :  { %2349 = vmatpush.bf16.msrb.mxu2 %v3944_v10  ;;  %v4014_v10 = vld [vmem:[%s5142_s1 + $0x3b0] sm:$0xff] }
  0x41   :  { %2363 = vmatpush.bf16.msrb.mxu3 %v3952_v11  ;;  %2322 = vmatmul.bf16.vlgmr.msrb.gmra.mxu0 %v2731_v24  ;;  %v4022_v11 = vld [vmem:[%s5142_s1 + $0x3f0] sm:$0xff] }
  0x42   :  { %2370 = vmatpush.bf16.msra.mxu0 %v3967_v12  ;;  %2336 = vmatmul.bf16.vlgmr.msrb.gmra.mxu1 %v2735_v26  ;;  %v3997_v12 = vld [vmem:[%s5142_s1 + $0x328] sm:$0xff]  ;;  %v3994_v24 = vld [vmem:[%s5142_s1 + $0x310] sm:$0xff] }
  0x43   :  { %2384 = vmatpush.bf16.msra.mxu1 %v3975_v13  ;;  %2350 = vmatmul.bf16.vlgmr.msrb.gmra.mxu2 %v2739_v25  ;;  %v4005_v13 = vld [vmem:[%s5142_s1 + $0x368] sm:$0xff]  ;;  %v4002_v25 = vld [vmem:[%s5142_s1 + $0x350] sm:$0xff] }
  0x44   :  { %2398 = vmatpush.bf16.msra.mxu2 %v3983_v22  ;;  %2364 = vmatmul.bf16.vlgmr.msrb.gmra.mxu3 %v2743_v27  ;;  %v4011_v22 = vld [vmem:[%s5142_s1 + $0x398] sm:$0xff]  ;;  %v4010_v26 = vld [vmem:[%s5142_s1 + $0x390] sm:$0xff] }
  0x45   :  { %2412 = vmatpush.bf16.msra.mxu3 %v3991_v23  ;;  %v4019_v23 = vld [vmem:[%s5142_s1 + $0x3d8] sm:$0xff]  ;;  %v4018_v27 = vld [vmem:[%s5142_s1 + $0x3d0] sm:$0xff] }
  0x46   :  { %2371 = vmatpush.bf16.msra.mxu0 %v3966_v28  ;;  %v3993_v28 = vld [vmem:[%s5142_s1 + $0x308] sm:$0xff] }
  0x47   :  { %2385 = vmatpush.bf16.msra.mxu1 %v3974_v29  ;;  %v4001_v29 = vld [vmem:[%s5142_s1 + $0x348] sm:$0xff] }
  0x48   :  { %2399 = vmatpush.bf16.msra.mxu2 %v3982_v30  ;;  %v4009_v30 = vld [vmem:[%s5142_s1 + $0x388] sm:$0xff] }
  0x49   :  { %2413 = vmatpush.bf16.msra.mxu3 %v3990_v31  ;;  %v4017_v31 = vld [vmem:[%s5142_s1 + $0x3c8] sm:$0xff] }
  0x4a   :  { %2372 = vmatpush.bf16.msra.mxu0 %v3965_v32  ;;  %v3992_v32 = vld [vmem:[%s5142_s1 + $0x300] sm:$0xff] }
  0x4b   :  { %2386 = vmatpush.bf16.msra.mxu1 %v3973_v33  ;;  %v4000_v33 = vld [vmem:[%s5142_s1 + $0x340] sm:$0xff] }
  0x4c   :  { %2400 = vmatpush.bf16.msra.mxu2 %v3981_v34  ;;  %v4008_v34 = vld [vmem:[%s5142_s1 + $0x380] sm:$0xff] }
  0x4d   :  { %2414 = vmatpush.bf16.msra.mxu3 %v3989_v35  ;;  %v4016_v35 = vld [vmem:[%s5142_s1 + $0x3c0] sm:$0xff] }
  0x4e   :  { %2373 = vmatpush.bf16.msra.mxu0 %v3964_v36  ;;  %v4031_v36 = vld [vmem:[%s5142_s1 + $0x438] sm:$0xff] }
  0x4f   :  { %2387 = vmatpush.bf16.msra.mxu1 %v3972_v37  ;;  %v4039_v37 = vld [vmem:[%s5142_s1 + $0x478] sm:$0xff] }
  0x50   :  { %2401 = vmatpush.bf16.msra.mxu2 %v3980_v38  ;;  %v2762_v38 = vld [vmem:[%s5143_s0 + $0x30] sm:$0xf] }
  0x51   :  { %2415 = vmatpush.bf16.msra.mxu3 %v3988_v39  ;;  %v3886_v39 = vld [vmem:[%s5143_s0 + $0xac] sm:$0xf0] }
  0x52   :  { %2374 = vmatpush.bf16.msra.mxu0 %v3963_v40  ;;  %v2770_v40 = vld [vmem:[%s5143_s0 + $0x38] sm:$0xf] }
  0x53   :  { %2388 = vmatpush.bf16.msra.mxu1 %v3971_v41  ;;  %v3887_v41 = vld [vmem:[%s5143_s0 + $0xb4] sm:$0xf0] }
  0x54   :  { %2402 = vmatpush.bf16.msra.mxu2 %v3979_v42  ;;  %v3870_v42 = vld [vmem:[%s5143_s0 + $0x34] sm:$0xf] }
  0x55   :  { %2416 = vmatpush.bf16.msra.mxu3 %v3987_v43  ;;  %v2764_v43 = vld [vmem:[%s5143_s0 + $0xb0] sm:$0xf0] }
  0x56   :  { %2375 = vmatpush.bf16.msra.mxu0 %v3962_v44  ;;  %v3871_v44 = vld [vmem:[%s5143_s0 + $0x3c] sm:$0xf] }
  0x57   :  { %2389 = vmatpush.bf16.msra.mxu1 %v3970_v45  ;;  %v2772_v45 = vld [vmem:[%s5143_s0 + $0xb8] sm:$0xf0] }
  0x58   :  { %2403 = vmatpush.bf16.msra.mxu2 %v3978_v46  ;;  %v4047_v46 = vld [vmem:[%s5142_s1 + $0x4b8] sm:$0xff] }
  0x59   :  { %2417 = vmatpush.bf16.msra.mxu3 %v3986_v47  ;;  %v4055_v47 = vld [vmem:[%s5142_s1 + $0x4f8] sm:$0xff] }
  0x5a   :  { %2376 = vmatpush.bf16.msra.mxu0 %v3961_v48  ;;  %v2763_v48 = vor.u32 %v3886_v39, %v2762_v38  ;;  %v4077_v38 = vld [vmem:[%s5142_s1 + $0x5a8] sm:$0xff] }
  0x5b   :  { %2390 = vmatpush.bf16.msra.mxu1 %v3969_v49  ;;  %v2771_v49 = vor.u32 %v3887_v41, %v2770_v40  ;;  %v4085_v39 = vld [vmem:[%s5142_s1 + $0x5e8] sm:$0xff]  ;;  %v4060_v40 = vld [vmem:[%s5142_s1 + $0x520] sm:$0xff] }
  0x5c   :  { %2404 = vmatpush.bf16.msra.mxu2 %v3977_v50  ;;  %v2767_v50 = vor.u32 %v3870_v42, %v2764_v43  ;;  %v4068_v41 = vld [vmem:[%s5142_s1 + $0x560] sm:$0xff] }
  0x5d   :  { %2418 = vmatpush.bf16.msra.mxu3 %v3985_v51  ;;  %v2775_v51 = vor.u32 %v3871_v44, %v2772_v45  ;;  %v4076_v42 = vld [vmem:[%s5142_s1 + $0x5a0] sm:$0xff]  ;;  %v4059_v44 = vld [vmem:[%s5142_s1 + $0x518] sm:$0xff] }
  0x5e   :  { %2377 = vmatpush.bf16.msra.mxu0 %v3960_v52  ;;  %v4030_v52 = vld [vmem:[%s5142_s1 + $0x430] sm:$0xff]  ;;  %v4084_v43 = vld [vmem:[%s5142_s1 + $0x5e0] sm:$0xff]  ;;  %v4067_v45 = vld [vmem:[%s5142_s1 + $0x558] sm:$0xff] }
  0x5f   :  { %2391 = vmatpush.bf16.msra.mxu1 %v3968_v53  ;;  %v4038_v53 = vld [vmem:[%s5142_s1 + $0x470] sm:$0xff] }
  0x60   :  { %2405 = vmatpush.bf16.msra.mxu2 %v3976_v54  ;;  %v4046_v54 = vld [vmem:[%s5142_s1 + $0x4b0] sm:$0xff] }
  0x61   :  { %2419 = vmatpush.bf16.msra.mxu3 %v3984_v55  ;;  %2378 = vmatmul.bf16.vlgmr.msra.gmra.mxu0 %v2747_v4  ;;  %v4054_v55 = vld [vmem:[%s5142_s1 + $0x4f0] sm:$0xff] }
  0x62   :  { %2426 = vmatpush.bf16.msrb.mxu0 %v3999_v56  ;;  %2392 = vmatmul.bf16.vlgmr.msra.gmra.mxu1 %v2751_v6  ;;  %v4029_v56 = vld [vmem:[%s5142_s1 + $0x428] sm:$0xff]  ;;  %v4026_v4 = vld [vmem:[%s5142_s1 + $0x410] sm:$0xff] }
  0x63   :  { %2440 = vmatpush.bf16.msrb.mxu1 %v4007_v57  ;;  %2406 = vmatmul.bf16.vlgmr.msra.gmra.mxu2 %v2755_v5  ;;  %v4037_v57 = vld [vmem:[%s5142_s1 + $0x468] sm:$0xff]  ;;  %v4034_v5 = vld [vmem:[%s5142_s1 + $0x450] sm:$0xff] }
  0x64   :  { %2454 = vmatpush.bf16.msrb.mxu2 %v4015_v2  ;;  %2420 = vmatmul.bf16.vlgmr.msra.gmra.mxu3 %v2759_v7  ;;  %v4043_v2 = vld [vmem:[%s5142_s1 + $0x498] sm:$0xff]  ;;  %v4042_v6 = vld [vmem:[%s5142_s1 + $0x490] sm:$0xff] }
  0x65   :  { %2468 = vmatpush.bf16.msrb.mxu3 %v4023_v3  ;;  %v4051_v3 = vld [vmem:[%s5142_s1 + $0x4d8] sm:$0xff]  ;;  %v4050_v7 = vld [vmem:[%s5142_s1 + $0x4d0] sm:$0xff] }
  0x66   :  { %2427 = vmatpush.bf16.msrb.mxu0 %v3998_v8  ;;  %v4025_v8 = vld [vmem:[%s5142_s1 + $0x408] sm:$0xff] }
  0x67   :  { %2441 = vmatpush.bf16.msrb.mxu1 %v4006_v9  ;;  %v4033_v9 = vld [vmem:[%s5142_s1 + $0x448] sm:$0xff] }
  0x68   :  { %2455 = vmatpush.bf16.msrb.mxu2 %v4014_v10  ;;  %v4041_v10 = vld [vmem:[%s5142_s1 + $0x488] sm:$0xff] }
  0x69   :  { %2469 = vmatpush.bf16.msrb.mxu3 %v4022_v11  ;;  %v4049_v11 = vld [vmem:[%s5142_s1 + $0x4c8] sm:$0xff] }
  0x6a   :  { %2428 = vmatpush.bf16.msrb.mxu0 %v3997_v12  ;;  %v4024_v12 = vld [vmem:[%s5142_s1 + $0x400] sm:$0xff] }
  0x6b   :  { %2442 = vmatpush.bf16.msrb.mxu1 %v4005_v13  ;;  %v4032_v13 = vld [vmem:[%s5142_s1 + $0x440] sm:$0xff] }
  0x6c   :  { %2456 = vmatpush.bf16.msrb.mxu2 %v4013_v14  ;;  %v4040_v14 = vld [vmem:[%s5142_s1 + $0x480] sm:$0xff] }
  0x6d   :  { %2470 = vmatpush.bf16.msrb.mxu3 %v4021_v15  ;;  %v4048_v15 = vld [vmem:[%s5142_s1 + $0x4c0] sm:$0xff] }
  0x6e   :  { %2429 = vmatpush.bf16.msrb.mxu0 %v3996_v16  ;;  %v4063_v16 = vld [vmem:[%s5142_s1 + $0x538] sm:$0xff] }
  0x6f   :  { %2443 = vmatpush.bf16.msrb.mxu1 %v4004_v17  ;;  %v4071_v17 = vld [vmem:[%s5142_s1 + $0x578] sm:$0xff] }
  0x70   :  { %2457 = vmatpush.bf16.msrb.mxu2 %v4012_v18  ;;  %v2778_v18 = vld [vmem:[%s5143_s0 + $0x40] sm:$0xf] }
  0x71   :  { %2471 = vmatpush.bf16.msrb.mxu3 %v4020_v19  ;;  %v3888_v19 = vld [vmem:[%s5143_s0 + $0xbc] sm:$0xf0] }
  0x72   :  { %2430 = vmatpush.bf16.msrb.mxu0 %v3995_v20  ;;  %v2786_v20 = vld [vmem:[%s5143_s0 + $0x48] sm:$0xf] }
  0x73   :  { %2444 = vmatpush.bf16.msrb.mxu1 %v4003_v21  ;;  %v3889_v21 = vld [vmem:[%s5143_s0 + $0xc4] sm:$0xf0] }
  0x74   :  { %2458 = vmatpush.bf16.msrb.mxu2 %v4011_v22  ;;  %v3872_v22 = vld [vmem:[%s5143_s0 + $0x44] sm:$0xf] }
  0x75   :  { %2472 = vmatpush.bf16.msrb.mxu3 %v4019_v23  ;;  %v2780_v23 = vld [vmem:[%s5143_s0 + $0xc0] sm:$0xf0] }
  0x76   :  { %2431 = vmatpush.bf16.msrb.mxu0 %v3994_v24  ;;  %v3873_v24 = vld [vmem:[%s5143_s0 + $0x4c] sm:$0xf] }
  0x77   :  { %2445 = vmatpush.bf16.msrb.mxu1 %v4002_v25  ;;  %v2788_v25 = vld [vmem:[%s5143_s0 + $0xc8] sm:$0xf0] }
  0x78   :  { %2459 = vmatpush.bf16.msrb.mxu2 %v4010_v26  ;;  %v4079_v26 = vld [vmem:[%s5142_s1 + $0x5b8] sm:$0xff] }
  0x79   :  { %2473 = vmatpush.bf16.msrb.mxu3 %v4018_v27  ;;  %v4087_v27 = vld [vmem:[%s5142_s1 + $0x5f8] sm:$0xff] }
  0x7a   :  { %2432 = vmatpush.bf16.msrb.mxu0 %v3993_v28  ;;  %v2779_v28 = vor.u32 %v3888_v19, %v2778_v18  ;;  %v4109_v18 = vld [vmem:[%s5142_s1 + $0x6a8] sm:$0xff] }
  0x7b   :  { %2446 = vmatpush.bf16.msrb.mxu1 %v4001_v29  ;;  %v2787_v29 = vor.u32 %v3889_v21, %v2786_v20  ;;  %v4117_v19 = vld [vmem:[%s5142_s1 + $0x6e8] sm:$0xff]  ;;  %v4092_v20 = vld [vmem:[%s5142_s1 + $0x620] sm:$0xff] }
  0x7c   :  { %2460 = vmatpush.bf16.msrb.mxu2 %v4009_v30  ;;  %v2783_v30 = vor.u32 %v3872_v22, %v2780_v23  ;;  %v4100_v21 = vld [vmem:[%s5142_s1 + $0x660] sm:$0xff] }
  0x7d   :  { %2474 = vmatpush.bf16.msrb.mxu3 %v4017_v31  ;;  %v2791_v31 = vor.u32 %v3873_v24, %v2788_v25  ;;  %v4108_v22 = vld [vmem:[%s5142_s1 + $0x6a0] sm:$0xff]  ;;  %v4091_v24 = vld [vmem:[%s5142_s1 + $0x618] sm:$0xff] }
  0x7e   :  { %2433 = vmatpush.bf16.msrb.mxu0 %v3992_v32  ;;  %v4062_v32 = vld [vmem:[%s5142_s1 + $0x530] sm:$0xff]  ;;  %v4116_v23 = vld [vmem:[%s5142_s1 + $0x6e0] sm:$0xff]  ;;  %v4099_v25 = vld [vmem:[%s5142_s1 + $0x658] sm:$0xff] }
  0x7f   :  { %2447 = vmatpush.bf16.msrb.mxu1 %v4000_v33  ;;  %v4070_v33 = vld [vmem:[%s5142_s1 + $0x570] sm:$0xff] }
  0x80   :  { %2461 = vmatpush.bf16.msrb.mxu2 %v4008_v34  ;;  %v4078_v34 = vld [vmem:[%s5142_s1 + $0x5b0] sm:$0xff] }
  0x81   :  { %2475 = vmatpush.bf16.msrb.mxu3 %v4016_v35  ;;  %2434 = vmatmul.bf16.vlgmr.msrb.gmra.mxu0 %v2763_v48  ;;  %v4086_v35 = vld [vmem:[%s5142_s1 + $0x5f0] sm:$0xff] }
  0x82   :  { %2482 = vmatpush.bf16.msra.mxu0 %v4031_v36  ;;  %2448 = vmatmul.bf16.vlgmr.msrb.gmra.mxu1 %v2767_v50  ;;  %v4061_v36 = vld [vmem:[%s5142_s1 + $0x528] sm:$0xff]  ;;  %v4058_v48 = vld [vmem:[%s5142_s1 + $0x510] sm:$0xff] }
  0x83   :  { %2496 = vmatpush.bf16.msra.mxu1 %v4039_v37  ;;  %2462 = vmatmul.bf16.vlgmr.msrb.gmra.mxu2 %v2771_v49  ;;  %v4069_v37 = vld [vmem:[%s5142_s1 + $0x568] sm:$0xff]  ;;  %v4066_v49 = vld [vmem:[%s5142_s1 + $0x550] sm:$0xff] }
  0x84   :  { %2510 = vmatpush.bf16.msra.mxu2 %v4047_v46  ;;  %2476 = vmatmul.bf16.vlgmr.msrb.gmra.mxu3 %v2775_v51  ;;  %v4075_v46 = vld [vmem:[%s5142_s1 + $0x598] sm:$0xff]  ;;  %v4074_v50 = vld [vmem:[%s5142_s1 + $0x590] sm:$0xff] }
  0x85   :  { %2524 = vmatpush.bf16.msra.mxu3 %v4055_v47  ;;  %v4083_v47 = vld [vmem:[%s5142_s1 + $0x5d8] sm:$0xff]  ;;  %v4082_v51 = vld [vmem:[%s5142_s1 + $0x5d0] sm:$0xff] }
  0x86   :  { %2483 = vmatpush.bf16.msra.mxu0 %v4030_v52  ;;  %v4057_v52 = vld [vmem:[%s5142_s1 + $0x508] sm:$0xff] }
  0x87   :  { %2497 = vmatpush.bf16.msra.mxu1 %v4038_v53  ;;  %v4065_v53 = vld [vmem:[%s5142_s1 + $0x548] sm:$0xff] }
  0x88   :  { %2511 = vmatpush.bf16.msra.mxu2 %v4046_v54  ;;  %v4073_v54 = vld [vmem:[%s5142_s1 + $0x588] sm:$0xff] }
  0x89   :  { %2525 = vmatpush.bf16.msra.mxu3 %v4054_v55  ;;  %v4081_v55 = vld [vmem:[%s5142_s1 + $0x5c8] sm:$0xff] }
  0x8a   :  { %2484 = vmatpush.bf16.msra.mxu0 %v4029_v56  ;;  %v4056_v56 = vld [vmem:[%s5142_s1 + $0x500] sm:$0xff] }
  0x8b   :  { %2498 = vmatpush.bf16.msra.mxu1 %v4037_v57  ;;  %v4064_v57 = vld [vmem:[%s5142_s1 + $0x540] sm:$0xff] }
  0x8c   :  { %2512 = vmatpush.bf16.msra.mxu2 %v4045_v58  ;;  %v4072_v58 = vld [vmem:[%s5142_s1 + $0x580] sm:$0xff] }
  0x8d   :  { %2526 = vmatpush.bf16.msra.mxu3 %v4053_v59  ;;  %v4080_v59 = vld [vmem:[%s5142_s1 + $0x5c0] sm:$0xff] }
  0x8e   :  { %2485 = vmatpush.bf16.msra.mxu0 %v4028_v60  ;;  %v4095_v60 = vld [vmem:[%s5142_s1 + $0x638] sm:$0xff] }
  0x8f   :  { %2499 = vmatpush.bf16.msra.mxu1 %v4036_v61  ;;  %v4103_v61 = vld [vmem:[%s5142_s1 + $0x678] sm:$0xff] }
  0x90   :  { %2513 = vmatpush.bf16.msra.mxu2 %v4044_v62  ;;  %v2794_v62 = vld [vmem:[%s5143_s0 + $0x50] sm:$0xf] }
  0x91   :  { %2527 = vmatpush.bf16.msra.mxu3 %v4052_v63  ;;  %v3890_v63 = vld [vmem:[%s5143_s0 + $0xcc] sm:$0xf0] }
  0x92   :  { %2486 = vmatpush.bf16.msra.mxu0 %v4027_v0  ;;  %v2802_v0 = vld [vmem:[%s5143_s0 + $0x58] sm:$0xf] }
  0x93   :  { %2500 = vmatpush.bf16.msra.mxu1 %v4035_v1  ;;  %v3891_v1 = vld [vmem:[%s5143_s0 + $0xd4] sm:$0xf0] }
  0x94   :  { %2514 = vmatpush.bf16.msra.mxu2 %v4043_v2  ;;  %v3874_v2 = vld [vmem:[%s5143_s0 + $0x54] sm:$0xf] }
  0x95   :  { %2528 = vmatpush.bf16.msra.mxu3 %v4051_v3  ;;  %v2796_v3 = vld [vmem:[%s5143_s0 + $0xd0] sm:$0xf0] }
  0x96   :  { %2487 = vmatpush.bf16.msra.mxu0 %v4026_v4  ;;  %v3875_v4 = vld [vmem:[%s5143_s0 + $0x5c] sm:$0xf] }
  0x97   :  { %2501 = vmatpush.bf16.msra.mxu1 %v4034_v5  ;;  %v2804_v5 = vld [vmem:[%s5143_s0 + $0xd8] sm:$0xf0] }
  0x98   :  { %2515 = vmatpush.bf16.msra.mxu2 %v4042_v6  ;;  %v4111_v6 = vld [vmem:[%s5142_s1 + $0x6b8] sm:$0xff] }
  0x99   :  { %2529 = vmatpush.bf16.msra.mxu3 %v4050_v7  ;;  %v4119_v7 = vld [vmem:[%s5142_s1 + $0x6f8] sm:$0xff] }
  0x9a   :  { %2488 = vmatpush.bf16.msra.mxu0 %v4025_v8  ;;  %v2795_v8 = vor.u32 %v3890_v63, %v2794_v62  ;;  %v4141_v62 = vld [vmem:[%s5142_s1 + $0x7a8] sm:$0xff] }
  0x9b   :  { %2502 = vmatpush.bf16.msra.mxu1 %v4033_v9  ;;  %v2803_v9 = vor.u32 %v3891_v1, %v2802_v0  ;;  %v4149_v63 = vld [vmem:[%s5142_s1 + $0x7e8] sm:$0xff]  ;;  %v4124_v0 = vld [vmem:[%s5142_s1 + $0x720] sm:$0xff] }
  0x9c   :  { %2516 = vmatpush.bf16.msra.mxu2 %v4041_v10  ;;  %v2799_v10 = vor.u32 %v3874_v2, %v2796_v3  ;;  %v4132_v1 = vld [vmem:[%s5142_s1 + $0x760] sm:$0xff] }
  0x9d   :  { %2530 = vmatpush.bf16.msra.mxu3 %v4049_v11  ;;  %v2807_v11 = vor.u32 %v3875_v4, %v2804_v5  ;;  %v4140_v2 = vld [vmem:[%s5142_s1 + $0x7a0] sm:$0xff]  ;;  %v4123_v4 = vld [vmem:[%s5142_s1 + $0x718] sm:$0xff] }
  0x9e   :  { %2489 = vmatpush.bf16.msra.mxu0 %v4024_v12  ;;  %v4094_v12 = vld [vmem:[%s5142_s1 + $0x630] sm:$0xff]  ;;  %v4148_v3 = vld [vmem:[%s5142_s1 + $0x7e0] sm:$0xff]  ;;  %v4131_v5 = vld [vmem:[%s5142_s1 + $0x758] sm:$0xff] }
  0x9f   :  { %2503 = vmatpush.bf16.msra.mxu1 %v4032_v13  ;;  %v4102_v13 = vld [vmem:[%s5142_s1 + $0x670] sm:$0xff] }
  0xa0   :  { %2517 = vmatpush.bf16.msra.mxu2 %v4040_v14  ;;  %v4110_v14 = vld [vmem:[%s5142_s1 + $0x6b0] sm:$0xff] }
  0xa1   :  { %2531 = vmatpush.bf16.msra.mxu3 %v4048_v15  ;;  %2490 = vmatmul.bf16.vlgmr.msra.gmra.mxu0 %v2779_v28  ;;  %v4118_v15 = vld [vmem:[%s5142_s1 + $0x6f0] sm:$0xff] }
  0xa2   :  { %2538 = vmatpush.bf16.msrb.mxu0 %v4063_v16  ;;  %2504 = vmatmul.bf16.vlgmr.msra.gmra.mxu1 %v2783_v30  ;;  %v4093_v16 = vld [vmem:[%s5142_s1 + $0x628] sm:$0xff]  ;;  %v4090_v28 = vld [vmem:[%s5142_s1 + $0x610] sm:$0xff] }
  0xa3   :  { %2552 = vmatpush.bf16.msrb.mxu1 %v4071_v17  ;;  %2518 = vmatmul.bf16.vlgmr.msra.gmra.mxu2 %v2787_v29  ;;  %v4101_v17 = vld [vmem:[%s5142_s1 + $0x668] sm:$0xff]  ;;  %v4098_v29 = vld [vmem:[%s5142_s1 + $0x650] sm:$0xff] }
  0xa4   :  { %2566 = vmatpush.bf16.msrb.mxu2 %v4079_v26  ;;  %2532 = vmatmul.bf16.vlgmr.msra.gmra.mxu3 %v2791_v31  ;;  %v4107_v26 = vld [vmem:[%s5142_s1 + $0x698] sm:$0xff]  ;;  %v4106_v30 = vld [vmem:[%s5142_s1 + $0x690] sm:$0xff] }
  0xa5   :  { %2580 = vmatpush.bf16.msrb.mxu3 %v4087_v27  ;;  %v4115_v27 = vld [vmem:[%s5142_s1 + $0x6d8] sm:$0xff]  ;;  %v4114_v31 = vld [vmem:[%s5142_s1 + $0x6d0] sm:$0xff] }
  0xa6   :  { %2539 = vmatpush.bf16.msrb.mxu0 %v4062_v32  ;;  %v4089_v32 = vld [vmem:[%s5142_s1 + $0x608] sm:$0xff] }
  0xa7   :  { %2553 = vmatpush.bf16.msrb.mxu1 %v4070_v33  ;;  %v4097_v33 = vld [vmem:[%s5142_s1 + $0x648] sm:$0xff] }
  0xa8   :  { %2567 = vmatpush.bf16.msrb.mxu2 %v4078_v34  ;;  %v4105_v34 = vld [vmem:[%s5142_s1 + $0x688] sm:$0xff] }
  0xa9   :  { %2581 = vmatpush.bf16.msrb.mxu3 %v4086_v35  ;;  %v4113_v35 = vld [vmem:[%s5142_s1 + $0x6c8] sm:$0xff] }
  0xaa   :  { %2540 = vmatpush.bf16.msrb.mxu0 %v4061_v36  ;;  %v4088_v36 = vld [vmem:[%s5142_s1 + $0x600] sm:$0xff] }
  0xab   :  { %2554 = vmatpush.bf16.msrb.mxu1 %v4069_v37  ;;  %v4096_v37 = vld [vmem:[%s5142_s1 + $0x640] sm:$0xff] }
  0xac   :  { %2568 = vmatpush.bf16.msrb.mxu2 %v4077_v38  ;;  %v4104_v38 = vld [vmem:[%s5142_s1 + $0x680] sm:$0xff] }
  0xad   :  { %2582 = vmatpush.bf16.msrb.mxu3 %v4085_v39  ;;  %v4112_v39 = vld [vmem:[%s5142_s1 + $0x6c0] sm:$0xff] }
  0xae   :  { %2541 = vmatpush.bf16.msrb.mxu0 %v4060_v40  ;;  %v4127_v40 = vld [vmem:[%s5142_s1 + $0x738] sm:$0xff] }
  0xaf   :  { %2555 = vmatpush.bf16.msrb.mxu1 %v4068_v41  ;;  %v4135_v41 = vld [vmem:[%s5142_s1 + $0x778] sm:$0xff] }
  0xb0   :  { %2569 = vmatpush.bf16.msrb.mxu2 %v4076_v42  ;;  %v2810_v42 = vld [vmem:[%s5143_s0 + $0x60] sm:$0xf] }
  0xb1   :  { %2583 = vmatpush.bf16.msrb.mxu3 %v4084_v43  ;;  %v3892_v43 = vld [vmem:[%s5143_s0 + $0xdc] sm:$0xf0] }
  0xb2   :  { %2542 = vmatpush.bf16.msrb.mxu0 %v4059_v44  ;;  %v2818_v44 = vld [vmem:[%s5143_s0 + $0x68] sm:$0xf] }
  0xb3   :  { %2556 = vmatpush.bf16.msrb.mxu1 %v4067_v45  ;;  %v3893_v45 = vld [vmem:[%s5143_s0 + $0xe4] sm:$0xf0] }
  0xb4   :  { %2570 = vmatpush.bf16.msrb.mxu2 %v4075_v46  ;;  %v3876_v46 = vld [vmem:[%s5143_s0 + $0x64] sm:$0xf] }
  0xb5   :  { %2584 = vmatpush.bf16.msrb.mxu3 %v4083_v47  ;;  %v2812_v47 = vld [vmem:[%s5143_s0 + $0xe0] sm:$0xf0] }
  0xb6   :  { %2543 = vmatpush.bf16.msrb.mxu0 %v4058_v48  ;;  %v3877_v48 = vld [vmem:[%s5143_s0 + $0x6c] sm:$0xf] }
  0xb7   :  { %2557 = vmatpush.bf16.msrb.mxu1 %v4066_v49  ;;  %v2820_v49 = vld [vmem:[%s5143_s0 + $0xe8] sm:$0xf0] }
  0xb8   :  { %2571 = vmatpush.bf16.msrb.mxu2 %v4074_v50  ;;  %v4143_v50 = vld [vmem:[%s5142_s1 + $0x7b8] sm:$0xff] }
  0xb9   :  { %2585 = vmatpush.bf16.msrb.mxu3 %v4082_v51  ;;  %v4151_v51 = vld [vmem:[%s5142_s1 + $0x7f8] sm:$0xff] }
  0xba   :  { %2544 = vmatpush.bf16.msrb.mxu0 %v4057_v52  ;;  %v2811_v52 = vor.u32 %v3892_v43, %v2810_v42 }
  0xbb   :  { %2558 = vmatpush.bf16.msrb.mxu1 %v4065_v53  ;;  %v2819_v53 = vor.u32 %v3893_v45, %v2818_v44 }
  0xbc   :  { %2572 = vmatpush.bf16.msrb.mxu2 %v4073_v54  ;;  %v2815_v54 = vor.u32 %v3876_v46, %v2812_v47  ;;  %v4152_v46 = vld [vmem:[%s5144_s2] ss:$0 sm:$0xff] }
  0xbd   :  { %2586 = vmatpush.bf16.msrb.mxu3 %v4081_v55  ;;  %v2823_v55 = vor.u32 %v3877_v48, %v2820_v49 }
  0xbe   :  { %2545 = vmatpush.bf16.msrb.mxu0 %v4056_v56  ;;  %v4126_v56 = vld [vmem:[%s5142_s1 + $0x730] sm:$0xff] }
  0xbf   :  { %2559 = vmatpush.bf16.msrb.mxu1 %v4064_v57  ;;  %v4134_v57 = vld [vmem:[%s5142_s1 + $0x770] sm:$0xff] }
  0xc0   :  { %2573 = vmatpush.bf16.msrb.mxu2 %v4072_v58  ;;  %v4142_v58 = vld [vmem:[%s5142_s1 + $0x7b0] sm:$0xff] }
  0xc1   :  { %2587 = vmatpush.bf16.msrb.mxu3 %v4080_v59  ;;  %2546 = vmatmul.bf16.vlgmr.msrb.gmra.mxu0 %v2795_v8  ;;  %v4150_v59 = vld [vmem:[%s5142_s1 + $0x7f0] sm:$0xff] }
  0xc2   :  { %2594 = vmatpush.bf16.msra.mxu0 %v4095_v60  ;;  %2560 = vmatmul.bf16.vlgmr.msrb.gmra.mxu1 %v2799_v10  ;;  %v4125_v60 = vld [vmem:[%s5142_s1 + $0x728] sm:$0xff]  ;;  %v4122_v8 = vld [vmem:[%s5142_s1 + $0x710] sm:$0xff] }
  0xc3   :  { %2608 = vmatpush.bf16.msra.mxu1 %v4103_v61  ;;  %2574 = vmatmul.bf16.vlgmr.msrb.gmra.mxu2 %v2803_v9  ;;  %v4133_v61 = vld [vmem:[%s5142_s1 + $0x768] sm:$0xff]  ;;  %v4130_v9 = vld [vmem:[%s5142_s1 + $0x750] sm:$0xff] }
  0xc4   :  { %2622 = vmatpush.bf16.msra.mxu2 %v4111_v6  ;;  %2588 = vmatmul.bf16.vlgmr.msrb.gmra.mxu3 %v2807_v11  ;;  %v4139_v6 = vld [vmem:[%s5142_s1 + $0x798] sm:$0xff]  ;;  %v4138_v10 = vld [vmem:[%s5142_s1 + $0x790] sm:$0xff] }
  0xc5   :  { %2636 = vmatpush.bf16.msra.mxu3 %v4119_v7  ;;  %v4147_v7 = vld [vmem:[%s5142_s1 + $0x7d8] sm:$0xff]  ;;  %v4146_v11 = vld [vmem:[%s5142_s1 + $0x7d0] sm:$0xff] }
  0xc6   :  { %2595 = vmatpush.bf16.msra.mxu0 %v4094_v12  ;;  %v4121_v12 = vld [vmem:[%s5142_s1 + $0x708] sm:$0xff] }
  0xc7   :  { %2609 = vmatpush.bf16.msra.mxu1 %v4102_v13  ;;  %v4129_v13 = vld [vmem:[%s5142_s1 + $0x748] sm:$0xff] }
  0xc8   :  { %2623 = vmatpush.bf16.msra.mxu2 %v4110_v14  ;;  %v4137_v14 = vld [vmem:[%s5142_s1 + $0x788] sm:$0xff] }
  0xc9   :  { %2637 = vmatpush.bf16.msra.mxu3 %v4118_v15  ;;  %v4145_v15 = vld [vmem:[%s5142_s1 + $0x7c8] sm:$0xff] }
  0xca   :  { %2596 = vmatpush.bf16.msra.mxu0 %v4093_v16  ;;  %v4120_v16 = vld [vmem:[%s5142_s1 + $0x700] sm:$0xff] }
  0xcb   :  { %2610 = vmatpush.bf16.msra.mxu1 %v4101_v17  ;;  %v4128_v17 = vld [vmem:[%s5142_s1 + $0x740] sm:$0xff] }
  0xcc   :  { %2624 = vmatpush.bf16.msra.mxu2 %v4109_v18  ;;  %v4136_v18 = vld [vmem:[%s5142_s1 + $0x780] sm:$0xff] }
  0xcd   :  { %2638 = vmatpush.bf16.msra.mxu3 %v4117_v19  ;;  %v4144_v19 = vld [vmem:[%s5142_s1 + $0x7c0] sm:$0xff] }
  0xce   :  { %2597 = vmatpush.bf16.msra.mxu0 %v4092_v20  ;;  %v2826_v20 = vld [vmem:[%s5143_s0 + $0x70] sm:$0xf] }
  0xcf   :  { %2611 = vmatpush.bf16.msra.mxu1 %v4100_v21  ;;  %v3894_v21 = vld [vmem:[%s5143_s0 + $0xec] sm:$0xf0] }
  0xd0   :  { %2625 = vmatpush.bf16.msra.mxu2 %v4108_v22  ;;  %v3878_v22 = vld [vmem:[%s5143_s0 + $0x74] sm:$0xf] }
  0xd1   :  { %2639 = vmatpush.bf16.msra.mxu3 %v4116_v23  ;;  %v2828_v23 = vld [vmem:[%s5143_s0 + $0xf0] sm:$0xf0] }
  0xd2   :  { %2598 = vmatpush.bf16.msra.mxu0 %v4091_v24  ;;  %v2834_v24 = vld [vmem:[%s5143_s0 + $0x78] sm:$0xf] }
  0xd3   :  { %2612 = vmatpush.bf16.msra.mxu1 %v4099_v25  ;;  %v3895_v25 = vld [vmem:[%s5143_s0 + $0xf4] sm:$0xf0] }
  0xd4   :  { %2626 = vmatpush.bf16.msra.mxu2 %v4107_v26  ;;  %v3879_v26 = vld [vmem:[%s5143_s0 + $0x7c] sm:$0xf] }
  0xd5   :  { %2640 = vmatpush.bf16.msra.mxu3 %v4115_v27  ;;  %v2836_v27 = vld [vmem:[%s5143_s0 + $0xf8] sm:$0xf0] }
  0xd6   :  { %2599 = vmatpush.bf16.msra.mxu0 %v4090_v28  ;;  %v2827_v28 = vor.u32 %v3894_v21, %v2826_v20 }
  0xd7   :  { %2613 = vmatpush.bf16.msra.mxu1 %v4098_v29  ;;  %v2831_v29 = vor.u32 %v3878_v22, %v2828_v23 }
  0xd8   :  { %2627 = vmatpush.bf16.msra.mxu2 %v4106_v30  ;;  %v2267_v30 = vpop.f32.mrf.mxu0 }
  0xd9   :  { %2641 = vmatpush.bf16.msra.mxu3 %v4114_v31  ;;  %v2835_v31 = vor.u32 %v3895_v25, %v2834_v24 }
  0xda   :  { %2600 = vmatpush.bf16.msra.mxu0 %v4089_v32  ;;  %v2839_v32 = vor.u32 %v3879_v26, %v2836_v27 }
  0xdb   :  { %2614 = vmatpush.bf16.msra.mxu1 %v4097_v33  ;;  %v2281_v33 = vpop.f32.mrf.mxu1 }
  0xdc   :  { %2628 = vmatpush.bf16.msra.mxu2 %v4105_v34  ;;  %v2295_v34 = vpop.f32.mrf.mxu2 }
  0xdd   :  { %2642 = vmatpush.bf16.msra.mxu3 %v4113_v35  ;;  %v2309_v35 = vpop.f32.mrf.mxu3 }
  0xde   :  { %2601 = vmatpush.bf16.msra.mxu0 %v4088_v36 }
  0xdf   :  { %2615 = vmatpush.bf16.msra.mxu1 %v4096_v37 }
  0xe0   :  { %2629 = vmatpush.bf16.msra.mxu2 %v4104_v38  ;;  %v2269_v36 = vpop.f32.mrf.mxu0 }
  0xe1   :  { %2643 = vmatpush.bf16.msra.mxu3 %v4112_v39  ;;  %2602 = vmatmul.bf16.vlgmr.msra.gmra.mxu0 %v2811_v52 }
  0xe2   :  { %2650 = vmatpush.bf16.msrb.mxu0 %v4127_v40  ;;  %2616 = vmatmul.bf16.vlgmr.msra.gmra.mxu1 %v2815_v54 }
  0xe3   :  { %2664 = vmatpush.bf16.msrb.mxu1 %v4135_v41  ;;  %2630 = vmatmul.bf16.vlgmr.msra.gmra.mxu2 %v2819_v53  ;;  %v2283_v37 = vpop.f32.mrf.mxu1 }
  0xe4   :  { %2678 = vmatpush.bf16.msrb.mxu2 %v4143_v50  ;;  %2644 = vmatmul.bf16.vlgmr.msra.gmra.mxu3 %v2823_v55  ;;  %v2297_v38 = vpop.f32.mrf.mxu2  ;;  %v2268_v50 = vadd.f32 %v4152_v46, %v2267_v30 }
  0xe5   :  { %2692 = vmatpush.bf16.msrb.mxu3 %v4151_v51  ;;  %v2311_v39 = vpop.f32.mrf.mxu3 }
  0xe6   :  { %2651 = vmatpush.bf16.msrb.mxu0 %v4126_v56  ;;  %v2282_v52 = vadd.f32 %v2281_v33, %v2268_v50 }
  0xe7   :  { %2665 = vmatpush.bf16.msrb.mxu1 %v4134_v57  ;;  %v2270_v57 = vadd.f32 %v4152_v46, %v2269_v36 }
  0xe8   :  { %2679 = vmatpush.bf16.msrb.mxu2 %v4142_v58  ;;  %v2323_v40 = vpop.f32.mrf.mxu0  ;;  %v2296_v55 = vadd.f32 %v2295_v34, %v2282_v52 }
  0xe9   :  { %2693 = vmatpush.bf16.msrb.mxu3 %v4150_v59 }
  0xea   :  { %2652 = vmatpush.bf16.msrb.mxu0 %v4125_v60  ;;  %v2310_v59 = vadd.f32 %v2309_v35, %v2296_v55  ;;  %v2284_v60 = vadd.f32 %v2283_v37, %v2270_v57 }
  0xeb   :  { %2666 = vmatpush.bf16.msrb.mxu1 %v4133_v61  ;;  %v2337_v41 = vpop.f32.mrf.mxu1 }
  0xec   :  { %2680 = vmatpush.bf16.msrb.mxu2 %v4141_v62  ;;  %v2351_v42 = vpop.f32.mrf.mxu2 }
  0xed   :  { %2694 = vmatpush.bf16.msrb.mxu3 %v4149_v63  ;;  %v2365_v43 = vpop.f32.mrf.mxu3  ;;  %v2324_v63 = vadd.f32 %v2323_v40, %v2310_v59 }
  0xee   :  { %2653 = vmatpush.bf16.msrb.mxu0 %v4124_v0 }
  0xef   :  { %2667 = vmatpush.bf16.msrb.mxu1 %v4132_v1  ;;  %v2298_v1 = vadd.f32 %v2297_v38, %v2284_v60 }
  0xf0   :  { %2681 = vmatpush.bf16.msrb.mxu2 %v4140_v2  ;;  %v2325_v44 = vpop.f32.mrf.mxu0 }
  0xf1   :  { %2695 = vmatpush.bf16.msrb.mxu3 %v4148_v3  ;;  %v2338_v3 = vadd.f32 %v2337_v41, %v2324_v63 }
  0xf2   :  { %2654 = vmatpush.bf16.msrb.mxu0 %v4123_v4  ;;  %v2312_v4 = vadd.f32 %v2311_v39, %v2298_v1 }
  0xf3   :  { %2668 = vmatpush.bf16.msrb.mxu1 %v4131_v5  ;;  %v2339_v45 = vpop.f32.mrf.mxu1 }
  0xf4   :  { %2682 = vmatpush.bf16.msrb.mxu2 %v4139_v6  ;;  %v2353_v47 = vpop.f32.mrf.mxu2 }
  0xf5   :  { %2696 = vmatpush.bf16.msrb.mxu3 %v4147_v7  ;;  %v2367_v48 = vpop.f32.mrf.mxu3  ;;  %v2352_v7 = vadd.f32 %v2351_v42, %v2338_v3 }
  0xf6   :  { %2655 = vmatpush.bf16.msrb.mxu0 %v4122_v8  ;;  %v2326_v8 = vadd.f32 %v2325_v44, %v2312_v4 }
  0xf7   :  { %2669 = vmatpush.bf16.msrb.mxu1 %v4130_v9 }
  0xf8   :  { %2683 = vmatpush.bf16.msrb.mxu2 %v4138_v10  ;;  %v2379_v49 = vpop.f32.mrf.mxu0  ;;  %v2366_v10 = vadd.f32 %v2365_v43, %v2352_v7 }
  0xf9   :  { %2697 = vmatpush.bf16.msrb.mxu3 %v4146_v11 }
  0xfa   :  { %2656 = vmatpush.bf16.msrb.mxu0 %v4121_v12  ;;  %v2340_v12 = vadd.f32 %v2339_v45, %v2326_v8 }
  0xfb   :  { %2670 = vmatpush.bf16.msrb.mxu1 %v4129_v13  ;;  %v2393_v51 = vpop.f32.mrf.mxu1  ;;  %v2380_v13 = vadd.f32 %v2379_v49, %v2366_v10 }
  0xfc   :  { %2684 = vmatpush.bf16.msrb.mxu2 %v4137_v14  ;;  %v2407_v53 = vpop.f32.mrf.mxu2  ;;  %v2354_v14 = vadd.f32 %v2353_v47, %v2340_v12 }
  0xfd   :  { %2698 = vmatpush.bf16.msrb.mxu3 %v4145_v15  ;;  %v2421_v54 = vpop.f32.mrf.mxu3 }
  0xfe   :  { %2657 = vmatpush.bf16.msrb.mxu0 %v4120_v16 }
  0xff   :  { %2671 = vmatpush.bf16.msrb.mxu1 %v4128_v17  ;;  %v2394_v17 = vadd.f32 %v2393_v51, %v2380_v13 }
 0x100   :  { %2685 = vmatpush.bf16.msrb.mxu2 %v4136_v18  ;;  %v2381_v56 = vpop.f32.mrf.mxu0 }
 0x101   :  { %2699 = vmatpush.bf16.msrb.mxu3 %v4144_v19  ;;  %2658 = vmatmul.bf16.vlgmr.msrb.gmra.mxu0 %v2827_v28  ;;  %v2368_v19 = vadd.f32 %v2367_v48, %v2354_v14  ;;  %v2408_v20 = vadd.f32 %v2407_v53, %v2394_v17 }
 0x102   :  { %2672 = vmatmul.bf16.vlgmr.msrb.gmra.mxu1 %v2831_v29 }
 0x103   :  { %2686 = vmatmul.bf16.vlgmr.msrb.gmra.mxu2 %v2835_v31  ;;  %v2395_v58 = vpop.f32.mrf.mxu1  ;;  %v2382_v22 = vadd.f32 %v2381_v56, %v2368_v19  ;;  %v2422_v23 = vadd.f32 %v2421_v54, %v2408_v20 }
 0x104   :  { %2700 = vmatmul.bf16.vlgmr.msrb.gmra.mxu3 %v2839_v32  ;;  %v2409_v61 = vpop.f32.mrf.mxu2 }
 0x105   :  { %v2423_v62 = vpop.f32.mrf.mxu3  ;;  %v2396_v26 = vadd.f32 %v2395_v58, %v2382_v22 }
 0x107   :  { %v2410_v28 = vadd.f32 %v2409_v61, %v2396_v26 }
 0x108   :  { %v2435_v0 = vpop.f32.mrf.mxu0 }
 0x109   :  { %v2436_v27 = vadd.f32 %v2435_v0, %v2422_v23  ;;  %v2424_v32 = vadd.f32 %v2423_v62, %v2410_v28 }
 0x10b   :  { %v2449_v2 = vpop.f32.mrf.mxu1 }
 0x10c   :  { %v2463_v5 = vpop.f32.mrf.mxu2  ;;  %v2450_v30 = vadd.f32 %v2449_v2, %v2436_v27 }
 0x10d   :  { %v2477_v6 = vpop.f32.mrf.mxu3 }
 0x10e   :  { %v2464_v33 = vadd.f32 %v2463_v5, %v2450_v30 }
 0x110   :  { %v2437_v9 = vpop.f32.mrf.mxu0  ;;  %v2478_v37 = vadd.f32 %v2477_v6, %v2464_v33 }
 0x111   :  { %v2438_v34 = vadd.f32 %v2437_v9, %v2424_v32 }
 0x113   :  { %v2451_v11 = vpop.f32.mrf.mxu1 }
 0x114   :  { %v2465_v15 = vpop.f32.mrf.mxu2  ;;  %v2452_v39 = vadd.f32 %v2451_v11, %v2438_v34 }
 0x115   :  { %v2479_v16 = vpop.f32.mrf.mxu3 }
 0x116   :  { %v2466_v42 = vadd.f32 %v2465_v15, %v2452_v39 }
 0x118   :  { %v2480_v46 = vadd.f32 %v2479_v16, %v2466_v42 }
 0x11e   :  { %v2491_v18 = vpop.f32.mrf.mxu0 }
 0x11f   :  { %v2505_v21 = vpop.f32.mrf.mxu1  ;;  %v2492_v40 = vadd.f32 %v2491_v18, %v2478_v37 }
 0x121   :  { %v2506_v43 = vadd.f32 %v2505_v21, %v2492_v40 }
 0x126   :  { %v2519_v24 = vpop.f32.mrf.mxu2  ;;  %v2493_v29 = vpop.f32.mrf.mxu0 }
 0x127   :  { %v2533_v25 = vpop.f32.mrf.mxu3  ;;  %v2507_v31 = vpop.f32.mrf.mxu1  ;;  %v2520_v47 = vadd.f32 %v2519_v24, %v2506_v43  ;;  %v2494_v48 = vadd.f32 %v2493_v29, %v2480_v46 }
 0x129   :  { %v2534_v50 = vadd.f32 %v2533_v25, %v2520_v47  ;;  %v2508_v52 = vadd.f32 %v2507_v31, %v2494_v48 }
 0x12e   :  { %v2521_v35 = vpop.f32.mrf.mxu2 }
 0x12f   :  { %v2535_v36 = vpop.f32.mrf.mxu3  ;;  %v2522_v54 = vadd.f32 %v2521_v35, %v2508_v52 }
 0x131   :  { %v2536_v59 = vadd.f32 %v2535_v36, %v2522_v54 }
 0x13e   :  { %v2547_v38 = vpop.f32.mrf.mxu0 }
 0x13f   :  { %v2561_v41 = vpop.f32.mrf.mxu1  ;;  %v2548_v53 = vadd.f32 %v2547_v38, %v2534_v50 }
 0x141   :  { %v2562_v57 = vadd.f32 %v2561_v41, %v2548_v53 }
 0x146   :  { %v2575_v44 = vpop.f32.mrf.mxu2  ;;  %v2549_v49 = vpop.f32.mrf.mxu0 }
 0x147   :  { %v2589_v45 = vpop.f32.mrf.mxu3  ;;  %v2563_v51 = vpop.f32.mrf.mxu1  ;;  %v2576_v60 = vadd.f32 %v2575_v44, %v2562_v57  ;;  %v2550_v62 = vadd.f32 %v2549_v49, %v2536_v59 }
 0x149   :  { %v2590_v63 = vadd.f32 %v2589_v45, %v2576_v60  ;;  %v2564_v2 = vadd.f32 %v2563_v51, %v2550_v62 }
 0x14e   :  { %v2577_v55 = vpop.f32.mrf.mxu2 }
 0x14f   :  { %v2591_v56 = vpop.f32.mrf.mxu3  ;;  %v2578_v4 = vadd.f32 %v2577_v55, %v2564_v2 }
 0x151   :  { %v2592_v8 = vadd.f32 %v2591_v56, %v2578_v4 }
 0x15e   :  { %v2603_v58 = vpop.f32.mrf.mxu0 }
 0x15f   :  { %v2617_v61 = vpop.f32.mrf.mxu1  ;;  %v2604_v3 = vadd.f32 %v2603_v58, %v2590_v63 }
 0x161   :  { %v2618_v6 = vadd.f32 %v2617_v61, %v2604_v3 }
 0x166   :  { %v2631_v0 = vpop.f32.mrf.mxu2  ;;  %v2605_v5 = vpop.f32.mrf.mxu0 }
 0x167   :  { %v2645_v1 = vpop.f32.mrf.mxu3  ;;  %v2619_v7 = vpop.f32.mrf.mxu1  ;;  %v2632_v9 = vadd.f32 %v2631_v0, %v2618_v6  ;;  %v2606_v10 = vadd.f32 %v2605_v5, %v2592_v8 }
 0x169   :  { %v2646_v13 = vadd.f32 %v2645_v1, %v2632_v9  ;;  %v2620_v15 = vadd.f32 %v2619_v7, %v2606_v10 }
 0x16e   :  { %v2633_v11 = vpop.f32.mrf.mxu2 }
 0x16f   :  { %v2647_v12 = vpop.f32.mrf.mxu3  ;;  %v2634_v18 = vadd.f32 %v2633_v11, %v2620_v15 }
 0x171   :  { %v2648_v22 = vadd.f32 %v2647_v12, %v2634_v18 }
 0x17e   :  { %v2659_v14 = vpop.f32.mrf.mxu0 }
 0x17f   :  { %v2660_v16 = vadd.f32 %v2659_v14, %v2646_v13  ;;  %v2673_v17 = vpop.f32.mrf.mxu1 }
 0x181   :  { %v2674_v19 = vadd.f32 %v2673_v17, %v2660_v16 }
 0x186   :  { %v2687_v20 = vpop.f32.mrf.mxu2  ;;  %v2661_v24 = vpop.f32.mrf.mxu0 }
 0x187   :  { %v2701_v21 = vpop.f32.mrf.mxu3  ;;  %v2688_v23 = vadd.f32 %v2687_v20, %v2674_v19  ;;  %v2662_v26 = vadd.f32 %v2661_v24, %v2648_v22  ;;  %v2675_v27 = vpop.f32.mrf.mxu1 }
 0x189   :  { %v2702_v25 = vadd.f32 %v2701_v21, %v2688_v23  ;;  %v2676_v28 = vadd.f32 %v2675_v27, %v2662_v26 }
 0x18b   :  { %2706 = vst [vmem:[%s5145_s3] sm:$0xff] %v2702_v25 }
 0x18e   :  { %v2689_v29 = vpop.f32.mrf.mxu2 }
 0x18f   :  { %v2690_v30 = vadd.f32 %v2689_v29, %v2676_v28  ;;  %v2703_v31 = vpop.f32.mrf.mxu3 }
 0x191   :  { %v2704_v32 = vadd.f32 %v2703_v31, %v2690_v30 }
 0x193   :  { %2707 = vst [vmem:[%s5145_s3 + $0x8] sm:$0xff] %v2704_v32 }

</bundles_post_ra>
